<compile_context>
chip_gen: v5e
topology: v5e:2x2
jax: 0.10.0
libtpu: 0.0.40
codegen_flags: <defaults>
</compile_context>

<pallas_src>
import jax
import jax.numpy as jnp
from jax.experimental import pallas as pl
from jax.experimental.pallas import tpu as pltpu

# TransformerEncoder defaults: inner_dim=8, heads=8, projection_dim=8, model_depth=1
INPUT_DIM = 16
OUTPUT_DIM = 4
INNER_DIM = 8                      # transformer feature dim (== heads -> head_dim == 1)
DEPTH = 8                          # projection_dim -> sequence length after AngleEmbedding
HEADS = 8
LN_EPS = 1e-5
FLAT = DEPTH * INNER_DIM           # 64  : token slab width, col = d*8 + p
EXP = DEPTH * DEPTH * INNER_DIM    # 512 : attention slab width, col = i*64 + j*8 + h
PAD_OUT = 128                      # lane-dense padded output width (real outputs in cols 0..3)


def _erf(z):
    # Abramowitz & Stegun 7.1.26 (|err| < 1.5e-7); matches F.gelu (exact) to ~f32 precision.
    a1, a2, a3, a4, a5 = (0.254829592, -0.284496736, 1.421413741,
                          -1.453152027, 1.061405429)
    p = 0.3275911
    s = jnp.where(z >= 0.0, 1.0, -1.0)
    az = jnp.abs(z)
    t = 1.0 / (1.0 + p * az)
    poly = ((((a5 * t + a4) * t + a3) * t + a2) * t + a1) * t
    return s * (1.0 - poly * jnp.exp(-az * az))


def _gelu_exact(z):
    return 0.5 * z * (1.0 + _erf(z * 0.7071067811865476))


def encoder_kernel(x_ref, wemb_ref, wslab_ref, rexp_ref, vec_ref, fp_ref, out_ref):
    # TODO(synk): SelfAttention source is not in the reference file; implemented as
    # standard bias-free scaled-dot-product MHA with output projection (head_dim == 1).
    f32 = jnp.float32
    F = FLAT

    def wblk(i):                                   # (64, 64) block i of the packed weight slab
        return wslab_ref[pl.ds(i * F, F), :]

    def vrow(i):                                   # (1, 64) packed gain / bias vector i
        return vec_ref[pl.ds(i, 1), :]

    # ---- AngleEmbedding, fused into two (tb, 16) @ (16, 64) matmuls ----
    x = x_ref[...]
    tok = (jnp.dot(jnp.sin(x), wemb_ref[pl.ds(0, INPUT_DIM), :],
                   preferred_element_type=f32)
           + jnp.dot(jnp.cos(x), wemb_ref[pl.ds(INPUT_DIM, INPUT_DIM), :],
                     preferred_element_type=f32))              # (tb, 64), col = d*8 + p

    gm = wblk(7)                                   # block-diag group-mean matrix

    def layer_norm(v, g, b):
        mu = jnp.dot(v, gm, preferred_element_type=f32)        # per-token mean, broadcast
        c = v - mu
        var = jnp.dot(c * c, gm, preferred_element_type=f32)
        return c * jax.lax.rsqrt(var + LN_EPS) * g + b

    # ---- self-attention (pre-norm, residual); head_dim == 1 so softmax scale == 1 ----
    xn = layer_norm(tok, vrow(0), vrow(1))
    q = jnp.dot(xn, wblk(0), preferred_element_type=f32)       # (tb, 64), col = i*8 + h
    k = jnp.dot(xn, wblk(1), preferred_element_type=f32)
    v = jnp.dot(xn, wblk(2), preferred_element_type=f32)

    rq = rexp_ref[pl.ds(0, F), :]                  # (64, 512): replicate (i, h) over keys j
    rk = rexp_ref[pl.ds(F, F), :]                  # (64, 512): replicate (j, h) over queries i
    go = wslab_ref[pl.ds(8 * F, EXP), :]           # (512, 64): sum over keys j  (== rq.T)

    q_big = jnp.dot(q, rq, preferred_element_type=f32)         # (tb, 512) -> q[b, i*8+h]
    k_big = jnp.dot(k, rk, preferred_element_type=f32)         # (tb, 512) -> k[b, j*8+h]
    v_big = jnp.dot(v, rk, preferred_element_type=f32)

    s = q_big * k_big                                          # scores for every (i, j, head)
    s = s - jnp.max(s, axis=-1, keepdims=True)                 # per-row const -> softmax-invariant
    p = jnp.exp(s)
    denom = jnp.dot(p, go, preferred_element_type=f32)         # (tb, 64): sum_j exp(q_ih k_jh)
    # Fold 1/denom after the key reduction: sum_j (p/denom) v == (sum_j p v) / denom.
    o = (jnp.dot(p * v_big, go, preferred_element_type=f32)
         * pl.reciprocal(denom, approx=True))                  # (tb, 64), col = i*8 + h
    tok = tok + jnp.dot(o, wblk(3), preferred_element_type=f32)

    # ---- GEGLU feed-forward (pre-norm, residual) ----
    xn2 = layer_norm(tok, vrow(2), vrow(3))
    hx = jnp.dot(xn2, wblk(4), preferred_element_type=f32) + vrow(4)
    hg = jnp.dot(xn2, wblk(5), preferred_element_type=f32) + vrow(5)
    tok = tok + jnp.dot(_gelu_exact(hg) * hx, wblk(6),
                        preferred_element_type=f32) + vrow(6)

    # ---- rearrange 'b d p -> b (d p)' is a no-op here; final Linear, lane-dense padded ----
    fpw = fp_ref[pl.ds(0, F), :]                   # (64, 128)
    fpb = fp_ref[pl.ds(F, 1), :]                   # (1, 128)
    out_ref[...] = jnp.dot(tok, fpw, preferred_element_type=f32) + fpb


def _pack_params(params):
    """Pack all module weights into 5 constant operands matching the flat token layout."""
    f32 = jnp.float32
    D, P, F = DEPTH, INNER_DIM, FLAT
    eye_d = jnp.eye(D, dtype=f32)
    eye_p = jnp.eye(P, dtype=f32)
    ones_d = jnp.ones((D,), f32)

    # AngleEmbedding fused: tok[b, d*8+p] = sum_i sin(x)[b,i] w1[d,0] w2[p,i]
    #                                      + sum_i cos(x)[b,i] w1[d,1] w2[p,i]
    w1, w2 = params["w1"].astype(f32), params["w2"].astype(f32)
    we_sin = jnp.einsum('d,pi->idp', w1[:, 0], w2).reshape(INPUT_DIM, F)
    we_cos = jnp.einsum('d,pi->idp', w1[:, 1], w2).reshape(INPUT_DIM, F)
    w_emb = jnp.concatenate([we_sin, we_cos], axis=0)           # (32, 64)

    def bd(w_out_in):   # torch Linear weight (out,in) -> (64,64) block-diag of w.T
        return jnp.kron(eye_d, w_out_in.astype(f32).T)

    gm = jnp.kron(eye_d, jnp.full((P, P), 1.0 / P, f32))        # LayerNorm group mean

    # Attention replicate / reduce constants; expanded column = i*64 + j*8 + h.
    rq = jnp.einsum('ai,bh,j->abijh', eye_d, eye_p, ones_d).reshape(F, EXP)
    rk = jnp.einsum('aj,bh,i->abijh', eye_d, eye_p, ones_d).reshape(F, EXP)
    go = rq.T                                                   # (512, 64)

    w_slab = jnp.concatenate([
        bd(params["wq"]), bd(params["wk"]), bd(params["wv"]), bd(params["wo"]),
        bd(params["ff1_w"][:P]), bd(params["ff1_w"][P:]), bd(params["ff2_w"]),
        gm, go], axis=0)                                        # (1024, 64)

    rexp = jnp.concatenate([rq, rk], axis=0)                    # (128, 512)

    def tile_vec(v):            # column d*8+p holds v[p]
        return jnp.tile(v.astype(f32), D)

    vec_slab = jnp.stack([
        tile_vec(params["ln1_g"]), tile_vec(params["ln1_b"]),
        tile_vec(params["ln2_g"]), tile_vec(params["ln2_b"]),
        tile_vec(params["ff1_b"][:P]), tile_vec(params["ff1_b"][P:]),
        tile_vec(params["ff2_b"]),
        jnp.zeros((F,), f32)], axis=0)                          # (8, 64): row i = vector i

    fp_slab = jnp.zeros((F + 8, PAD_OUT), f32)                  # rows 0..63 weight, row 64 bias
    fp_slab = fp_slab.at[:F, :OUTPUT_DIM].set(params["fp_w"].astype(f32).T)
    fp_slab = fp_slab.at[F, :OUTPUT_DIM].set(params["fp_b"].astype(f32))
    return w_emb, w_slab, rexp, vec_slab, fp_slab


def _round_up(n, m):
    return ((n + m - 1) // m) * m


def transformer_encoder_forward(x, params, *, batch_tile=None):
    b, in_dim = x.shape
    assert in_dim == INPUT_DIM
    if batch_tile is None:
        # Large tiles amortize the ~0.35us/grid-step overhead; capped at 512 rows so the
        # per-step VMEM footprint (~10 KiB/row of live intermediates) fits every TPU
        # generation's scoped VMEM, and big batches still give >=2 parallel steps (v7x 2 TCs).
        batch_tile = min(512, _round_up(b, 8))
    # Pad arbitrary batch sizes up to a tile multiple (padded rows are computed and discarded).
    b_pad = _round_up(b, batch_tile)
    if b_pad != b:
        x = jnp.pad(x, ((0, b_pad - b), (0, 0)))

    w_emb, w_slab, rexp, vec_slab, fp_slab = _pack_params(params)

    out_padded = pl.pallas_call(
        encoder_kernel,
        out_shape=jax.ShapeDtypeStruct((b_pad, PAD_OUT), jnp.float32),
        grid=(b_pad // batch_tile,),
        in_specs=[
            pl.BlockSpec((batch_tile, INPUT_DIM), lambda i: (i, 0)),
            pl.BlockSpec(w_emb.shape, lambda i: (0, 0)),
            pl.BlockSpec(w_slab.shape, lambda i: (0, 0)),
            pl.BlockSpec(rexp.shape, lambda i: (0, 0)),
            pl.BlockSpec(vec_slab.shape, lambda i: (0, 0)),
            pl.BlockSpec(fp_slab.shape, lambda i: (0, 0)),
        ],
        out_specs=pl.BlockSpec((batch_tile, PAD_OUT), lambda i: (i, 0)),
        compiler_params=pltpu.CompilerParams(
            dimension_semantics=("parallel",),
            vmem_limit_bytes=32 * 1024 * 1024,
        ),
    )(x, w_emb, w_slab, rexp, vec_slab, fp_slab)
    return out_padded[:b, :OUTPUT_DIM]


def init_params(key):
    ks = jax.random.split(key, 16)

    def lin_w(k, out_f, in_f):
        bound = 1.0 / (in_f ** 0.5)
        return jax.random.uniform(k, (out_f, in_f), jnp.float32, -bound, bound)

    def lin_b(k, out_f, in_f):
        bound = 1.0 / (in_f ** 0.5)
        return jax.random.uniform(k, (out_f,), jnp.float32, -bound, bound)

    d, s = INNER_DIM, DEPTH
    return {
        "w1": lin_w(ks[0], s, 2),                  # AngleEmbedding.linear_layer_1 (no bias)
        "w2": lin_w(ks[1], d, INPUT_DIM),          # AngleEmbedding.linear_layer_2 (no bias)
        "ln1_g": 1.0 + 0.1 * jax.random.normal(ks[2], (d,), jnp.float32),
        "ln1_b": 0.1 * jax.random.normal(ks[3], (d,), jnp.float32),
        "wq": lin_w(ks[4], d, d),
        "wk": lin_w(ks[5], d, d),
        "wv": lin_w(ks[6], d, d),
        "wo": lin_w(ks[7], d, d),
        "ln2_g": 1.0 + 0.1 * jax.random.normal(ks[8], (d,), jnp.float32),
        "ln2_b": 0.1 * jax.random.normal(ks[9], (d,), jnp.float32),
        "ff1_w": lin_w(ks[10], 2 * d, d),          # Linear(dim, 2*dim), then GEGLU
        "ff1_b": lin_b(ks[11], 2 * d, d),
        "ff2_w": lin_w(ks[12], d, d),
        "ff2_b": lin_b(ks[13], d, d),
        "fp_w": lin_w(ks[14], OUTPUT_DIM, d * s),  # final_projection
        "fp_b": lin_b(ks[15], OUTPUT_DIM, d * s),
    }


def reference_forward(x, params):
    """Pure-JAX reproduction of the PyTorch module (for verification)."""
    sin_x, cos_x = jnp.sin(x), jnp.cos(x)
    xa = jnp.stack([sin_x, cos_x], axis=-1)                      # (B, I, 2)
    p = jnp.einsum('bik,dk->bid', xa, params["w1"])              # (B, I, DEPTH)
    p = jnp.transpose(p, (0, 2, 1))                              # (B, DEPTH, I)
    h = jnp.einsum('bdi,ei->bde', p, params["w2"])               # (B, DEPTH, INNER)

    def ln(v, g, bta):
        mu = v.mean(-1, keepdims=True)
        var = ((v - mu) ** 2).mean(-1, keepdims=True)
        return (v - mu) / jnp.sqrt(var + LN_EPS) * g + bta

    xn = ln(h, params["ln1_g"], params["ln1_b"])
    q = xn @ params["wq"].T
    k = xn @ params["wk"].T
    v = xn @ params["wv"].T
    bsz, seq, dim = q.shape
    hd = dim // HEADS
    q4 = q.reshape(bsz, seq, HEADS, hd)
    k4 = k.reshape(bsz, seq, HEADS, hd)
    v4 = v.reshape(bsz, seq, HEADS, hd)
    scores = jnp.einsum('bihd,bjhd->bhij', q4, k4) / (hd ** 0.5)
    attn = jax.nn.softmax(scores, axis=-1)
    o = jnp.einsum('bhij,bjhd->bihd', attn, v4).reshape(bsz, seq, dim)
    h = h + o @ params["wo"].T

    xn2 = ln(h, params["ln2_g"], params["ln2_b"])
    ffh = xn2 @ params["ff1_w"].T + params["ff1_b"]
    hx, gate = jnp.split(ffh, 2, axis=-1)
    h = h + (jax.nn.gelu(gate, approximate=False) * hx) @ params["ff2_w"].T + params["ff2_b"]

    flat = h.reshape(bsz, seq * dim)                             # rearrange 'b d p -> b (d p)'
    return flat @ params["fp_w"].T + params["fp_b"]


if __name__ == "__main__":
    key = jax.random.PRNGKey(0)
    pkey, xkey = jax.random.split(key)
    params = init_params(pkey)
    batch = 128
    x = jax.random.normal(xkey, (batch, INPUT_DIM), jnp.float32)

    # batch_tile=64 -> 2 parallel grid steps (exercises the multi-step / megacore path).
    out = transformer_encoder_forward(x, params, batch_tile=64)
    out = jax.block_until_ready(out)
    assert out.shape == (batch, OUTPUT_DIM)

    ref = reference_forward(x, params)
    err = float(jnp.max(jnp.abs(out - ref)))
    if not err < 2e-3:
        raise AssertionError(f"kernel/reference mismatch, max abs err = {err}")
    print("KERNEL_OK")
</pallas_src>

<mosaic_0001>
module attributes {stable_mosaic.version = 11 : i64} {
  func.func @encoder_kernel(%arg0: i32, %arg1: memref<64x16xf32, #tpu.memory_space<vmem>>, %arg2: memref<32x64xf32, #tpu.memory_space<vmem>>, %arg3: memref<1024x64xf32, #tpu.memory_space<vmem>>, %arg4: memref<128x512xf32, #tpu.memory_space<vmem>>, %arg5: memref<8x64xf32, #tpu.memory_space<vmem>>, %arg6: memref<72x128xf32, #tpu.memory_space<vmem>>, %arg7: memref<64x128xf32, #tpu.memory_space<vmem>>) attributes {dimension_semantics = [#tpu.dimension_semantics<parallel>], iteration_bounds = array<i64: 2>, scalar_prefetch = 0 : i64, scratch_operands = 0 : i64, tpu.core_type = #tpu.core_type<tc>, window_params = [{transform_indices = @transform_0, window_bounds = array<i64: 64, 16>}, {pipeline_mode = #tpu.pipeline_mode<synchronous>, transform_indices = @transform_1, window_bounds = array<i64: 32, 64>}, {pipeline_mode = #tpu.pipeline_mode<synchronous>, transform_indices = @transform_2, window_bounds = array<i64: 1024, 64>}, {pipeline_mode = #tpu.pipeline_mode<synchronous>, transform_indices = @transform_3, window_bounds = array<i64: 128, 512>}, {pipeline_mode = #tpu.pipeline_mode<synchronous>, transform_indices = @transform_4, window_bounds = array<i64: 8, 64>}, {pipeline_mode = #tpu.pipeline_mode<synchronous>, transform_indices = @transform_5, window_bounds = array<i64: 72, 128>}, {transform_indices = @transform_6, window_bounds = array<i64: 64, 128>}]} {
    %c0 = arith.constant 0 : index
    %c0_0 = arith.constant 0 : index
    %0 = vector.load %arg1[%c0, %c0_0] : memref<64x16xf32, #tpu.memory_space<vmem>>, vector<64x16xf32>
    %1 = math.sin %0 : vector<64x16xf32>
    %c0_1 = arith.constant 0 : index
    %c0_2 = arith.constant 0 : index
    %2 = vector.load %arg2[%c0_1, %c0_2] : memref<32x64xf32, #tpu.memory_space<vmem>>, vector<16x64xf32>
    %cst = arith.constant dense<0.000000e+00> : vector<64x64xf32>
    %3 = tpu.matmul %1, %2, %cst {dimension_numbers = #tpu.dot_dimension_numbers<[1], [0], [0], [1], [0, 0, 1, 1], [], []>} : vector<64x16xf32>, vector<16x64xf32>, vector<64x64xf32> -> vector<64x64xf32>
    %4 = math.cos %0 : vector<64x16xf32>
    %c16 = arith.constant 16 : index
    %c0_3 = arith.constant 0 : index
    %5 = vector.load %arg2[%c16, %c0_3] : memref<32x64xf32, #tpu.memory_space<vmem>>, vector<16x64xf32>
    %cst_4 = arith.constant dense<0.000000e+00> : vector<64x64xf32>
    %6 = tpu.matmul %4, %5, %cst_4 {dimension_numbers = #tpu.dot_dimension_numbers<[1], [0], [0], [1], [0, 0, 1, 1], [], []>} : vector<64x16xf32>, vector<16x64xf32>, vector<64x64xf32> -> vector<64x64xf32>
    %7 = arith.addf %3, %6 : vector<64x64xf32>
    %c448 = arith.constant 448 : index
    %c0_5 = arith.constant 0 : index
    %8 = vector.load %arg3[%c448, %c0_5] : memref<1024x64xf32, #tpu.memory_space<vmem>>, vector<64x64xf32>
    %c0_6 = arith.constant 0 : index
    %c0_7 = arith.constant 0 : index
    %9 = vector.load %arg5[%c0_6, %c0_7] : memref<8x64xf32, #tpu.memory_space<vmem>>, vector<1x64xf32>
    %c1 = arith.constant 1 : index
    %c0_8 = arith.constant 0 : index
    %10 = vector.load %arg5[%c1, %c0_8] : memref<8x64xf32, #tpu.memory_space<vmem>>, vector<1x64xf32>
    %cst_9 = arith.constant dense<0.000000e+00> : vector<64x64xf32>
    %11 = tpu.matmul %7, %8, %cst_9 {dimension_numbers = #tpu.dot_dimension_numbers<[1], [0], [0], [1], [0, 0, 1, 1], [], []>} : vector<64x64xf32>, vector<64x64xf32>, vector<64x64xf32> -> vector<64x64xf32>
    %12 = arith.subf %7, %11 : vector<64x64xf32>
    %13 = arith.mulf %12, %12 : vector<64x64xf32>
    %cst_10 = arith.constant dense<0.000000e+00> : vector<64x64xf32>
    %14 = tpu.matmul %13, %8, %cst_10 {dimension_numbers = #tpu.dot_dimension_numbers<[1], [0], [0], [1], [0, 0, 1, 1], [], []>} : vector<64x64xf32>, vector<64x64xf32>, vector<64x64xf32> -> vector<64x64xf32>
    %cst_11 = arith.constant 9.99999974E-6 : f32
    %15 = vector.broadcast %cst_11 : f32 to vector<64x64xf32>
    %16 = arith.addf %14, %15 : vector<64x64xf32>
    %17 = math.rsqrt %16 : vector<64x64xf32>
    %18 = arith.mulf %12, %17 : vector<64x64xf32>
    %19 = vector.broadcast %9 : vector<1x64xf32> to vector<64x64xf32>
    %20 = arith.mulf %18, %19 : vector<64x64xf32>
    %21 = vector.broadcast %10 : vector<1x64xf32> to vector<64x64xf32>
    %22 = arith.addf %20, %21 : vector<64x64xf32>
    %c0_12 = arith.constant 0 : index
    %c0_13 = arith.constant 0 : index
    %23 = vector.load %arg3[%c0_12, %c0_13] : memref<1024x64xf32, #tpu.memory_space<vmem>>, vector<64x64xf32>
    %cst_14 = arith.constant dense<0.000000e+00> : vector<64x64xf32>
    %24 = tpu.matmul %22, %23, %cst_14 {dimension_numbers = #tpu.dot_dimension_numbers<[1], [0], [0], [1], [0, 0, 1, 1], [], []>} : vector<64x64xf32>, vector<64x64xf32>, vector<64x64xf32> -> vector<64x64xf32>
    %c64 = arith.constant 64 : index
    %c0_15 = arith.constant 0 : index
    %25 = vector.load %arg3[%c64, %c0_15] : memref<1024x64xf32, #tpu.memory_space<vmem>>, vector<64x64xf32>
    %cst_16 = arith.constant dense<0.000000e+00> : vector<64x64xf32>
    %26 = tpu.matmul %22, %25, %cst_16 {dimension_numbers = #tpu.dot_dimension_numbers<[1], [0], [0], [1], [0, 0, 1, 1], [], []>} : vector<64x64xf32>, vector<64x64xf32>, vector<64x64xf32> -> vector<64x64xf32>
    %c128 = arith.constant 128 : index
    %c0_17 = arith.constant 0 : index
    %27 = vector.load %arg3[%c128, %c0_17] : memref<1024x64xf32, #tpu.memory_space<vmem>>, vector<64x64xf32>
    %cst_18 = arith.constant dense<0.000000e+00> : vector<64x64xf32>
    %28 = tpu.matmul %22, %27, %cst_18 {dimension_numbers = #tpu.dot_dimension_numbers<[1], [0], [0], [1], [0, 0, 1, 1], [], []>} : vector<64x64xf32>, vector<64x64xf32>, vector<64x64xf32> -> vector<64x64xf32>
    %c0_19 = arith.constant 0 : index
    %c0_20 = arith.constant 0 : index
    %29 = vector.load %arg4[%c0_19, %c0_20] : memref<128x512xf32, #tpu.memory_space<vmem>>, vector<64x512xf32>
    %c64_21 = arith.constant 64 : index
    %c0_22 = arith.constant 0 : index
    %30 = vector.load %arg4[%c64_21, %c0_22] : memref<128x512xf32, #tpu.memory_space<vmem>>, vector<64x512xf32>
    %c512 = arith.constant 512 : index
    %c0_23 = arith.constant 0 : index
    %31 = vector.load %arg3[%c512, %c0_23] : memref<1024x64xf32, #tpu.memory_space<vmem>>, vector<512x64xf32>
    %cst_24 = arith.constant dense<0.000000e+00> : vector<64x512xf32>
    %32 = tpu.matmul %24, %29, %cst_24 {dimension_numbers = #tpu.dot_dimension_numbers<[1], [0], [0], [1], [0, 0, 1, 1], [], []>} : vector<64x64xf32>, vector<64x512xf32>, vector<64x512xf32> -> vector<64x512xf32>
    %cst_25 = arith.constant dense<0.000000e+00> : vector<64x512xf32>
    %33 = tpu.matmul %26, %30, %cst_25 {dimension_numbers = #tpu.dot_dimension_numbers<[1], [0], [0], [1], [0, 0, 1, 1], [], []>} : vector<64x64xf32>, vector<64x512xf32>, vector<64x512xf32> -> vector<64x512xf32>
    %cst_26 = arith.constant dense<0.000000e+00> : vector<64x512xf32>
    %34 = tpu.matmul %28, %30, %cst_26 {dimension_numbers = #tpu.dot_dimension_numbers<[1], [0], [0], [1], [0, 0, 1, 1], [], []>} : vector<64x64xf32>, vector<64x512xf32>, vector<64x512xf32> -> vector<64x512xf32>
    %35 = arith.mulf %32, %33 : vector<64x512xf32>
    %cst_27 = arith.constant dense<0xFF800000> : vector<64xf32>
    %36 = vector.multi_reduction <maximumf>, %35, %cst_27 [1] : vector<64x512xf32> to vector<64xf32>
    %37 = vector.shape_cast %36 : vector<64xf32> to vector<64x1xf32>
    %38 = vector.broadcast %37 : vector<64x1xf32> to vector<64x512xf32>
    %39 = arith.subf %35, %38 : vector<64x512xf32>
    %40 = math.exp %39 : vector<64x512xf32>
    %cst_28 = arith.constant dense<0.000000e+00> : vector<64x64xf32>
    %41 = tpu.matmul %40, %31, %cst_28 {dimension_numbers = #tpu.dot_dimension_numbers<[1], [0], [0], [1], [0, 0, 1, 1], [], []>} : vector<64x512xf32>, vector<512x64xf32>, vector<64x64xf32> -> vector<64x64xf32>
    %42 = arith.mulf %40, %34 : vector<64x512xf32>
    %cst_29 = arith.constant dense<0.000000e+00> : vector<64x64xf32>
    %43 = tpu.matmul %42, %31, %cst_29 {dimension_numbers = #tpu.dot_dimension_numbers<[1], [0], [0], [1], [0, 0, 1, 1], [], []>} : vector<64x512xf32>, vector<512x64xf32>, vector<64x64xf32> -> vector<64x64xf32>
    %44 = tpu.reciprocal %41 {approx = true} : vector<64x64xf32> -> vector<64x64xf32>
    %45 = arith.mulf %43, %44 : vector<64x64xf32>
    %c192 = arith.constant 192 : index
    %c0_30 = arith.constant 0 : index
    %46 = vector.load %arg3[%c192, %c0_30] : memref<1024x64xf32, #tpu.memory_space<vmem>>, vector<64x64xf32>
    %cst_31 = arith.constant dense<0.000000e+00> : vector<64x64xf32>
    %47 = tpu.matmul %45, %46, %cst_31 {dimension_numbers = #tpu.dot_dimension_numbers<[1], [0], [0], [1], [0, 0, 1, 1], [], []>} : vector<64x64xf32>, vector<64x64xf32>, vector<64x64xf32> -> vector<64x64xf32>
    %48 = arith.addf %7, %47 : vector<64x64xf32>
    %c2 = arith.constant 2 : index
    %c0_32 = arith.constant 0 : index
    %49 = vector.load %arg5[%c2, %c0_32] : memref<8x64xf32, #tpu.memory_space<vmem>>, vector<1x64xf32>
    %c3 = arith.constant 3 : index
    %c0_33 = arith.constant 0 : index
    %50 = vector.load %arg5[%c3, %c0_33] : memref<8x64xf32, #tpu.memory_space<vmem>>, vector<1x64xf32>
    %cst_34 = arith.constant dense<0.000000e+00> : vector<64x64xf32>
    %51 = tpu.matmul %48, %8, %cst_34 {dimension_numbers = #tpu.dot_dimension_numbers<[1], [0], [0], [1], [0, 0, 1, 1], [], []>} : vector<64x64xf32>, vector<64x64xf32>, vector<64x64xf32> -> vector<64x64xf32>
    %52 = arith.subf %48, %51 : vector<64x64xf32>
    %53 = arith.mulf %52, %52 : vector<64x64xf32>
    %cst_35 = arith.constant dense<0.000000e+00> : vector<64x64xf32>
    %54 = tpu.matmul %53, %8, %cst_35 {dimension_numbers = #tpu.dot_dimension_numbers<[1], [0], [0], [1], [0, 0, 1, 1], [], []>} : vector<64x64xf32>, vector<64x64xf32>, vector<64x64xf32> -> vector<64x64xf32>
    %cst_36 = arith.constant 9.99999974E-6 : f32
    %55 = vector.broadcast %cst_36 : f32 to vector<64x64xf32>
    %56 = arith.addf %54, %55 : vector<64x64xf32>
    %57 = math.rsqrt %56 : vector<64x64xf32>
    %58 = arith.mulf %52, %57 : vector<64x64xf32>
    %59 = vector.broadcast %49 : vector<1x64xf32> to vector<64x64xf32>
    %60 = arith.mulf %58, %59 : vector<64x64xf32>
    %61 = vector.broadcast %50 : vector<1x64xf32> to vector<64x64xf32>
    %62 = arith.addf %60, %61 : vector<64x64xf32>
    %c256 = arith.constant 256 : index
    %c0_37 = arith.constant 0 : index
    %63 = vector.load %arg3[%c256, %c0_37] : memref<1024x64xf32, #tpu.memory_space<vmem>>, vector<64x64xf32>
    %cst_38 = arith.constant dense<0.000000e+00> : vector<64x64xf32>
    %64 = tpu.matmul %62, %63, %cst_38 {dimension_numbers = #tpu.dot_dimension_numbers<[1], [0], [0], [1], [0, 0, 1, 1], [], []>} : vector<64x64xf32>, vector<64x64xf32>, vector<64x64xf32> -> vector<64x64xf32>
    %c4 = arith.constant 4 : index
    %c0_39 = arith.constant 0 : index
    %65 = vector.load %arg5[%c4, %c0_39] : memref<8x64xf32, #tpu.memory_space<vmem>>, vector<1x64xf32>
    %66 = vector.broadcast %65 : vector<1x64xf32> to vector<64x64xf32>
    %67 = arith.addf %64, %66 : vector<64x64xf32>
    %c320 = arith.constant 320 : index
    %c0_40 = arith.constant 0 : index
    %68 = vector.load %arg3[%c320, %c0_40] : memref<1024x64xf32, #tpu.memory_space<vmem>>, vector<64x64xf32>
    %cst_41 = arith.constant dense<0.000000e+00> : vector<64x64xf32>
    %69 = tpu.matmul %62, %68, %cst_41 {dimension_numbers = #tpu.dot_dimension_numbers<[1], [0], [0], [1], [0, 0, 1, 1], [], []>} : vector<64x64xf32>, vector<64x64xf32>, vector<64x64xf32> -> vector<64x64xf32>
    %c5 = arith.constant 5 : index
    %c0_42 = arith.constant 0 : index
    %70 = vector.load %arg5[%c5, %c0_42] : memref<8x64xf32, #tpu.memory_space<vmem>>, vector<1x64xf32>
    %71 = vector.broadcast %70 : vector<1x64xf32> to vector<64x64xf32>
    %72 = arith.addf %69, %71 : vector<64x64xf32>
    %cst_43 = arith.constant 5.000000e-01 : f32
    %73 = vector.broadcast %cst_43 : f32 to vector<64x64xf32>
    %74 = arith.mulf %73, %72 : vector<64x64xf32>
    %cst_44 = arith.constant 0.707106769 : f32
    %75 = vector.broadcast %cst_44 : f32 to vector<64x64xf32>
    %76 = arith.mulf %72, %75 : vector<64x64xf32>
    %cst_45 = arith.constant 0.000000e+00 : f32
    %77 = vector.broadcast %cst_45 : f32 to vector<64x64xf32>
    %78 = arith.cmpf oge, %76, %77 : vector<64x64xf32>
    %cst_46 = arith.constant 1.000000e+00 : f32
    %cst_47 = arith.constant -1.000000e+00 : f32
    %79 = vector.broadcast %cst_46 : f32 to vector<64x64xf32>
    %80 = vector.broadcast %cst_47 : f32 to vector<64x64xf32>
    %81 = arith.select %78, %79, %80 : vector<64x64xi1>, vector<64x64xf32>
    %82 = math.absf %76 : vector<64x64xf32>
    %cst_48 = arith.constant 0.327591091 : f32
    %83 = vector.broadcast %cst_48 : f32 to vector<64x64xf32>
    %84 = arith.mulf %83, %82 : vector<64x64xf32>
    %cst_49 = arith.constant 1.000000e+00 : f32
    %85 = vector.broadcast %cst_49 : f32 to vector<64x64xf32>
    %86 = arith.addf %85, %84 : vector<64x64xf32>
    %cst_50 = arith.constant 1.000000e+00 : f32
    %87 = vector.broadcast %cst_50 : f32 to vector<64x64xf32>
    %88 = arith.divf %87, %86 : vector<64x64xf32>
    %cst_51 = arith.constant 1.06140542 : f32
    %89 = vector.broadcast %cst_51 : f32 to vector<64x64xf32>
    %90 = arith.mulf %89, %88 : vector<64x64xf32>
    %cst_52 = arith.constant -1.45315206 : f32
    %91 = vector.broadcast %cst_52 : f32 to vector<64x64xf32>
    %92 = arith.addf %90, %91 : vector<64x64xf32>
    %93 = arith.mulf %92, %88 : vector<64x64xf32>
    %cst_53 = arith.constant 1.42141378 : f32
    %94 = vector.broadcast %cst_53 : f32 to vector<64x64xf32>
    %95 = arith.addf %93, %94 : vector<64x64xf32>
    %96 = arith.mulf %95, %88 : vector<64x64xf32>
    %cst_54 = arith.constant -0.284496725 : f32
    %97 = vector.broadcast %cst_54 : f32 to vector<64x64xf32>
    %98 = arith.addf %96, %97 : vector<64x64xf32>
    %99 = arith.mulf %98, %88 : vector<64x64xf32>
    %cst_55 = arith.constant 0.254829586 : f32
    %100 = vector.broadcast %cst_55 : f32 to vector<64x64xf32>
    %101 = arith.addf %99, %100 : vector<64x64xf32>
    %102 = arith.mulf %101, %88 : vector<64x64xf32>
    %cst_56 = arith.constant 0.000000e+00 : f32
    %103 = vector.broadcast %cst_56 : f32 to vector<64x64xf32>
    %104 = arith.subf %103, %82 : vector<64x64xf32>
    %105 = arith.mulf %104, %82 : vector<64x64xf32>
    %106 = math.exp %105 : vector<64x64xf32>
    %107 = arith.mulf %102, %106 : vector<64x64xf32>
    %cst_57 = arith.constant 1.000000e+00 : f32
    %108 = vector.broadcast %cst_57 : f32 to vector<64x64xf32>
    %109 = arith.subf %108, %107 : vector<64x64xf32>
    %110 = arith.mulf %81, %109 : vector<64x64xf32>
    %cst_58 = arith.constant 1.000000e+00 : f32
    %111 = vector.broadcast %cst_58 : f32 to vector<64x64xf32>
    %112 = arith.addf %111, %110 : vector<64x64xf32>
    %113 = arith.mulf %74, %112 : vector<64x64xf32>
    %114 = arith.mulf %113, %67 : vector<64x64xf32>
    %c384 = arith.constant 384 : index
    %c0_59 = arith.constant 0 : index
    %115 = vector.load %arg3[%c384, %c0_59] : memref<1024x64xf32, #tpu.memory_space<vmem>>, vector<64x64xf32>
    %cst_60 = arith.constant dense<0.000000e+00> : vector<64x64xf32>
    %116 = tpu.matmul %114, %115, %cst_60 {dimension_numbers = #tpu.dot_dimension_numbers<[1], [0], [0], [1], [0, 0, 1, 1], [], []>} : vector<64x64xf32>, vector<64x64xf32>, vector<64x64xf32> -> vector<64x64xf32>
    %117 = arith.addf %48, %116 : vector<64x64xf32>
    %c6 = arith.constant 6 : index
    %c0_61 = arith.constant 0 : index
    %118 = vector.load %arg5[%c6, %c0_61] : memref<8x64xf32, #tpu.memory_space<vmem>>, vector<1x64xf32>
    %119 = vector.broadcast %118 : vector<1x64xf32> to vector<64x64xf32>
    %120 = arith.addf %117, %119 : vector<64x64xf32>
    %c0_62 = arith.constant 0 : index
    %c0_63 = arith.constant 0 : index
    %121 = vector.load %arg6[%c0_62, %c0_63] : memref<72x128xf32, #tpu.memory_space<vmem>>, vector<64x128xf32>
    %c64_64 = arith.constant 64 : index
    %c0_65 = arith.constant 0 : index
    %122 = vector.load %arg6[%c64_64, %c0_65] : memref<72x128xf32, #tpu.memory_space<vmem>>, vector<1x128xf32>
    %cst_66 = arith.constant dense<0.000000e+00> : vector<64x128xf32>
    %123 = tpu.matmul %120, %121, %cst_66 {dimension_numbers = #tpu.dot_dimension_numbers<[1], [0], [0], [1], [0, 0, 1, 1], [], []>} : vector<64x64xf32>, vector<64x128xf32>, vector<64x128xf32> -> vector<64x128xf32>
    %124 = vector.broadcast %122 : vector<1x128xf32> to vector<64x128xf32>
    %125 = arith.addf %123, %124 : vector<64x128xf32>
    %c0_67 = arith.constant 0 : index
    %c0_68 = arith.constant 0 : index
    %126 = vector.load %arg7[%c0_67, %c0_68] : memref<64x128xf32, #tpu.memory_space<vmem>>, vector<64x128xf32>
    tpu.vector_store %arg7[%c0_67, %c0_68], %125 {strides = array<i32>} : memref<64x128xf32, #tpu.memory_space<vmem>>, vector<64x128xf32>,
    return
  }
  func.func @transform_0(%arg0: i32) -> (i32, i32) {
    %c0_i32 = arith.constant 0 : i32
    %c0_i32_0 = arith.constant 0 : i32
    return %arg0, %c0_i32 : i32, i32
  }
  func.func @transform_1(%arg0: i32) -> (i32, i32) {
    %c0_i32 = arith.constant 0 : i32
    %c0_i32_0 = arith.constant 0 : i32
    %c0_i32_1 = arith.constant 0 : i32
    return %c0_i32, %c0_i32_0 : i32, i32
  }
  func.func @transform_2(%arg0: i32) -> (i32, i32) {
    %c0_i32 = arith.constant 0 : i32
    %c0_i32_0 = arith.constant 0 : i32
    %c0_i32_1 = arith.constant 0 : i32
    return %c0_i32, %c0_i32_0 : i32, i32
  }
  func.func @transform_3(%arg0: i32) -> (i32, i32) {
    %c0_i32 = arith.constant 0 : i32
    %c0_i32_0 = arith.constant 0 : i32
    %c0_i32_1 = arith.constant 0 : i32
    return %c0_i32, %c0_i32_0 : i32, i32
  }
  func.func @transform_4(%arg0: i32) -> (i32, i32) {
    %c0_i32 = arith.constant 0 : i32
    %c0_i32_0 = arith.constant 0 : i32
    %c0_i32_1 = arith.constant 0 : i32
    return %c0_i32, %c0_i32_0 : i32, i32
  }
  func.func @transform_5(%arg0: i32) -> (i32, i32) {
    %c0_i32 = arith.constant 0 : i32
    %c0_i32_0 = arith.constant 0 : i32
    %c0_i32_1 = arith.constant 0 : i32
    return %c0_i32, %c0_i32_0 : i32, i32
  }
  func.func @transform_6(%arg0: i32) -> (i32, i32) {
    %c0_i32 = arith.constant 0 : i32
    %c0_i32_0 = arith.constant 0 : i32
    return %arg0, %c0_i32 : i32, i32
  }
}

</mosaic_0001>

<bundles_post_ra>
// kernel: tpu_custom_call.1
= control target key start
LH: loop header
LB: loop body
LE: loop exit
PB: predicated region body
PF: predicated region fallthrough
CT: control target
= control target key end

     0   :  { %11 = vsyncpa [#allocation3], 0  ;;  %s9352_s0 = inlined_call_operand.vmem [shape: f32[128,16], index: 0, kind: input, shape index: {}]   ;;  %s9353_s1 = inlined_call_operand.vmem [shape: f32[32,64], index: 1, kind: input, shape index: {}]   ;;  %s9354_s2 = inlined_call_operand.vmem [shape: f32[1024,64], index: 2, kind: input, shape index: {}]   ;;  %s9355_s3 = inlined_call_operand.vmem [shape: f32[128,512], index: 3, kind: input, shape index: {}]   ;;  %s9356_s4 = inlined_call_operand.vmem [shape: f32[8,64], index: 4, kind: input, shape index: {}]   ;;  %s9357_s5 = inlined_call_operand.vmem [shape: f32[72,128], index: 5, kind: input, shape index: {}]   ;;  %s9358_s6 = inlined_call_operand.hbm [shape: f32[128,128], index: 6, kind: output, shape index: {}]  }
   0x1   :  { %13 = vsyncpa [#allocation3 + $0x1], 0  ;;  %s6179_s21 = smov 0   ;;  %s6181_s22 = smov 0  }
   0x2   :  { %s6183_s23 = smov 0   ;;  %s6185_s24 = smov 0  }
   0x3 LB: > { %s6200_s25 = sadd.s32 4294967295, %s6132_s24   ;;  %s5579_s26 = sadd.s32 4294967294, %s6132_s24   ;;  %s6132_s24 = sphi %s6185_s24, %s9496_s24   ;;  %s6128_s23 = sphi %s6183_s23, %s9495_s23   ;;  %s6124_s22 = sphi %s6181_s22, %s9494_s22   ;;  %s6120_s21 = sphi %s6179_s21, %s9493_s21  }
   0x4   : > { %s6204_s27 = sadd.s32 1, %s6132_s24   ;;  %s157_s28 = sadd.s32 1, %s6128_s23 }
   0x5   : > { %s154_s29 = ssub.s32 %s6132_s24, %s6204_s27  ;;  %p167_p0 = scmp.ne.s32.totalorder %s6128_s23, %s6124_s22 }
   0x6   : > { %p155_p1 = scmp.eq.s32.totalorder %s154_s29, 0  ;;  %p168_p2 = scmp.eq.s32.totalorder %s6200_s25, 1 }
   0x7   : > { %p173_p3 = scmp.ne.s32.totalorder %s6124_s22, %s6120_s21  ;;  %p174_p4 = scmp.eq.s32.totalorder %s5579_s26, 1 }
   0x8   : > { %s6215_s30 = scalar_select %p155_p1, %s6128_s23, %s157_s28  }
   0x9   : > { %p6217_p5 = por %p168_p2, %p167_p0  ;;  %p6221_p6 = por %p174_p4, %p173_p3 }
   0xa   : > { %p5582_p7 = scmp.ge.s32.totalorder %s6132_s24, 1  ;;  %p216_p8 = scmp.lt.s32.totalorder %s6132_s24, 3 }
   0xc   : > { %p217_p9 = pnand %p5582_p7, %p216_p8 }
   0xe   : > { %220 = sbr.rel (%p217_p9) target bundleno = 2351 (0x92f), region = 44 }
  0x13   : > { %v2736_v0 = vld [vmem:[%s9353_s1 + $0x18] sm:$0xff]  ;;  %v1502_v1 = vld [vmem:[%s9353_s1 + $0x8] sm:$0xff]  ;;  %v2735_v2 = vld [vmem:[%s9353_s1 + $0x10] sm:$0xff]  ;;  %s5584_s15 = sshll.u32 %s6200_s25, 3  ;;  %v6134_v32 = vmov 683565275  }
  0x14   : > { %2776 = vmatpush.msra.mxu0 %v2736_v0  ;;  %2841 = vmatpush.msra.mxu1 %v1502_v1  ;;  %v1501_v3 = vld [vmem:[%s9353_s1] sm:$0xff]  ;;  %p247_p10 = scmp.lt.s32.totalorder %s5584_s15, 15  ;;  %v6135_v34 = vmov 2475754826   ;;  %v6136_v36 = vmov 2131351028  }
  0x15   : > { %5850 = vmatpush.msra.mxu3 %v1502_v1  ;;  %5848 = vmatpush.msra.mxu2 %v2736_v0  ;;  %v6137_v38 = vmov 2102212464   ;;  %v6138_v40 = vmov 920167782   ;;  %v6139_v49 = vmov 1326507024  }
  0x16   : > { %2777 = vmatpush.msra.mxu0 %v2735_v2  ;;  %2842 = vmatpush.msra.mxu1 %v1501_v3  ;;  %s9498_s15 = smov (!%p247_p10, %s5584_s15), 15  ;;  %s243_s17 = sand.u32 1, %s6124_s22  }
  0x17   : > { %5851 = vmatpush.msra.mxu3 %v1501_v3  ;;  %5849 = vmatpush.msra.mxu2 %v2735_v2  ;;  %s5585_s18 = sshll.u32 %s9498_s15, 3  ;;  %s5847_s28 = sshll.u32 %s6200_s25, 6 }
  0x18   : > { %s6243_s26 = scalar_lea.vmem %s9352_s0, %s5585_s18  ;;  %s5583_s18 = sshll.u32 %s243_s17, 6 }
  0x19   : > { %v6246_v4 = vld [vmem:[%s6243_s26] sm:$0xff]  ;;  %v6249_v5 = vld [vmem:[%s6243_s26 + $0x8] sm:$0xff]  ;;  %v6252_v6 = vld [vmem:[%s6243_s26 + $0x10] sm:$0xff]  ;;  %s5513_s10 = scalar_lea.hbm %s9358_s6, %s5847_s28  ;;  %s5502_s13 = scalar_lea.sflag [#allocation3], %s243_s17 }
  0x1a   : > { %v261_v7 = vand.u32 2147483647, %v6246_v4  ;;  %v264_v8 = vand.u32 2139095040, %v6246_v4  ;;  %v416_v9 = vand.u32 2147483647, %v6249_v5  ;;  %v419_v10 = vand.u32 2139095040, %v6249_v5 }
  0x1b   : > { %v574_v13 = vand.u32 2139095040, %v6252_v6  ;;  %s5516_s12 = sshll.u32 %s5513_s10, 4  ;;  %s5517_s12 = int_to_ptr.hbm [resolvable:$true] %s5516_s12 }
  0x1c   : > { %v265_v11 = vshrl.u32 %v264_v8, 23  ;;  %v268_v12 = vand.u32 8388607, %v261_v7  ;;  %v420_v14 = vshrl.u32 %v419_v10, 23  ;;  %v423_v15 = vand.u32 8388607, %v416_v9 }
  0x1d   : > { %v575_v20 = vshrl.u32 %v574_v13, 23  ;;  %s6084_s14 = sshra.s32 %s5517_s12, 4  ;;  %s6085_s14 = int_to_ptr.hbm [resolvable:$true] %s6084_s14 }
  0x1e   : > { %v5586_v16 = vadd.s32 4294967169, %v265_v11  ;;  %v269_v17 = vor.u32 8388608, %v268_v12  ;;  %v5589_v18 = vadd.s32 4294967169, %v420_v14  ;;  %v424_v21 = vor.u32 8388608, %v423_v15  ;;  %s6086_s15 = scalar_lea.hbm %s6085_s14, 64  ;;  %p6091_p0 = scmp.lt.s32.totalorder %s6085_s14, %s9358_s6 }
  0x1f   : > { %v5592_v27 = vadd.s32 4294967169, %v575_v20  ;;  %p6087_p11 = scmp.ne.s32.totalorder %s6085_s14, %s6086_s15 }
  0x20   : > { %v271_v19 = vadd.s32 1, %v5586_v16  ;;  %v426_v22 = vadd.s32 1, %v5589_v18  ;;  %v6263_v24 = vshll.u32 %v269_v17, 8  ;;  %v6269_v30 = vshll.u32 %v424_v21, 8 }
  0x21   : > { %v6281_v47 = vadd.s32 1, %v5592_v27  ;;  %p6088_p12 = pnand %p6087_p11, %p6217_p5 }
  0x22   : > { %vm272_vm0 = vcmp.gt.s32.totalorder %v271_v19, 0  ;;  %vm427_vm1 = vcmp.gt.s32.totalorder %v426_v22, 0  ;;  %v310_v42 = vand.u32 65535, %v6263_v24  ;;  %v311_v43 = vshrl.u32 %v6263_v24, 16 }
  0x23   : > { %v273_v23 = vsel %vm272_vm0, %v271_v19, 0  ;;  %v428_v26 = vsel %vm427_vm1, %v426_v22, 0  ;;  %vm582_vm15 = vcmp.gt.s32.totalorder %v6281_v47, 0  ;;  %p6089_p13 = pneg %p6088_p12 }
  0x24   : > { %v275_v25 = vand.u32 31, %v273_v23  ;;  %v6265_v28 = vshrl.u32 %v273_v23, 5  ;;  %v6267_v29 = vand.u32 31, %v428_v26  ;;  %v6297_v60 = vshrl.u32 %v428_v26, 5 }
  0x26   : > { %v276_v31 = vsub.s32 32, %v275_v25  ;;  %v278_v33 = vshll.u32 %v6134_v32, %v275_v25  ;;  %v281_v35 = vshll.u32 %v6135_v34, %v275_v25  ;;  %v284_v37 = vshll.u32 %v6136_v36, %v275_v25 }
  0x27   : > { %v287_v39 = vshll.u32 %v6137_v38, %v275_v25  ;;  %v290_v41 = vshll.u32 %v6138_v40, %v275_v25  ;;  %vm293_vm2 = vcmp.lt.s32.totalorder %v6265_v28, 1  ;;  %vm296_vm3 = vcmp.lt.s32.totalorder %v6265_v28, 4 }
  0x28   : > { %v279_v44 = vshrl.u32 %v6135_v34, %v276_v31  ;;  %v282_v45 = vshrl.u32 %v6136_v36, %v276_v31  ;;  %v285_v46 = vshrl.u32 %v6137_v38, %v276_v31  ;;  %v288_v48 = vshrl.u32 %v6138_v40, %v276_v31 }
  0x29   : > { %v291_v50 = vshrl.u32 %v6139_v49, %v276_v31  ;;  %v6288_v54 = vsub.s32 32, %v6267_v29  ;;  %v277_v55 = vshrl.u32 %v6134_v32, %v276_v31  ;;  %vm295_vm4 = vcmp.lt.s32.totalorder %v6265_v28, 3 }
  0x2a   : > { %v280_v51 = vor.u32 %v279_v44, %v278_v33  ;;  %v283_v52 = vor.u32 %v282_v45, %v281_v35  ;;  %v286_v53 = vor.u32 %v285_v46, %v284_v37  ;;  %v289_v56 = vor.u32 %v288_v48, %v287_v39 }
  0x2b   : > { %v292_v57 = vor.u32 %v291_v50, %v290_v41  ;;  %vm294_vm5 = vcmp.lt.s32.totalorder %v6265_v28, 2  ;;  %v433_v63 = vshll.u32 %v6134_v32, %v6267_v29  ;;  %v436_v0 = vshll.u32 %v6135_v34, %v6267_v29 }
  0x2c   : > { %v301_v58 = vsel %vm293_vm2, %v280_v51, %v283_v52  ;;  %v305_v59 = vsel %vm293_vm2, %v283_v52, %v286_v53  ;;  %v302_v61 = vsel %vm296_vm3, %v289_v56, 920167782  ;;  %v298_v1 = vsel %vm296_vm3, %v286_v53, 2102212464 }
  0x2d   : > { %v306_v62 = vsel %vm296_vm3, %v292_v57, 1326507024  ;;  %v303_v2 = vsel %vm295_vm4, %v286_v53, %v302_v61  ;;  %v434_v8 = vshrl.u32 %v6135_v34, %v6288_v54  ;;  %v297_v10 = vsel %vm293_vm2, %v277_v55, %v280_v51 }
  0x2e   : > { %v307_v3 = vsel %vm295_vm4, %v289_v56, %v306_v62  ;;  %v304_v11 = vsel %vm294_vm5, %v301_v58, %v303_v2  ;;  %v437_v13 = vshrl.u32 %v6136_v36, %v6288_v54  ;;  %v299_v18 = vsel %vm295_vm4, %v283_v52, %v298_v1 }
  0x2f   : > { %v308_v12 = vsel %vm294_vm5, %v305_v59, %v307_v3  ;;  %v334_v16 = vand.u32 65535, %v304_v11  ;;  %v335_v17 = vshrl.u32 %v304_v11, 16  ;;  %v6325_v19 = vor.u32 %v434_v8, %v433_v63 }
  0x30   : > { %v312_v14 = vand.u32 65535, %v308_v12  ;;  %v313_v15 = vshrl.u32 %v308_v12, 16  ;;  %v6327_v20 = vor.u32 %v437_v13, %v436_v0  ;;  %v439_v21 = vshll.u32 %v6136_v36, %v6267_v29 }
  0x31   : > { %v440_v26 = vshrl.u32 %v6137_v38, %v6288_v54  ;;  %v336_v31 = vmul.u32 %v334_v16, %v310_v42  ;;  %v337_v33 = vmul.u32 %v335_v17, %v310_v42  ;;  %v338_v35 = vmul.u32 %v334_v16, %v311_v43 }
  0x32   : > { %v314_v22 = vmul.u32 %v312_v14, %v310_v42  ;;  %v315_v23 = vmul.u32 %v313_v15, %v310_v42  ;;  %v316_v25 = vmul.u32 %v312_v14, %v311_v43  ;;  %v317_v27 = vmul.u32 %v313_v15, %v311_v43 }
  0x33   : > { %v339_v44 = vmul.u32 %v335_v17, %v311_v43  ;;  %v340_v46 = vshll.u32 %v337_v33, 16  ;;  %v341_v48 = vshrl.u32 %v337_v33, 16  ;;  %v342_v50 = vshll.u32 %v338_v35, 16 }
  0x34   : > { %v318_v37 = vshll.u32 %v315_v23, 16  ;;  %v319_v39 = vshrl.u32 %v315_v23, 16  ;;  %v320_v41 = vshll.u32 %v316_v25, 16  ;;  %v321_v45 = vshrl.u32 %v316_v25, 16 }
  0x35   : > { %v343_v52 = vshrl.u32 %v338_v35, 16  ;;  %v442_v53 = vshll.u32 %v6137_v38, %v6267_v29  ;;  %v6140_v55 = vmov 0   ;;  %vm344_vm7 = vc.u32 %v336_v31, %v340_v46 }
  0x36   : > { %vm322_vm6 = vc.u32 %v314_v22, %v318_v37  ;;  %v324_v51 = vadd.s32 %v318_v37, %v314_v22  ;;  %v346_v42 = vadd.s32 %v340_v46, %v336_v31  ;;  %v443_v57 = vshrl.u32 %v6138_v40, %v6288_v54 }
  0x37   : > { %v323_v56 = vsel %vm322_vm6, 1, %v6140_v55  ;;  %v345_v43 = vsel %vm344_vm7, 1, %v6140_v55  ;;  %v445_v59 = vshll.u32 %v6138_v40, %v6267_v29  ;;  %v441_v63 = vor.u32 %v440_v26, %v439_v21 }
  0x38   : > { %v325_v58 = vadd.s32 %v323_v56, %v317_v27  ;;  %vm326_vm8 = vc.u32 %v324_v51, %v320_v41  ;;  %v347_v62 = vadd.s32 %v345_v43, %v339_v44  ;;  %vm348_vm9 = vc.u32 %v346_v42, %v342_v50 }
  0x39   : > { %v327_v61 = vsel %vm326_vm8, 1, %v6140_v55  ;;  %v349_v1 = vsel %vm348_vm9, 1, %v6140_v55  ;;  %v444_v2 = vor.u32 %v443_v57, %v442_v53  ;;  %v446_v3 = vshrl.u32 %v6139_v49, %v6288_v54 }
  0x3a   : > { %v329_v0 = vadd.s32 %v327_v61, %v325_v58  ;;  %v6345_v8 = vadd.s32 %v346_v42, %v342_v50  ;;  %v351_v11 = vadd.s32 %v349_v1, %v347_v62  ;;  %vm448_vm10 = vcmp.lt.s32.totalorder %v6297_v60, 1 }
  0x3b   : > { %vm450_vm11 = vcmp.lt.s32.totalorder %v6297_v60, 3  ;;  %v447_v12 = vor.u32 %v446_v3, %v445_v59  ;;  %vm449_vm12 = vcmp.lt.s32.totalorder %v6297_v60, 2  ;;  %vm451_vm13 = vcmp.lt.s32.totalorder %v6297_v60, 4 }
  0x3c   : > { %v330_v29 = vadd.s32 %v329_v0, %v319_v39  ;;  %v300_v13 = vsel %vm294_vm5, %v297_v10, %v299_v18  ;;  %v352_v14 = vadd.s32 %v351_v11, %v341_v48  ;;  %v456_v15 = vsel %vm448_vm10, %v6325_v19, %v6327_v20 }
  0x3d   : > { %v457_v16 = vsel %vm451_vm13, %v444_v2, 920167782  ;;  %v460_v22 = vsel %vm448_vm10, %v6327_v20, %v441_v63  ;;  %v466_v28 = vshrl.u32 %v6269_v30, 16  ;;  %v461_v23 = vsel %vm451_vm13, %v447_v12, 1326507024 }
  0x3e   : > { %v6359_v17 = vadd.s32 %v330_v29, %v321_v45  ;;  %v458_v21 = vsel %vm450_vm11, %v441_v63, %v457_v16  ;;  %v353_v10 = vadd.s32 %v352_v14, %v343_v52  ;;  %v465_v25 = vand.u32 65535, %v6269_v30 }
  0x3f   : > { %v459_v18 = vsel %vm449_vm12, %v456_v15, %v458_v21  ;;  %v354_v26 = vmul.u32 %v6263_v24, %v300_v13  ;;  %v462_v27 = vsel %vm450_vm11, %v444_v2, %v461_v23  ;;  %v432_v61 = vshrl.u32 %v6134_v32, %v6288_v54 }
  0x40   : > { %vm356_vm14 = vc.u32 %v6359_v17, %v6345_v8  ;;  %v489_v31 = vand.u32 65535, %v459_v18  ;;  %v357_v33 = vadd.s32 1, %v353_v10  ;;  %v463_v35 = vsel %vm449_vm12, %v460_v22, %v462_v27 }
  0x41   : > { %v490_v37 = vshrl.u32 %v459_v18, 16  ;;  %v467_v39 = vand.u32 65535, %v463_v35  ;;  %v468_v41 = vshrl.u32 %v463_v35, 16  ;;  %v583_v0 = vsel %vm582_vm15, %v6281_v47, 0 }
  0x42   : > { %v493_v44 = vmul.u32 %v489_v31, %v466_v28  ;;  %v358_v45 = vsel %vm356_vm14, %v357_v33, %v353_v10  ;;  %v491_v46 = vmul.u32 %v489_v31, %v465_v25  ;;  %v453_v11 = vsel %vm451_vm13, %v441_v63, 2102212464 }
  0x43   : > { %v492_v48 = vmul.u32 %v490_v37, %v465_v25  ;;  %v359_v24 = vadd.s32 %v358_v45, %v354_v26  ;;  %v469_v50 = vmul.u32 %v467_v39, %v465_v25  ;;  %v470_v51 = vmul.u32 %v468_v41, %v465_v25 }
  0x44   : > { %v471_v52 = vmul.u32 %v467_v39, %v466_v28  ;;  %v494_v53 = vmul.u32 %v490_v37, %v466_v28  ;;  %v497_v42 = vshll.u32 %v493_v44, 16  ;;  %v472_v58 = vmul.u32 %v468_v41, %v466_v28 }
  0x45   : > { %v495_v56 = vshll.u32 %v492_v48, 16  ;;  %v360_v57 = vadd.s32 536870912, %v359_v24  ;;  %v473_v43 = vshll.u32 %v470_v51, 16  ;;  %v474_v14 = vshrl.u32 %v470_v51, 16 }
  0x46   : > { %v475_v59 = vshll.u32 %v471_v52, 16  ;;  %v452_v47 = vsel %vm448_vm10, %v432_v61, %v6325_v19  ;;  %v496_v16 = vshrl.u32 %v492_v48, 16  ;;  %v454_v63 = vsel %vm450_vm11, %v6327_v20, %v453_v11 }
  0x47   : > { %vm499_vm0 = vc.u32 %v491_v46, %v495_v56  ;;  %v501_v62 = vadd.s32 %v495_v56, %v491_v46  ;;  %v361_v1 = vshrl.u32 %v360_v57, 30  ;;  %vm477_vm1 = vc.u32 %v469_v50, %v473_v43 }
  0x48   : > { %v479_v2 = vadd.s32 %v473_v43, %v469_v50  ;;  %v500_v3 = vsel %vm499_vm0, 1, %v6140_v55  ;;  %v478_v29 = vsel %vm477_vm1, 1, %v6140_v55  ;;  %v476_v28 = vshrl.u32 %v471_v52, 16 }
  0x49   : > { %v502_v12 = vadd.s32 %v500_v3, %v494_v53  ;;  %vm503_vm2 = vc.u32 %v501_v62, %v497_v42  ;;  %v362_v13 = vshll.u32 %v361_v1, 30  ;;  %v480_v15 = vadd.s32 %v478_v29, %v472_v58 }
  0x4a   : > { %vm481_vm3 = vc.u32 %v479_v2, %v475_v59  ;;  %v504_v21 = vsel %vm503_vm2, 1, %v6140_v55  ;;  %v498_v18 = vshrl.u32 %v493_v44, 16  ;;  %v6395_v23 = vadd.s32 %v501_v62, %v497_v42 }
  0x4b   : > { %v482_v54 = vsel %vm481_vm3, 1, %v6140_v55  ;;  %v363_v22 = vsub.s32 %v359_v24, %v362_v13  ;;  %v506_v25 = vadd.s32 %v504_v21, %v502_v12  ;;  %v585_v19 = vand.u32 31, %v583_v0 }
  0x4c   : > { %v484_v10 = vadd.s32 %v482_v54, %v480_v15  ;;  %v455_v31 = vsel %vm449_vm12, %v452_v47, %v454_v63  ;;  %vm263_vm6 = vcmp.lt.s32.totalorder %v6246_v4, 0  ;;  %v355_v48 = vadd.s32 %v6345_v8, %v6359_v17 }
  0x4d   : > { %vm364_vm4 = vcmp.lt.s32.totalorder %v363_v22, 0  ;;  %v365_v26 = vsub.s32 0, %v363_v22  ;;  %v507_v33 = vadd.s32 %v506_v25, %v496_v16  ;;  %v509_v20 = vmul.u32 %v6269_v30, %v455_v31 }
  0x4e   : > { %v485_v27 = vadd.s32 %v484_v10, %v474_v14  ;;  %v586_v44 = vsub.s32 32, %v585_v19  ;;  %v385_v24 = vsub.s32 4, %v361_v1  ;;  %v571_v60 = vand.u32 2147483647, %v6252_v6 }
  0x4f   : > { %v366_v35 = vsel %vm364_vm4, %v365_v26, %v363_v22  ;;  %v508_v41 = vadd.s32 %v507_v33, %v498_v18  ;;  %v6405_v51 = vshrl.u32 %v583_v0, 5  ;;  %v591_v52 = vshll.u32 %v6135_v34, %v585_v19 }
  0x50   : > { %v486_v37 = vadd.s32 %v485_v27, %v476_v28  ;;  %v367_v39 = vclz %v366_v35  ;;  %v592_v56 = vshrl.u32 %v6136_v36, %v586_v44  ;;  %v594_v42 = vshll.u32 %v6136_v36, %v585_v19 }
  0x51   : > { %v512_v46 = vadd.s32 1, %v508_v41  ;;  %v595_v8 = vshrl.u32 %v6137_v38, %v586_v44  ;;  %vm6413_vm8 = vcmp.le.f32.partialorder %v261_v7, 0.7853982  ;;  %v386_v59 = vsel %vm263_vm6, %v385_v24, %v361_v1 }
  0x52   : > { %vm511_vm5 = vc.u32 %v486_v37, %v6395_v23  ;;  %v5587_v45 = vadd.s32 4294967294, %v367_v39  ;;  %v578_v61 = vand.u32 8388607, %v571_v60  ;;  %v597_v2 = vshll.u32 %v6137_v38, %v585_v19 }
  0x53   : > { %v513_v50 = vsel %vm511_vm5, %v512_v46, %v508_v41  ;;  %vm603_vm9 = vcmp.lt.s32.totalorder %v6405_v51, 1  ;;  %v598_v11 = vshrl.u32 %v6138_v40, %v586_v44  ;;  %v600_v7 = vshll.u32 %v6138_v40, %v585_v19 }
  0x54   : > { %vm5588_vm7 = vcmp.lt.s32.totalorder %v5587_v45, 0  ;;  %v514_v53 = vadd.s32 %v513_v50, %v509_v20  ;;  %v601_v29 = vshrl.u32 %v6139_v49, %v586_v44  ;;  %v6426_v14 = vor.u32 %v592_v56, %v591_v52 }
  0x55   : > { %v370_v30 = vsel %vm5588_vm7, 0, %v5587_v45  ;;  %v596_v1 = vor.u32 %v595_v8, %v594_v42  ;;  %vm605_vm10 = vcmp.lt.s32.totalorder %v6405_v51, 3  ;;  %vm606_vm11 = vcmp.lt.s32.totalorder %v6405_v51, 4 }
  0x56   : > { %v371_v57 = vsub.s32 32, %v370_v30  ;;  %v372_v58 = vshll.u32 %v363_v22, %v370_v30  ;;  %v375_v43 = vsub.s32 4294967266, %v370_v30  ;;  %v515_v3 = vadd.s32 536870912, %v514_v53 }
  0x57   : > { %v602_v47 = vor.u32 %v601_v29, %v600_v7  ;;  %v588_v21 = vshll.u32 %v6134_v32, %v585_v19  ;;  %v589_v22 = vshrl.u32 %v6135_v34, %v586_v44  ;;  %v579_v28 = vor.u32 8388608, %v578_v61 }
  0x58   : > { %v373_v62 = vshrl.u32 %v355_v48, %v371_v57  ;;  %v376_v0 = vadd.s32 127, %v375_v43  ;;  %v516_v15 = vshrl.u32 %v515_v3, 30  ;;  %v599_v10 = vor.u32 %v598_v11, %v597_v2 }
  0x59   : > { %vm604_vm12 = vcmp.lt.s32.totalorder %v6405_v51, 2  ;;  %v388_v25 = vsel %vm6413_vm8, 0, %v386_v59  ;;  %v615_v26 = vsel %vm603_vm9, %v6426_v14, %v596_v1  ;;  %v616_v27 = vsel %vm606_vm11, %v602_v47, 1326507024 }
  0x5a   : > { %v374_v12 = vor.u32 %v373_v62, %v372_v58  ;;  %v377_v13 = vshll.u32 %v376_v0, 23  ;;  %v517_v63 = vshll.u32 %v516_v15, 30  ;;  %vm418_vm13 = vcmp.lt.s32.totalorder %v6249_v5, 0 }
  0x5b   : > { %v510_v19 = vadd.s32 %v6395_v23, %v486_v37  ;;  %v617_v33 = vsel %vm605_vm10, %v599_v10, %v616_v27  ;;  %v587_v39 = vshrl.u32 %v6134_v32, %v586_v44  ;;  %v590_v41 = vor.u32 %v589_v22, %v588_v21 }
  0x5c   : > { %v378_v54 = vor.u32 4788187, %v377_v13  ;;  %v381_v16 = vcvt.s32.f32 %v374_v12  ;;  %v6442_v31 = vsub.s32 %v514_v53, %v517_v63  ;;  %v618_v20 = vsel %vm604_vm12, %v615_v26, %v617_v33 }
  0x5d   : > { %v405_v45 = vadd.s32 3, %v388_v25  ;;  %v6451_v48 = vshll.u32 %v579_v28, 8  ;;  %v612_v37 = vsel %vm606_vm11, %v599_v10, 920167782  ;;  %v622_v24 = vand.u32 65535, %v618_v20 }
  0x5e   : > { %v379_v18 = vand.u32 2147483647, %v378_v54  ;;  %vm519_vm14 = vcmp.lt.s32.totalorder %v6442_v31, 0  ;;  %v520_v46 = vsub.s32 0, %v6442_v31  ;;  %v623_v50 = vshrl.u32 %v618_v20, 16 }
  0x5f   : > { %v540_v44 = vsub.s32 4, %v516_v15  ;;  %v6457_v30 = vand.u32 65535, %v6451_v48  ;;  %v6460_v53 = vshrl.u32 %v6451_v48, 16  ;;  %v6464_v42 = vand.u32 3, %v388_v25 }
  0x60   : > { %v382_v35 = vmul.f32 %v381_v16, %v379_v18  ;;  %v521_v52 = vsel %vm519_vm14, %v520_v46, %v6442_v31  ;;  %vm6468_vm15 = vcmp.le.f32.partialorder %v416_v9, 0.7853982  ;;  %v611_v43 = vsel %vm603_vm9, %v590_v41, %v6426_v14 }
  0x61   : > { %v522_v58 = vclz %v521_v52  ;;  %v613_v59 = vsel %vm605_vm10, %v596_v1, %v612_v37  ;;  %v624_v61 = vmul.u32 %v622_v24, %v6457_v30  ;;  %v6484_v9 = vmul.u32 %v623_v50, %v6457_v30 }
  0x62   : > { %v383_v23 = vxor.u32 2147483648, %v382_v35  ;;  %v6488_v0 = vand.u32 3, %v405_v45  ;;  %v6492_v3 = vsel %vm603_vm9, %v587_v39, %v590_v41  ;;  %v541_v17 = vsel %vm418_vm13, %v540_v44, %v516_v15 }
  0x63   : > { %v5590_v2 = vadd.s32 4294967294, %v522_v58  ;;  %v608_v11 = vsel %vm606_vm11, %v596_v1, 2102212464  ;;  %v6499_v7 = vmul.u32 %v622_v24, %v6460_v53  ;;  %v628_v29 = vshll.u32 %v6484_v9, 16  ;;  %v6529_v58 = vld [vmem:[%s6243_s26 + $0x18] sm:$0xff] }
  0x64   : > { %v384_v56 = vsel %vm263_vm6, %v383_v23, %v382_v35  ;;  %v614_v47 = vsel %vm604_vm12, %v611_v43, %v613_v59  ;;  %v627_v16 = vmul.u32 %v623_v50, %v6460_v53  ;;  %vm1652_vm2 = vcmp.eq.s32.totalorder %v6464_v42, 2 }
  0x65   : > { %v6478_v8 = vsel %vm6413_vm8, %v6246_v4, %v384_v56  ;;  %vm5591_vm0 = vcmp.lt.s32.totalorder %v5590_v2, 0  ;;  %vm632_vm1 = vc.u32 %v624_v61, %v628_v29  ;;  %v644_v21 = vand.u32 65535, %v614_v47 }
  0x66   : > { %v389_v62 = vmul.f32 %v6478_v8, %v6478_v8  ;;  %v525_v54 = vsel %vm5591_vm0, 0, %v5590_v2  ;;  %vm411_vm3 = vcmp.eq.s32.totalorder %v6488_v0, 2  ;;  %v630_v10 = vshll.u32 %v6499_v7, 16 }
  0x67   : > { %v526_v63 = vsub.s32 32, %v525_v54  ;;  %v527_v1 = vshll.u32 %v6442_v31, %v525_v54  ;;  %v530_v28 = vsub.s32 4294967266, %v525_v54  ;;  %v633_v18 = vsel %vm632_vm1, 1, %v6140_v55 }
  0x68   : > { %v390_v12 = vmul.f32 -0.001358992, %v389_v62  ;;  %v397_v13 = vmul.f32 -0.00019511016, %v389_v62  ;;  %v634_v25 = vadd.s32 %v628_v29, %v624_v61  ;;  %v6513_v35 = vsel %vm605_vm10, %v6426_v14, %v608_v11 }
  0x69   : > { %v528_v33 = vshrl.u32 %v510_v19, %v526_v63  ;;  %vm1649_vm4 = vcmp.eq.s32.totalorder %v6464_v42, 0  ;;  %vm408_vm5 = vcmp.eq.s32.totalorder %v6488_v0, 0  ;;  %v531_v31 = vadd.s32 127, %v530_v28 }
  0x6a   : > { %v391_v15 = vadd.f32 0.041655596, %v390_v12  ;;  %v398_v22 = vadd.f32 0.008332121, %v397_v13  ;;  %v6519_v39 = vsel %vm6468_vm15, 0, %v541_v17  ;;  %v635_v41 = vadd.s32 %v633_v18, %v627_v16 }
  0x6b   : > { %v645_v20 = vshrl.u32 %v614_v47, 16  ;;  %vm1648_vm6 = vcmp.lt.s32.totalorder %v6464_v42, 2  ;;  %vm407_vm7 = vcmp.lt.s32.totalorder %v6488_v0, 2  ;;  %v529_v14 = vor.u32 %v528_v33, %v527_v1 }
  0x6c   : > { %v392_v26 = vmul.f32 %v391_v15, %v389_v62  ;;  %v399_v27 = vmul.f32 %v398_v22, %v389_v62  ;;  %v646_v19 = vmul.u32 %v644_v21, %v6457_v30  ;;  %vm404_vm8 = vweird.f32 %v6246_v4 }
  0x6d   : > { %v532_v23 = vshll.u32 %v531_v31, 23  ;;  %v629_v37 = vshrl.u32 %v6484_v9, 16  ;;  %v631_v24 = vshrl.u32 %v6499_v7, 16  ;;  %vm636_vm9 = vc.u32 %v634_v25, %v630_v10 }
  0x6e   : > { %v393_v45 = vadd.f32 -0.4999988, %v392_v26  ;;  %v400_v46 = vadd.f32 -0.16666654, %v399_v27  ;;  %vm2737_vm10 = vcmask 130048   ;;  %v536_v44 = vcvt.s32.f32 %v529_v14 }
  0x6f   : > { %v637_v56 = vsel %vm636_vm9, 1, %v6140_v55  ;;  %v533_v43 = vor.u32 4788187, %v532_v23  ;;  %v647_v61 = vmul.u32 %v645_v20, %v6457_v30  ;;  %v648_v2 = vmul.u32 %v644_v21, %v6460_v53 }
  0x70   : > { %v394_v50 = vmul.f32 %v393_v45, %v389_v62  ;;  %v401_v52 = vmul.f32 %v400_v46, %v389_v62  ;;  %v639_v59 = vadd.s32 %v637_v56, %v635_v41  ;;  %v560_v9 = vadd.s32 3, %v6519_v39 }
  0x71   : > { %v649_v7 = vmul.u32 %v645_v20, %v6460_v53  ;;  %v534_v29 = vand.u32 2147483647, %v533_v43  ;;  %v650_v12 = vshll.u32 %v647_v61, 16  ;;  %v729_v13 = vand.u32 2139095040, %v6529_v58 }
  0x72   : > { %v395_v17 = vadd.f32 1.0, %v394_v50  ;;  %v402_v11 = vadd.f32 1.0, %v401_v52  ;;  %v640_v62 = vadd.s32 %v639_v59, %v629_v37  ;;  %v651_v16 = vshrl.u32 %v647_v61, 16 }
  0x73   : > { %v652_v15 = vshll.u32 %v648_v2, 16  ;;  %v537_v22 = vmul.f32 %v536_v44, %v534_v29  ;;  %v653_v30 = vshrl.u32 %v648_v2, 16  ;;  %vm654_vm11 = vc.u32 %v646_v19, %v650_v12 }
  0x74   : > { %v403_v47 = vmul.f32 %v402_v11, %v6478_v8  ;;  %v412_v54 = vxor.u32 2147483648, %v395_v17  ;;  %v656_v21 = vadd.s32 %v650_v12, %v646_v19  ;;  %v655_v28 = vsel %vm654_vm11, 1, %v6140_v55 }
  0x75   : > { %v538_v10 = vxor.u32 2147483648, %v537_v22  ;;  %v6542_v18 = vadd.s32 %v640_v62, %v631_v24  ;;  %v657_v8 = vadd.s32 %v655_v28, %v649_v7  ;;  %v730_v33 = vshrl.u32 %v729_v13, 23 }
  0x76   : > { %v409_v63 = vxor.u32 2147483648, %v403_v47  ;;  %v1654_v1 = vsel %vm1652_vm2, %v412_v54, %v403_v47  ;;  %v413_v53 = vsel %vm411_vm3, %v412_v54, %v403_v47  ;;  %vm658_vm14 = vc.u32 %v656_v21, %v652_v15 }
  0x77   : > { %v659_v27 = vsel %vm658_vm14, 1, %v6140_v55  ;;  %v539_v20 = vsel %vm418_vm13, %v538_v10, %v537_v22  ;;  %v6562_v23 = vadd.s32 %v656_v21, %v652_v15  ;;  %v610_v0 = vsel %vm604_vm12, %v6492_v3, %v6513_v35  ;;  %v6594_v15 = vld [vmem:[%s6243_s26 + $0x20] sm:$0xff] }
  0x78   : > { %v1651_v25 = vsel %vm1649_vm4, %v395_v17, %v409_v63  ;;  %v410_v26 = vsel %vm408_vm5, %v395_v17, %v409_v63  ;;  %v661_v45 = vadd.s32 %v659_v27, %v657_v8  ;;  %v542_v19 = vsel %vm6468_vm15, %v6249_v5, %v539_v20 }
  0x79   : > { %v1655_v31 = vsel %vm1648_vm6, %v1651_v25, %v1654_v1  ;;  %v414_v41 = vsel %vm407_vm7, %v410_v26, %v413_v53  ;;  %v544_v42 = vmul.f32 %v542_v19, %v542_v19  ;;  %v5595_v24 = vadd.s32 4294967169, %v730_v33 }
  0x7a   : > { %v1656_v46 = vsel %vm404_vm8, nan, %v1655_v31  ;;  %v415_v14 = vsel %vm404_vm8, nan, %v414_v41  ;;  %v662_v37 = vadd.s32 %v661_v45, %v651_v16  ;;  %v6571_v57 = vand.u32 3, %v6519_v39 }
  0x7b   : > { %5634 = vmatmul.msk.f32.vlgmr.msra.gmra.mxu0 %vm2737_vm10, %v1656_v46  ;;  %5642 = vmatmul.msk.f32.vlgmr.msra.gmra.mxu1 %vm2737_vm10, %v415_v14  ;;  %v545_v4 = vmul.f32 -0.001358992, %v544_v42  ;;  %v552_v50 = vmul.f32 -0.00019511016, %v544_v42  ;;  %v736_v44 = vadd.s32 1, %v5595_v24  ;;  %v6573_v56 = vand.u32 3, %v560_v9 }
  0x7c   : > { %v663_v52 = vadd.s32 %v662_v37, %v653_v30  ;;  %v664_v43 = vmul.u32 %v6451_v48, %v610_v0  ;;  %vm666_vm13 = vc.u32 %v6542_v18, %v6562_v23  ;;  %v726_v3 = vand.u32 2147483647, %v6529_v58 }
  0x7d   : > { %v546_v59 = vadd.f32 0.041655596, %v545_v4  ;;  %v553_v61 = vadd.f32 0.008332121, %v552_v50  ;;  %vm737_vm12 = vcmp.gt.s32.totalorder %v736_v44, 0  ;;  %vm1803_vm15 = vcmp.eq.s32.totalorder %v6571_v57, 0 }
  0x7e   : > { %v667_v51 = vadd.s32 1, %v663_v52  ;;  %v738_v35 = vsel %vm737_vm12, %v736_v44, 0  ;;  %vm1806_vm0 = vcmp.eq.s32.totalorder %v6571_v57, 2  ;;  %vm1802_vm1 = vcmp.lt.s32.totalorder %v6571_v57, 2 }
  0x7f   : > { %v547_v2 = vmul.f32 %v546_v59, %v544_v42  ;;  %v554_v17 = vmul.f32 %v553_v61, %v544_v42  ;;  %v740_v48 = vand.u32 31, %v738_v35  ;;  %vm562_vm2 = vcmp.lt.s32.totalorder %v6573_v56, 2 }
  0x80   : > { %v668_v11 = vsel %vm666_vm13, %v667_v51, %v663_v52  ;;  %vm563_vm3 = vcmp.eq.s32.totalorder %v6573_v56, 0  ;;  %vm559_vm4 = vweird.f32 %v6249_v5  ;;  %vm566_vm5 = vcmp.eq.s32.totalorder %v6573_v56, 2 }
  0x81   : > { %v669_v39 = vadd.s32 %v668_v11, %v664_v43  ;;  %v548_v9 = vadd.f32 -0.4999988, %v547_v2  ;;  %v555_v7 = vadd.f32 -0.16666654, %v554_v17  ;;  %v733_v62 = vand.u32 8388607, %v726_v3 }
  0x82   : > { %v6588_v12 = vsub.s32 32, %v740_v48  ;;  %v6590_v54 = vshrl.u32 %v738_v35, 5  ;;  %v743_v16 = vshll.u32 %v6134_v32, %v740_v48  ;;  %v746_v21 = vshll.u32 %v6135_v34, %v740_v48 }
  0x83   : > { %v670_v29 = vadd.s32 536870912, %v669_v39  ;;  %v549_v13 = vmul.f32 %v548_v9, %v544_v42  ;;  %v556_v47 = vmul.f32 %v555_v7, %v544_v42  ;;  %v749_v28 = vshll.u32 %v6136_v36, %v740_v48 }
  0x84   : > { %v744_v30 = vshrl.u32 %v6135_v34, %v6588_v12  ;;  %v747_v63 = vshrl.u32 %v6136_v36, %v6588_v12  ;;  %v750_v10 = vshrl.u32 %v6137_v38, %v6588_v12  ;;  %v752_v25 = vshll.u32 %v6137_v38, %v740_v48 }
  0x85   : > { %v671_v22 = vshrl.u32 %v670_v29, 30  ;;  %v550_v1 = vadd.f32 1.0, %v549_v13  ;;  %v557_v53 = vadd.f32 1.0, %v556_v47  ;;  %v753_v26 = vshrl.u32 %v6138_v40, %v6588_v12 }
  0x86   : > { %v884_v27 = vand.u32 2139095040, %v6594_v15  ;;  %v734_v41 = vor.u32 8388608, %v733_v62  ;;  %vm758_vm6 = vcmp.lt.s32.totalorder %v6590_v54, 1  ;;  %v6611_v45 = vor.u32 %v744_v30, %v743_v16 }
  0x87   : > { %v672_v8 = vshll.u32 %v671_v22, 30  ;;  %v558_v33 = vmul.f32 %v557_v53, %v542_v19  ;;  %v567_v31 = vxor.u32 2147483648, %v550_v1  ;;  %v6613_v46 = vor.u32 %v747_v63, %v746_v21 }
  0x88   : > { %v755_v14 = vshll.u32 %v6138_v40, %v740_v48  ;;  %vm573_vm7 = vcmp.lt.s32.totalorder %v6252_v6, 0  ;;  %v751_v19 = vor.u32 %v750_v10, %v749_v28  ;;  %v754_v4 = vor.u32 %v753_v26, %v752_v25 }
  0x89   : > { %v6609_v20 = vsub.s32 %v669_v39, %v672_v8  ;;  %v564_v42 = vxor.u32 2147483648, %v558_v33  ;;  %v1808_v0 = vsel %vm1806_vm0, %v567_v31, %v558_v33  ;;  %v568_v37 = vsel %vm566_vm5, %v567_v31, %v558_v33 }
  0x8a   : > { %v756_v50 = vshrl.u32 %v6139_v49, %v6588_v12  ;;  %vm760_vm9 = vcmp.lt.s32.totalorder %v6590_v54, 3  ;;  %vm761_vm11 = vcmp.lt.s32.totalorder %v6590_v54, 4  ;;  %v6640_v11 = vshll.u32 %v734_v41, 8 }
  0x8b   : > { %vm674_vm8 = vcmp.lt.s32.totalorder %v6609_v20, 0  ;;  %v675_v24 = vsub.s32 0, %v6609_v20  ;;  %v1805_v52 = vsel %vm1803_vm15, %v550_v1, %v564_v42  ;;  %v565_v44 = vsel %vm563_vm3, %v550_v1, %v564_v42 }
  0x8c   : > { %v1809_v43 = vsel %vm1802_vm1, %v1805_v52, %v1808_v0  ;;  %v569_v59 = vsel %vm562_vm2, %v565_v44, %v568_v37  ;;  %v757_v51 = vor.u32 %v756_v50, %v755_v14  ;;  %v695_v57 = vsub.s32 4, %v671_v22 }
  0x8d   : > { %v676_v61 = vsel %vm674_vm8, %v675_v24, %v6609_v20  ;;  %v1810_v35 = vsel %vm559_vm4, nan, %v1809_v43  ;;  %v570_v2 = vsel %vm559_vm4, nan, %v569_v59  ;;  %vm759_vm14 = vcmp.lt.s32.totalorder %v6590_v54, 2 }
  0x8e   : > { %v677_v17 = vclz %v676_v61  ;;  %5635 = vmatmul.msk.f32.gmra.mxu0 %vm2737_vm10, %v1810_v35  ;;  %5643 = vmatmul.msk.f32.gmra.mxu1 %vm2737_vm10, %v570_v2  ;;  %v767_v56 = vsel %vm761_vm11, %v754_v4, 920167782  ;;  %v770_v39 = vsel %vm758_vm6, %v6613_v46, %v751_v19  ;;  %v766_v5 = vsel %vm758_vm6, %v6611_v45, %v6613_v46 }
  0x8f   : > { %v768_v9 = vsel %vm760_vm9, %v751_v19, %v767_v56  ;;  %v771_v7 = vsel %vm761_vm11, %v757_v51, 1326507024  ;;  %v665_v29 = vadd.s32 %v6562_v23, %v6542_v18  ;;  %v881_v13 = vand.u32 2147483647, %v6594_v15 }
  0x90   : > { %v5593_v48 = vadd.s32 4294967294, %v677_v17  ;;  %v772_v62 = vsel %vm760_vm9, %v754_v4, %v771_v7  ;;  %v885_v47 = vshrl.u32 %v884_v27, 23  ;;  %v775_v30 = vand.u32 65535, %v6640_v11 }
  0x91   : > { %v773_v16 = vsel %vm759_vm14, %v770_v39, %v772_v62  ;;  %v776_v21 = vshrl.u32 %v6640_v11, 16  ;;  %v696_v1 = vsel %vm573_vm7, %v695_v57, %v671_v22  ;;  %v769_v18 = vsel %vm759_vm14, %v766_v5, %v768_v9 }
  0x92   : > { %vm5594_vm13 = vcmp.lt.s32.totalorder %v5593_v48, 0  ;;  %v777_v23 = vand.u32 65535, %v773_v16  ;;  %v778_v8 = vshrl.u32 %v773_v16, 16  ;;  %vm6674_vm12 = vcmp.le.f32.partialorder %v571_v60, 0.7853982 }
  0x93   : > { %v680_v63 = vsel %vm5594_vm13, 0, %v5593_v48  ;;  %v799_v26 = vand.u32 65535, %v769_v18  ;;  %v6680_v27 = vand.u32 8388607, %v881_v13  ;;  %v742_v31 = vshrl.u32 %v6134_v32, %v6588_v12 }
  0x94   : > { %v681_v53 = vsub.s32 32, %v680_v63  ;;  %v682_v28 = vshll.u32 %v6609_v20, %v680_v63  ;;  %v685_v10 = vsub.s32 4294967266, %v680_v63  ;;  %v5598_v41 = vadd.s32 4294967169, %v885_v47 }
  0x95   : > { %v698_v20 = vsel %vm6674_vm12, 0, %v696_v1  ;;  %v779_v14 = vmul.u32 %v777_v23, %v775_v30  ;;  %v780_v42 = vmul.u32 %v778_v8, %v775_v30  ;;  %v781_v60 = vmul.u32 %v777_v23, %v776_v21 }
  0x96   : > { %v683_v22 = vshrl.u32 %v665_v29, %v681_v53  ;;  %v686_v33 = vadd.s32 127, %v685_v10  ;;  %v763_v24 = vsel %vm761_vm11, %v751_v19, 2102212464  ;;  %v800_v4 = vshrl.u32 %v769_v18, 16 }
  0x97   : > { %v782_v50 = vmul.u32 %v778_v8, %v776_v21  ;;  %v783_v52 = vshll.u32 %v780_v42, 16  ;;  %v785_v44 = vshll.u32 %v781_v60, 16  ;;  %v801_v43 = vmul.u32 %v799_v26, %v775_v30 }
  0x98   : > { %v684_v0 = vor.u32 %v683_v22, %v682_v28  ;;  %v687_v37 = vshll.u32 %v686_v33, 23  ;;  %v802_v12 = vmul.u32 %v800_v4, %v775_v30  ;;  %v803_v51 = vmul.u32 %v799_v26, %v776_v21  ;;  %v6703_v26 = vld [vmem:[%s6243_s26 + $0x10] sm:$0xff] }
  0x99   : > { %v762_v35 = vsel %vm758_vm6, %v742_v31, %v6611_v45  ;;  %v764_v2 = vsel %vm760_vm9, %v6613_v46, %v763_v24  ;;  %vm787_vm15 = vc.u32 %v779_v14, %v783_v52  ;;  %v789_v17 = vadd.s32 %v783_v52, %v779_v14 }
  0x9a   : > { %v688_v59 = vor.u32 4788187, %v687_v37  ;;  %v691_v61 = vcvt.s32.f32 %v684_v0  ;;  %v788_v57 = vsel %vm787_vm15, 1, %v6140_v55  ;;  %v804_v56 = vmul.u32 %v800_v4, %v776_v21 }
  0x9b   : > { %v805_v39 = vshll.u32 %v802_v12, 16  ;;  %v784_v48 = vshrl.u32 %v780_v42, 16  ;;  %v790_v5 = vadd.s32 %v788_v57, %v782_v50  ;;  %vm791_vm0 = vc.u32 %v789_v17, %v785_v44 }
  0x9c   : > { %v689_v19 = vand.u32 2147483647, %v688_v59  ;;  %v807_v9 = vshll.u32 %v803_v51, 16  ;;  %v792_v29 = vsel %vm791_vm0, 1, %v6140_v55  ;;  %v786_v62 = vshrl.u32 %v781_v60, 16 }
  0x9d   : > { %vm809_vm1 = vc.u32 %v801_v43, %v805_v39  ;;  %v811_v45 = vadd.s32 %v805_v39, %v801_v43  ;;  %v794_v47 = vadd.s32 %v792_v29, %v790_v5  ;;  %v891_v16 = vadd.s32 1, %v5598_v41 }
  0x9e   : > { %v692_v7 = vmul.f32 %v691_v61, %v689_v19  ;;  %v810_v46 = vsel %vm809_vm1, 1, %v6140_v55  ;;  %v806_v63 = vshrl.u32 %v802_v12, 16  ;;  %v765_v21 = vsel %vm759_vm14, %v762_v35, %v764_v2 }
  0x9f   : > { %v812_v1 = vadd.s32 %v810_v46, %v804_v56  ;;  %vm813_vm2 = vc.u32 %v811_v45, %v807_v9  ;;  %v795_v18 = vadd.s32 %v794_v47, %v784_v48  ;;  %vm892_vm3 = vcmp.gt.s32.totalorder %v891_v16, 0 }
  0xa0   : > { %v693_v30 = vxor.u32 2147483648, %v692_v7  ;;  %v814_v23 = vsel %vm813_vm2, 1, %v6140_v55  ;;  %v808_v28 = vshrl.u32 %v803_v51, 16  ;;  %v893_v8 = vsel %vm892_vm3, %v891_v16, 0 }
  0xa1   : > { %v816_v10 = vadd.s32 %v814_v23, %v812_v1  ;;  %v6708_v33 = vadd.s32 %v795_v18, %v786_v62  ;;  %v6710_v54 = vadd.s32 %v811_v45, %v807_v9  ;;  %v895_v31 = vand.u32 31, %v893_v8 }
  0xa2   : > { %v694_v53 = vsel %vm573_vm7, %v693_v30, %v692_v7  ;;  %v889_v42 = vor.u32 8388608, %v6680_v27  ;;  %v6713_v6 = vand.u32 3, %v698_v20  ;;  %v715_v60 = vadd.s32 3, %v698_v20 }
  0xa3   : > { %v697_v22 = vsel %vm6674_vm12, %v6703_v26, %v694_v53  ;;  %v817_v14 = vadd.s32 %v816_v10, %v806_v63  ;;  %v819_v0 = vmul.u32 %v6640_v11, %v765_v21  ;;  %v6716_v37 = vsub.s32 32, %v895_v31 }
  0xa4   : > { %v699_v41 = vmul.f32 %v697_v22, %v697_v22  ;;  %v6718_v50 = vshrl.u32 %v893_v8, 5  ;;  %vm821_vm4 = vc.u32 %v6708_v33, %v6710_v54  ;;  %v898_v52 = vshll.u32 %v6134_v32, %v895_v31 }
  0xa5   : > { %v818_v25 = vadd.s32 %v817_v14, %v808_v28  ;;  %v899_v27 = vshrl.u32 %v6135_v34, %v6716_v37  ;;  %v901_v44 = vshll.u32 %v6135_v34, %v895_v31  ;;  %v902_v59 = vshrl.u32 %v6136_v36, %v6716_v37 }
  0xa6   : > { %v700_v24 = vmul.f32 -0.001358992, %v699_v41  ;;  %v707_v4 = vmul.f32 -0.00019511016, %v699_v41  ;;  %v904_v61 = vshll.u32 %v6136_v36, %v895_v31  ;;  %v905_v12 = vshrl.u32 %v6137_v38, %v6716_v37 }
  0xa7   : > { %v822_v11 = vadd.s32 1, %v818_v25  ;;  %v907_v51 = vshll.u32 %v6137_v38, %v895_v31  ;;  %v908_v35 = vshrl.u32 %v6138_v40, %v6716_v37  ;;  %v716_v19 = vand.u32 3, %v715_v60 }
  0xa8   : > { %v701_v20 = vadd.f32 0.041655596, %v700_v24  ;;  %v708_v43 = vadd.f32 0.008332121, %v707_v4  ;;  %v6734_v39 = vor.u32 %v899_v27, %v898_v52  ;;  %v910_v48 = vshll.u32 %v6138_v40, %v895_v31 }
  0xa9   : > { %v823_v57 = vsel %vm821_vm4, %v822_v11, %v818_v25  ;;  %v911_v5 = vshrl.u32 %v6139_v49, %v6716_v37  ;;  %vm1956_vm5 = vcmp.lt.s32.totalorder %v6713_v6, 2  ;;  %v6740_v29 = vor.u32 %v902_v59, %v901_v44 }
  0xaa   : > { %v702_v2 = vmul.f32 %v701_v20, %v699_v41  ;;  %v709_v17 = vmul.f32 %v708_v43, %v699_v41  ;;  %v824_v56 = vadd.s32 %v823_v57, %v819_v0  ;;  %v909_v45 = vor.u32 %v908_v35, %v907_v51 }
  0xab   : > { %vm714_vm6 = vweird.f32 %v6703_v26  ;;  %vm1957_vm7 = vcmp.eq.s32.totalorder %v6713_v6, 0  ;;  %v6744_v47 = vor.u32 %v905_v12, %v904_v61  ;;  %vm913_vm8 = vcmp.lt.s32.totalorder %v6718_v50, 1 }
  0xac   : > { %v703_v9 = vadd.f32 -0.4999988, %v702_v2  ;;  %v710_v7 = vadd.f32 -0.16666654, %v709_v17  ;;  %v825_v62 = vadd.s32 536870912, %v824_v56  ;;  %vm915_vm9 = vcmp.lt.s32.totalorder %v6718_v50, 3 }
  0xad   : > { %vm916_vm11 = vcmp.lt.s32.totalorder %v6718_v50, 4  ;;  %v912_v63 = vor.u32 %v911_v5, %v910_v48  ;;  %vm914_vm14 = vcmp.lt.s32.totalorder %v6718_v50, 2  ;;  %v6752_v1 = vshll.u32 %v889_v42, 8 }
  0xae   : > { %v704_v46 = vmul.f32 %v703_v9, %v699_v41  ;;  %v711_v16 = vmul.f32 %v710_v7, %v699_v41  ;;  %v6749_v30 = vshrl.u32 %v825_v62, 30  ;;  %v921_v23 = vsel %vm913_vm8, %v6734_v39, %v6740_v29 }
  0xaf   : > { %v922_v53 = vsel %vm916_vm11, %v909_v45, 920167782  ;;  %vm1960_vm13 = vcmp.eq.s32.totalorder %v6713_v6, 2  ;;  %vm721_vm12 = vcmp.eq.s32.totalorder %v716_v19, 2  ;;  %vm717_vm15 = vcmp.lt.s32.totalorder %v716_v19, 2 }
  0xb0   : > { %v705_v21 = vadd.f32 1.0, %v704_v46  ;;  %v712_v18 = vadd.f32 1.0, %v711_v16  ;;  %v827_v28 = vshll.u32 %v6749_v30, 30  ;;  %v923_v10 = vsel %vm915_vm9, %v6744_v47, %v922_v53 }
  0xb1   : > { %vm718_vm0 = vcmp.eq.s32.totalorder %v716_v19, 0  ;;  %v924_v14 = vsel %vm914_vm14, %v921_v23, %v923_v10  ;;  %v925_v42 = vsel %vm913_vm8, %v6740_v29, %v6744_v47  ;;  %v926_v60 = vsel %vm916_vm11, %v912_v63, 1326507024 }
  0xb2   : > { %v713_v8 = vmul.f32 %v712_v18, %v697_v22  ;;  %v722_v31 = vxor.u32 2147483648, %v705_v21  ;;  %v828_v41 = vsub.s32 %v824_v56, %v827_v28  ;;  %v930_v22 = vand.u32 65535, %v6752_v1  ;;  %v6789_v56 = vld [vmem:[%s6243_s26 + $0x28] sm:$0xff] }
  0xb3   : > { %v927_v52 = vsel %vm915_vm9, %v909_v45, %v926_v60  ;;  %v931_v27 = vshrl.u32 %v6752_v1, 16  ;;  %v955_v11 = vshrl.u32 %v924_v14, 16  ;;  %v897_v6 = vshrl.u32 %v6134_v32, %v6716_v37 }
  0xb4   : > { %v719_v0 = vxor.u32 2147483648, %v713_v8  ;;  %v1962_v24 = vsel %vm1960_vm13, %v722_v31, %v713_v8  ;;  %v723_v4 = vsel %vm721_vm12, %v722_v31, %v713_v8  ;;  %vm829_vm1 = vcmp.lt.s32.totalorder %v828_v41, 0 }
  0xb5   : > { %v830_v25 = vsub.s32 0, %v828_v41  ;;  %v928_v43 = vsel %vm914_vm14, %v925_v42, %v927_v52  ;;  %v954_v19 = vand.u32 65535, %v924_v14  ;;  %vm728_vm2 = vcmp.lt.s32.totalorder %v6529_v58, 0 }
  0xb6   : > { %v1959_v44 = vsel %vm1957_vm7, %v705_v21, %v719_v0  ;;  %v720_v20 = vsel %vm718_vm0, %v705_v21, %v719_v0  ;;  %v932_v51 = vand.u32 65535, %v928_v43  ;;  %v933_v57 = vshrl.u32 %v928_v43, 16 }
  0xb7   : > { %v1963_v59 = vsel %vm1956_vm5, %v1959_v44, %v1962_v24  ;;  %v724_v61 = vsel %vm717_vm15, %v720_v20, %v723_v4  ;;  %v831_v12 = vsel %vm829_vm1, %v830_v25, %v828_v41  ;;  %v957_v26 = vmul.u32 %v955_v11, %v930_v22 }
  0xb8   : > { %v1964_v35 = vsel %vm714_vm6, nan, %v1963_v59  ;;  %v725_v2 = vsel %vm714_vm6, nan, %v724_v61  ;;  %v832_v17 = vclz %v831_v12  ;;  %v934_v5 = vmul.u32 %v932_v51, %v930_v22 }
  0xb9   : > { %5636 = vmatmul.msk.f32.gmra.mxu0 %vm2737_vm10, %v1964_v35  ;;  %5644 = vmatmul.msk.f32.gmra.mxu1 %vm2737_vm10, %v725_v2  ;;  %v935_v9 = vmul.u32 %v933_v57, %v930_v22  ;;  %v936_v7 = vmul.u32 %v932_v51, %v931_v27  ;;  %v1039_v45 = vand.u32 2139095040, %v6789_v56  ;;  %v820_v62 = vadd.s32 %v6710_v54, %v6708_v33 }
  0xba   : > { %v5596_v48 = vadd.s32 4294967294, %v832_v17  ;;  %v850_v46 = vsub.s32 4, %v6749_v30  ;;  %v917_v37 = vsel %vm913_vm8, %v897_v6, %v6734_v39  ;;  %v937_v21 = vmul.u32 %v933_v57, %v931_v27 }
  0xbb   : > { %v938_v16 = vshll.u32 %v935_v9, 16  ;;  %v958_v18 = vmul.u32 %v954_v19, %v931_v27  ;;  %vm6805_vm4 = vcmp.le.f32.partialorder %v726_v3, 0.7853982  ;;  %v918_v54 = vsel %vm916_vm11, %v6744_v47, 2102212464 }
  0xbc   : > { %vm5597_vm3 = vcmp.lt.s32.totalorder %v5596_v48, 0  ;;  %v940_v10 = vshll.u32 %v936_v7, 16  ;;  %v956_v8 = vmul.u32 %v954_v19, %v930_v22  ;;  %v960_v31 = vshll.u32 %v957_v26, 16 }
  0xbd   : > { %v835_v63 = vsel %vm5597_vm3, 0, %v5596_v48  ;;  %vm942_vm5 = vc.u32 %v934_v5, %v938_v16  ;;  %v851_v3 = vsel %vm728_vm2, %v850_v46, %v6749_v30  ;;  %v1040_v42 = vshrl.u32 %v1039_v45, 23 }
  0xbe   : > { %v836_v53 = vsub.s32 32, %v835_v63  ;;  %v837_v28 = vshll.u32 %v828_v41, %v835_v63  ;;  %v840_v33 = vsub.s32 4294967266, %v835_v63  ;;  %v943_v60 = vsel %vm942_vm5, 1, %v6140_v55 }
  0xbf   : > { %v944_v0 = vadd.s32 %v938_v16, %v934_v5  ;;  %v959_v41 = vmul.u32 %v955_v11, %v931_v27  ;;  %v962_v24 = vshll.u32 %v958_v18, 16  ;;  %v941_v52 = vshrl.u32 %v936_v7, 16 }
  0xc0   : > { %v838_v39 = vshrl.u32 %v820_v62, %v836_v53  ;;  %v841_v14 = vadd.s32 127, %v840_v33  ;;  %v945_v44 = vadd.s32 %v943_v60, %v937_v21  ;;  %v939_v47 = vshrl.u32 %v935_v9, 16 }
  0xc1   : > { %vm946_vm6 = vc.u32 %v944_v0, %v940_v10  ;;  %vm964_vm7 = vc.u32 %v956_v8, %v960_v31  ;;  %v966_v22 = vadd.s32 %v960_v31, %v956_v8  ;;  %v961_v12 = vshrl.u32 %v957_v26, 16 }
  0xc2   : > { %v839_v4 = vor.u32 %v838_v39, %v837_v28  ;;  %v842_v25 = vshll.u32 %v841_v14, 23  ;;  %v947_v59 = vsel %vm946_vm6, 1, %v6140_v55  ;;  %v965_v30 = vsel %vm964_vm7, 1, %v6140_v55 }
  0xc3   : > { %v949_v61 = vadd.s32 %v947_v59, %v945_v44  ;;  %v967_v51 = vadd.s32 %v965_v30, %v959_v41  ;;  %vm968_vm8 = vc.u32 %v966_v22, %v962_v24  ;;  %v919_v11 = vsel %vm915_vm9, %v6740_v29, %v918_v54 }
  0xc4   : > { %v843_v20 = vor.u32 4788187, %v842_v25  ;;  %v846_v43 = vcvt.s32.f32 %v839_v4  ;;  %v969_v35 = vsel %vm968_vm8, 1, %v6140_v55  ;;  %v5601_v2 = vadd.s32 4294967169, %v1040_v42 }
  0xc5   : > { %v853_v17 = vsel %vm6805_vm4, 0, %v851_v3  ;;  %v950_v57 = vadd.s32 %v949_v61, %v939_v47  ;;  %v963_v6 = vshrl.u32 %v958_v18, 16  ;;  %v971_v19 = vadd.s32 %v969_v35, %v967_v51 }
  0xc6   : > { %v844_v27 = vand.u32 2147483647, %v843_v20  ;;  %v6824_v5 = vadd.s32 %v966_v22, %v962_v24  ;;  %v1046_v9 = vadd.s32 1, %v5601_v2  ;;  %v920_v7 = vsel %vm914_vm14, %v917_v37, %v919_v11 }
  0xc7   : > { %v6828_v26 = vadd.s32 %v950_v57, %v941_v52  ;;  %v972_v45 = vadd.s32 %v971_v19, %v961_v12  ;;  %v870_v62 = vadd.s32 3, %v853_v17  ;;  %v1036_v16 = vand.u32 2147483647, %v6789_v56 }
  0xc8   : > { %v847_v48 = vmul.f32 %v846_v43, %v844_v27  ;;  %vm1047_vm9 = vcmp.gt.s32.totalorder %v1046_v9, 0  ;;  %v974_v18 = vmul.u32 %v6752_v1, %v920_v7  ;;  %v6843_v33 = vand.u32 3, %v853_v17  ;;  %v6891_v7 = vld [vmem:[%s6243_s26 + $0x30] sm:$0xff] }
  0xc9   : > { %v973_v46 = vadd.s32 %v972_v45, %v963_v6  ;;  %v1048_v63 = vsel %vm1047_vm9, %v1046_v9, 0  ;;  %vm976_vm11 = vc.u32 %v6828_v26, %v6824_v5  ;;  %v6845_v54 = vand.u32 3, %v870_v62 }
  0xca   : > { %v848_v29 = vxor.u32 2147483648, %v847_v48  ;;  %v1050_v50 = vand.u32 31, %v1048_v63  ;;  %v1043_v8 = vand.u32 8388607, %v1036_v16  ;;  %v6851_v31 = vshrl.u32 %v1048_v63, 5 }
  0xcb   : > { %v977_v53 = vadd.s32 1, %v973_v46  ;;  %vm2114_vm14 = vcmp.eq.s32.totalorder %v6843_v33, 2  ;;  %vm2111_vm13 = vcmp.eq.s32.totalorder %v6843_v33, 0  ;;  %vm873_vm12 = vcmp.eq.s32.totalorder %v6845_v54, 0 }
  0xcc   : > { %v849_v21 = vsel %vm728_vm2, %v848_v29, %v847_v48  ;;  %v6847_v10 = vsub.s32 32, %v1050_v50  ;;  %v1053_v23 = vshll.u32 %v6134_v32, %v1050_v50  ;;  %v1062_v42 = vshll.u32 %v6137_v38, %v1050_v50 }
  0xcd   : > { %v6839_v37 = vsel %vm6805_vm4, %v6529_v58, %v849_v21  ;;  %v978_v1 = vsel %vm976_vm11, %v977_v53, %v973_v46  ;;  %v1056_v0 = vshll.u32 %v6135_v34, %v1050_v50  ;;  %v1059_v44 = vshll.u32 %v6136_v36, %v1050_v50 }
  0xce   : > { %v854_v28 = vmul.f32 %v6839_v37, %v6839_v37  ;;  %v979_v3 = vadd.s32 %v978_v1, %v974_v18  ;;  %v1054_v60 = vshrl.u32 %v6135_v34, %v6847_v10  ;;  %v1057_v41 = vshrl.u32 %v6136_v36, %v6847_v10 }
  0xcf   : > { %v1063_v24 = vshrl.u32 %v6138_v40, %v6847_v10  ;;  %v1060_v47 = vshrl.u32 %v6137_v38, %v6847_v10  ;;  %v1065_v22 = vshll.u32 %v6138_v40, %v1050_v50  ;;  %v1066_v20 = vshrl.u32 %v6139_v49, %v6847_v10 }
  0xd0   : > { %v855_v39 = vmul.f32 -0.001358992, %v854_v28  ;;  %v862_v14 = vmul.f32 -0.00019511016, %v854_v28  ;;  %v980_v52 = vadd.s32 536870912, %v979_v3  ;;  %v6873_v12 = vor.u32 %v1054_v60, %v1053_v23 }
  0xd1   : > { %v1064_v61 = vor.u32 %v1063_v24, %v1062_v42  ;;  %v6875_v51 = vor.u32 %v1057_v41, %v1056_v0  ;;  %vm1071_vm15 = vcmp.lt.s32.totalorder %v6851_v31, 4  ;;  %vm2110_vm0 = vcmp.lt.s32.totalorder %v6843_v33, 2 }
  0xd2   : > { %v856_v4 = vadd.f32 0.041655596, %v855_v39  ;;  %v863_v25 = vadd.f32 0.008332121, %v862_v14  ;;  %v6869_v30 = vshrl.u32 %v980_v52, 30  ;;  %vm872_vm1 = vcmp.lt.s32.totalorder %v6845_v54, 2 }
  0xd3   : > { %vm1068_vm2 = vcmp.lt.s32.totalorder %v6851_v31, 1  ;;  %vm869_vm3 = vweird.f32 %v6529_v58  ;;  %v1044_v2 = vor.u32 8388608, %v1043_v8  ;;  %v6883_v17 = vor.u32 %v1060_v47, %v1059_v44 }
  0xd4   : > { %v857_v43 = vmul.f32 %v856_v4, %v854_v28  ;;  %v864_v59 = vmul.f32 %v863_v25, %v854_v28  ;;  %v982_v35 = vshll.u32 %v6869_v30, 30  ;;  %v1067_v57 = vor.u32 %v1066_v20, %v1065_v22 }
  0xd5   : > { %vm1070_vm4 = vcmp.lt.s32.totalorder %v6851_v31, 3  ;;  %v1077_v9 = vsel %vm1071_vm15, %v1064_v61, 920167782  ;;  %vm876_vm5 = vcmp.eq.s32.totalorder %v6845_v54, 2  ;;  %vm1069_vm6 = vcmp.lt.s32.totalorder %v6851_v31, 2 }
  0xd6   : > { %v858_v27 = vadd.f32 -0.4999988, %v857_v43  ;;  %v865_v11 = vadd.f32 -0.16666654, %v864_v59  ;;  %v6886_v48 = vsub.s32 %v979_v3, %v982_v35  ;;  %v1076_v45 = vsel %vm1068_vm2, %v6873_v12, %v6875_v51 }
  0xd7   : > { %v1191_v29 = vand.u32 2147483647, %v6891_v7  ;;  %v1078_v21 = vsel %vm1070_vm4, %v6883_v17, %v1077_v9  ;;  %v1080_v18 = vsel %vm1068_vm2, %v6875_v51, %v6883_v17  ;;  %v1081_v50 = vsel %vm1071_vm15, %v1067_v57, 1326507024 }
  0xd8   : > { %v859_v6 = vmul.f32 %v858_v27, %v854_v28  ;;  %v866_v19 = vmul.f32 %v865_v11, %v854_v28  ;;  %vm984_vm7 = vcmp.lt.s32.totalorder %v6886_v48, 0  ;;  %v985_v63 = vsub.s32 0, %v6886_v48 }
  0xd9   : > { %v6911_v53 = vshll.u32 %v1044_v2, 8  ;;  %v1079_v23 = vsel %vm1069_vm6, %v1076_v45, %v1078_v21  ;;  %vm883_vm8 = vcmp.lt.s32.totalorder %v6594_v15, 0  ;;  %v975_v39 = vadd.s32 %v6824_v5, %v6828_v26 }
  0xda   : > { %v860_v62 = vadd.f32 1.0, %v859_v6  ;;  %v867_v46 = vadd.f32 1.0, %v866_v19  ;;  %v986_v8 = vsel %vm984_vm7, %v985_v63, %v6886_v48  ;;  %v1082_v3 = vsel %vm1070_vm4, %v1064_v61, %v1081_v50 }
  0xdb   : > { %v987_v14 = vclz %v986_v8  ;;  %v1194_v42 = vand.u32 2139095040, %v6891_v7  ;;  %v1083_v41 = vsel %vm1069_vm6, %v1080_v18, %v1082_v3  ;;  %v1085_v4 = vand.u32 65535, %v6911_v53 }
  0xdc   : > { %v868_v28 = vmul.f32 %v867_v46, %v6839_v37  ;;  %v877_v1 = vxor.u32 2147483648, %v860_v62  ;;  %v1086_v5 = vshrl.u32 %v6911_v53, 16  ;;  %v1110_v26 = vshrl.u32 %v1079_v23, 16 }
  0xdd   : > { %v5599_v24 = vadd.s32 4294967294, %v987_v14  ;;  %v1087_v44 = vand.u32 65535, %v1083_v41  ;;  %v1088_v47 = vshrl.u32 %v1083_v41, 16  ;;  %vm6941_vm9 = vcmp.le.f32.partialorder %v881_v13, 0.7853982 }
  0xde   : > { %v874_v60 = vxor.u32 2147483648, %v868_v28  ;;  %v2116_v37 = vsel %vm2114_vm14, %v877_v1, %v868_v28  ;;  %v878_v0 = vsel %vm876_vm5, %v877_v1, %v868_v28  ;;  %v1052_v59 = vshrl.u32 %v6134_v32, %v6847_v10 }
  0xdf   : > { %vm5600_vm11 = vcmp.lt.s32.totalorder %v5599_v24, 0  ;;  %v1005_v54 = vsub.s32 4, %v6869_v30  ;;  %v1109_v2 = vand.u32 65535, %v1079_v23  ;;  %v1089_v57 = vmul.u32 %v1087_v44, %v1085_v4 }
  0xe0   : > { %v2113_v25 = vsel %vm2111_vm13, %v860_v62, %v874_v60  ;;  %v875_v52 = vsel %vm873_vm12, %v860_v62, %v874_v60  ;;  %v990_v27 = vsel %vm5600_vm11, 0, %v5599_v24  ;;  %v1090_v10 = vmul.u32 %v1088_v47, %v1085_v4 }
  0xe1   : > { %v2117_v22 = vsel %vm2110_vm0, %v2113_v25, %v2116_v37  ;;  %v879_v20 = vsel %vm872_vm1, %v875_v52, %v878_v0  ;;  %v991_v13 = vsub.s32 32, %v990_v27  ;;  %v992_v11 = vshll.u32 %v6886_v48, %v990_v27 }
  0xe2   : > { %v2118_v61 = vsel %vm869_vm3, nan, %v2117_v22  ;;  %v880_v33 = vsel %vm869_vm3, nan, %v879_v20  ;;  %v995_v35 = vsub.s32 4294967266, %v990_v27  ;;  %v1112_v6 = vmul.u32 %v1110_v26, %v1085_v4 }
  0xe3   : > { %5637 = vmatmul.msk.f32.gmra.mxu0 %vm2737_vm10, %v2118_v61  ;;  %5645 = vmatmul.msk.f32.gmra.mxu1 %vm2737_vm10, %v880_v33  ;;  %v1195_v19 = vshrl.u32 %v1194_v42, 23  ;;  %v993_v9 = vshrl.u32 %v975_v39, %v991_v13  ;;  %v1072_v58 = vsel %vm1068_vm2, %v1052_v59, %v6873_v12  ;;  %v1091_v62 = vmul.u32 %v1087_v44, %v1086_v5 }
  0xe4   : > { %v996_v45 = vadd.s32 127, %v995_v35  ;;  %v1006_v46 = vsel %vm883_vm8, %v1005_v54, %v6869_v30  ;;  %v1073_v48 = vsel %vm1071_vm15, %v6883_v17, 2102212464  ;;  %v1092_v63 = vmul.u32 %v1088_v47, %v1086_v5 }
  0xe5   : > { %v1093_v21 = vshll.u32 %v1090_v10, 16  ;;  %v994_v18 = vor.u32 %v993_v9, %v992_v11  ;;  %v1095_v28 = vshll.u32 %v1091_v62, 16  ;;  %v1113_v1 = vmul.u32 %v1109_v2, %v1086_v5 }
  0xe6   : > { %v997_v50 = vshll.u32 %v996_v45, 23  ;;  %v1111_v23 = vmul.u32 %v1109_v2, %v1085_v4  ;;  %v1115_v39 = vshll.u32 %v1112_v6, 16  ;;  %v1074_v30 = vsel %vm1070_vm4, %v6875_v51, %v1073_v48 }
  0xe7   : > { %vm1097_vm14 = vc.u32 %v1089_v57, %v1093_v21  ;;  %v1099_v8 = vadd.s32 %v1093_v21, %v1089_v57  ;;  %v1001_v14 = vcvt.s32.f32 %v994_v18  ;;  %v6970_v17 = vsel %vm6941_vm9, 0, %v1006_v46 }
  0xe8   : > { %v998_v12 = vor.u32 4788187, %v997_v50  ;;  %v1098_v3 = vsel %vm1097_vm14, 1, %v6140_v55  ;;  %v1114_v60 = vmul.u32 %v1110_v26, %v1086_v5  ;;  %v5604_v37 = vadd.s32 4294967169, %v1195_v19 }
  0xe9   : > { %v1100_v42 = vadd.s32 %v1098_v3, %v1092_v63  ;;  %v1094_v41 = vshrl.u32 %v1090_v10, 16  ;;  %vm1101_vm13 = vc.u32 %v1099_v8, %v1095_v28  ;;  %v1117_v24 = vshll.u32 %v1113_v1, 16 }
  0xea   : > { %v999_v0 = vand.u32 2147483647, %v998_v12  ;;  %v1075_v4 = vsel %vm1069_vm6, %v1072_v58, %v1074_v30  ;;  %v1102_v25 = vsel %vm1101_vm13, 1, %v6140_v55  ;;  %vm1119_vm12 = vc.u32 %v1111_v23, %v1115_v39 }
  0xeb   : > { %v1121_v51 = vadd.s32 %v1115_v39, %v1111_v23  ;;  %v1096_v44 = vshrl.u32 %v1091_v62, 16  ;;  %v1104_v47 = vadd.s32 %v1102_v25, %v1100_v42  ;;  %v1120_v22 = vsel %vm1119_vm12, 1, %v6140_v55 }
  0xec   : > { %v1002_v52 = vmul.f32 %v1001_v14, %v999_v0  ;;  %v1116_v20 = vshrl.u32 %v1112_v6, 16  ;;  %v1122_v59 = vadd.s32 %v1120_v22, %v1114_v60  ;;  %v1201_v5 = vadd.s32 1, %v5604_v37 }
  0xed   : > { %vm1123_vm15 = vc.u32 %v1121_v51, %v1117_v24  ;;  %v1025_v61 = vadd.s32 3, %v6970_v17  ;;  %v1105_v33 = vadd.s32 %v1104_v47, %v1094_v41  ;;  %v1118_v27 = vshrl.u32 %v1113_v1, 16 }
  0xee   : > { %v1003_v26 = vxor.u32 2147483648, %v1002_v52  ;;  %v1124_v31 = vsel %vm1123_vm15, 1, %v6140_v55  ;;  %v6978_v54 = vadd.s32 %v1121_v51, %v1117_v24  ;;  %vm1202_vm0 = vcmp.gt.s32.totalorder %v1201_v5, 0 }
  0xef   : > { %v1126_v13 = vadd.s32 %v1124_v31, %v1122_v59  ;;  %v6982_v35 = vadd.s32 %v1105_v33, %v1096_v44  ;;  %v1203_v2 = vsel %vm1202_vm0, %v1201_v5, 0  ;;  %v1198_v6 = vand.u32 8388607, %v1191_v29 }
  0xf0   : > { %v1004_v11 = vsel %vm883_vm8, %v1003_v26, %v1002_v52  ;;  %v1205_v19 = vand.u32 31, %v1203_v2  ;;  %v6993_v45 = vand.u32 3, %v1025_v61  ;;  %v1129_v58 = vmul.u32 %v6911_v53, %v1075_v4 }
  0xf1   : > { %v6987_v57 = vsel %vm6941_vm9, %v6594_v15, %v1004_v11  ;;  %v1127_v10 = vadd.s32 %v1126_v13, %v1116_v20  ;;  %v6996_v62 = vshrl.u32 %v1203_v2, 5  ;;  %vm1131_vm1 = vc.u32 %v6982_v35, %v6978_v54 }
  0xf2   : > { %v1009_v9 = vmul.f32 %v6987_v57, %v6987_v57  ;;  %v7000_v43 = vsub.s32 32, %v1205_v19  ;;  %v1208_v48 = vshll.u32 %v6134_v32, %v1205_v19  ;;  %v1211_v18 = vshll.u32 %v6135_v34, %v1205_v19 }
  0xf3   : > { %v1128_v46 = vadd.s32 %v1127_v10, %v1118_v27  ;;  %v1214_v50 = vshll.u32 %v6136_v36, %v1205_v19  ;;  %v1217_v8 = vshll.u32 %v6137_v38, %v1205_v19  ;;  %v1199_v3 = vor.u32 8388608, %v1198_v6 }
  0xf4   : > { %v1010_v63 = vmul.f32 -0.001358992, %v1009_v9  ;;  %v1017_v21 = vmul.f32 -0.00019511016, %v1009_v9  ;;  %v1209_v53 = vshrl.u32 %v6135_v34, %v7000_v43  ;;  %v1212_v1 = vshrl.u32 %v6136_v36, %v7000_v43 }
  0xf5   : > { %v1132_v28 = vadd.s32 1, %v1128_v46  ;;  %v1215_v12 = vshrl.u32 %v6137_v38, %v7000_v43  ;;  %v1218_v14 = vshrl.u32 %v6138_v40, %v7000_v43  ;;  %v1220_v42 = vshll.u32 %v6138_v40, %v1205_v19 }
  0xf6   : > { %v1011_v23 = vadd.f32 0.041655596, %v1010_v63  ;;  %v1018_v39 = vadd.f32 0.008332121, %v1017_v21  ;;  %v7015_v41 = vor.u32 %v1209_v53, %v1208_v48  ;;  %vm1028_vm2 = vcmp.eq.s32.totalorder %v6993_v45, 0  ;;  %v7061_v21 = vld [vmem:[%s6243_s26 + $0x38] sm:$0xff] }
  0xf7   : > { %v1133_v30 = vsel %vm1131_vm1, %v1132_v28, %v1128_v46  ;;  %v7018_v24 = vor.u32 %v1212_v1, %v1211_v18  ;;  %v7020_v4 = vor.u32 %v1215_v12, %v1214_v50  ;;  %v1219_v25 = vor.u32 %v1218_v14, %v1217_v8  ;;  %s245_s26 = scalar_lea.vmem [#allocation2], %s5583_s18  ;;  %s6090_s18 = scalar_lea.hbm %s9358_s6, 128 }
  0xf8   : > { %v1012_v60 = vmul.f32 %v1011_v23, %v1009_v9  ;;  %v1019_v37 = vmul.f32 %v1018_v39, %v1009_v9  ;;  %v1134_v0 = vadd.s32 %v1133_v30, %v1129_v58  ;;  %v1221_v51 = vshrl.u32 %v6139_v49, %v7000_v43  ;;  %s5514_s11 = sshll.u32 %s245_s26, 4  ;;  %p6092_p1 = scmp.lt.s32.totalorder %s6090_s18, %s6086_s15  ;;  %s5515_s11 = int_to_ptr.vmem [resolvable:$true] %s5514_s11 }
  0xf9   : > { %vm1027_vm3 = vcmp.lt.s32.totalorder %v6993_v45, 2  ;;  %vm1223_vm4 = vcmp.lt.s32.totalorder %v6996_v62, 1  ;;  %vm1024_vm5 = vweird.f32 %v6594_v15  ;;  %v2263_v22 = vand.u32 3, %v6970_v17 }
  0xfa   : > { %v1013_v52 = vadd.f32 -0.4999988, %v1012_v60  ;;  %v1020_v44 = vadd.f32 -0.16666654, %v1019_v37  ;;  %v1135_v47 = vadd.s32 536870912, %v1134_v0  ;;  %v1222_v20 = vor.u32 %v1221_v51, %v1220_v42  ;;  %p6093_p2 = por %p6092_p1, %p6091_p0 }
  0xfb   : > { %vm1226_vm6 = vcmp.lt.s32.totalorder %v6996_v62, 4  ;;  %v7029_v59 = vshll.u32 %v1199_v3, 8  ;;  %vm1225_vm7 = vcmp.lt.s32.totalorder %v6996_v62, 3  ;;  %vm1224_vm8 = vcmp.lt.s32.totalorder %v6996_v62, 2 }
  0xfc   : > { %v1014_v5 = vmul.f32 %v1013_v52, %v1009_v9  ;;  %v1021_v26 = vmul.f32 %v1020_v44, %v1009_v9  ;;  %v7031_v61 = vshrl.u32 %v1135_v47, 30  ;;  %v1231_v33 = vsel %vm1223_vm4, %v7015_v41, %v7018_v24  ;;  %p6094_p3 = pnand %p6093_p2, %p6089_p13 }
  0xfd   : > { %v1232_v17 = vsel %vm1226_vm6, %v1219_v25, 920167782  ;;  %v1236_v31 = vsel %vm1226_vm6, %v1222_v20, 1326507024  ;;  %v1235_v2 = vsel %vm1223_vm4, %v7018_v24, %v7020_v4  ;;  %vm1031_vm9 = vcmp.eq.s32.totalorder %v6993_v45, 2 }
  0xfe   : > { %v1015_v27 = vadd.f32 1.0, %v1014_v5  ;;  %v1022_v13 = vadd.f32 1.0, %v1021_v26  ;;  %v1137_v11 = vshll.u32 %v7031_v61, 30  ;;  %vm2268_vm11 = vcmp.eq.s32.totalorder %v2263_v22, 2 }
  0xff   : > { %v1233_v10 = vsel %vm1225_vm7, %v7020_v4, %v1232_v17  ;;  %v1237_v6 = vsel %vm1225_vm7, %v1219_v25, %v1236_v31  ;;  %vm2264_vm14 = vcmp.lt.s32.totalorder %v2263_v22, 2  ;;  %vm2265_vm13 = vcmp.eq.s32.totalorder %v2263_v22, 0 }
 0x100   : > { %v1023_v19 = vmul.f32 %v1022_v13, %v6987_v57  ;;  %v1032_v9 = vxor.u32 2147483648, %v1015_v27  ;;  %v1138_v58 = vsub.s32 %v1134_v0, %v1137_v11  ;;  %v1234_v46 = vsel %vm1224_vm8, %v1231_v33, %v1233_v10 }
 0x101   : > { %v1238_v48 = vsel %vm1224_vm8, %v1235_v2, %v1237_v6  ;;  %v1240_v63 = vand.u32 65535, %v7029_v59  ;;  %v1241_v57 = vshrl.u32 %v7029_v59, 16  ;;  %v1265_v12 = vshrl.u32 %v1234_v46, 16 }
 0x102   : > { %v1029_v18 = vxor.u32 2147483648, %v1023_v19  ;;  %v1033_v50 = vsel %vm1031_vm9, %v1032_v9, %v1023_v19  ;;  %v2270_v28 = vsel %vm2268_vm11, %v1032_v9, %v1023_v19  ;;  %vm1139_vm12 = vcmp.lt.s32.totalorder %v1138_v58, 0 }
 0x103   : > { %v1140_v53 = vsub.s32 0, %v1138_v58  ;;  %v1242_v1 = vand.u32 65535, %v1238_v48  ;;  %v1243_v8 = vshrl.u32 %v1238_v48, 16  ;;  %v1349_v14 = vand.u32 2139095040, %v7061_v21 }
 0x104   : > { %v1030_v23 = vsel %vm1028_vm2, %v1015_v27, %v1029_v18  ;;  %v2267_v39 = vsel %vm2265_vm13, %v1015_v27, %v1029_v18  ;;  %v1264_v47 = vand.u32 65535, %v1234_v46  ;;  %v1130_v22 = vadd.s32 %v6978_v54, %v6982_v35 }
 0x105   : > { %v1034_v30 = vsel %vm1027_vm3, %v1030_v23, %v1033_v50  ;;  %v2271_v3 = vsel %vm2264_vm14, %v2267_v39, %v2270_v28  ;;  %v1141_v42 = vsel %vm1139_vm12, %v1140_v53, %v1138_v58  ;;  %v1244_v60 = vmul.u32 %v1242_v1, %v1240_v63 }
 0x106   : > { %v1035_v37 = vsel %vm1024_vm5, nan, %v1034_v30  ;;  %v2272_v0 = vsel %vm1024_vm5, nan, %v2271_v3  ;;  %v1142_v25 = vclz %v1141_v42  ;;  %v1245_v51 = vmul.u32 %v1243_v8, %v1240_v63 }
 0x107   : > { %5646 = vmatmul.msk.f32.vlgmr.msra.gmra.mxu3 %vm2737_vm10, %v1035_v37  ;;  %5638 = vmatmul.msk.f32.gmra.mxu0 %vm2737_vm10, %v2272_v0  ;;  %v1246_v52 = vmul.u32 %v1242_v1, %v1241_v57  ;;  %v1207_v20 = vshrl.u32 %v6134_v32, %v7000_v43  ;;  %v1247_v5 = vmul.u32 %v1243_v8, %v1241_v57  ;;  %v1350_v26 = vshrl.u32 %v1349_v14, 23 }
 0x108   : > { %v5602_v44 = vadd.s32 4294967294, %v1142_v25  ;;  %v1248_v45 = vshll.u32 %v1245_v51, 16  ;;  %v1267_v15 = vmul.u32 %v1265_v12, %v1240_v63  ;;  %v1268_v10 = vmul.u32 %v1264_v47, %v1241_v57 }
 0x109   : > { %v1250_v17 = vshll.u32 %v1246_v52, 16  ;;  %vm1038_vm1 = vcmp.lt.s32.totalorder %v6789_v56, 0  ;;  %v1227_v54 = vsel %vm1223_vm4, %v1207_v20, %v7015_v41  ;;  %v1266_v43 = vmul.u32 %v1264_v47, %v1240_v63 }
 0x10a   : > { %vm5603_vm15 = vcmp.lt.s32.totalorder %v5602_v44, 0  ;;  %vm1252_vm0 = vc.u32 %v1244_v60, %v1248_v45  ;;  %v1254_v27 = vadd.s32 %v1248_v45, %v1244_v60  ;;  %v1228_v9 = vsel %vm1226_vm6, %v7020_v4, 2102212464 }
 0x10b   : > { %v1145_v33 = vsel %vm5603_vm15, 0, %v5602_v44  ;;  %v1253_v31 = vsel %vm1252_vm0, 1, %v6140_v55  ;;  %v5607_v46 = vadd.s32 4294967169, %v1350_v26  ;;  %v1249_v48 = vshrl.u32 %v1245_v51, 16 }
 0x10c   : > { %v1146_v13 = vsub.s32 32, %v1145_v33  ;;  %v1147_v11 = vshll.u32 %v1138_v58, %v1145_v33  ;;  %v1150_v2 = vsub.s32 4294967266, %v1145_v33  ;;  %v1255_v35 = vadd.s32 %v1253_v31, %v1247_v5 }
 0x10d   : > { %vm1256_vm2 = vc.u32 %v1254_v27, %v1250_v17  ;;  %v1269_v58 = vmul.u32 %v1265_v12, %v1241_v57  ;;  %v1270_v18 = vshll.u32 %v1267_v15, 16  ;;  %v1272_v1 = vshll.u32 %v1268_v10, 16 }
 0x10e   : > { %v1148_v6 = vshrl.u32 %v1130_v22, %v1146_v13  ;;  %v1151_v19 = vadd.s32 127, %v1150_v2  ;;  %v1257_v53 = vsel %vm1256_vm2, 1, %v6140_v55  ;;  %v1160_v41 = vsub.s32 4, %v7031_v61 }
 0x10f   : > { %v1259_v8 = vadd.s32 %v1257_v53, %v1255_v35  ;;  %vm1274_vm3 = vc.u32 %v1266_v43, %v1270_v18  ;;  %v1276_v63 = vadd.s32 %v1270_v18, %v1266_v43  ;;  %v1251_v14 = vshrl.u32 %v1246_v52, 16 }
 0x110   : > { %v1149_v50 = vor.u32 %v1148_v6, %v1147_v11  ;;  %v1152_v28 = vshll.u32 %v1151_v19, 23  ;;  %v1275_v4 = vsel %vm1274_vm3, 1, %v6140_v55  ;;  %v1271_v3 = vshrl.u32 %v1267_v15, 16 }
 0x111   : > { %v1260_v30 = vadd.s32 %v1259_v8, %v1249_v48  ;;  %v1277_v42 = vadd.s32 %v1275_v4, %v1269_v58  ;;  %vm1278_vm4 = vc.u32 %v1276_v63, %v1272_v1  ;;  %v1229_v12 = vsel %vm1225_vm7, %v7018_v24, %v1228_v9 }
 0x112   : > { %v1153_v23 = vor.u32 4788187, %v1152_v28  ;;  %v1156_v39 = vcvt.s32.f32 %v1149_v50  ;;  %v1279_v60 = vsel %vm1278_vm4, 1, %v6140_v55  ;;  %v1356_v37 = vadd.s32 1, %v5607_v46 }
 0x113   : > { %v1161_v0 = vsel %vm1038_vm1, %v1160_v41, %v7031_v61  ;;  %v1273_v25 = vshrl.u32 %v1268_v10, 16  ;;  %v1281_v51 = vadd.s32 %v1279_v60, %v1277_v42  ;;  %v7098_v44 = vadd.s32 %v1260_v30, %v1251_v14 }
 0x114   : > { %v1154_v57 = vand.u32 2147483647, %v1153_v23  ;;  %v7100_v45 = vadd.s32 %v1276_v63, %v1272_v1  ;;  %vm1357_vm5 = vcmp.gt.s32.totalorder %v1356_v37, 0  ;;  %vm1037_vm6 = vcmp.le.f32.partialorder %v1036_v16, 0.7853982 }
 0x115   : > { %v1230_v24 = vsel %vm1224_vm8, %v1227_v54, %v1229_v12  ;;  %v1282_v47 = vadd.s32 %v1281_v51, %v1271_v3  ;;  %v1358_v22 = vsel %vm1357_vm5, %v1356_v37, 0  ;;  %v1163_v5 = vsel %vm1037_vm6, 0, %v1161_v0 }
 0x116   : > { %v1157_v52 = vmul.f32 %v1156_v39, %v1154_v57  ;;  %v1346_v61 = vand.u32 2147483647, %v7061_v21  ;;  %v1360_v15 = vand.u32 31, %v1358_v22  ;;  %v1284_v17 = vmul.u32 %v7029_v59, %v1230_v24 }
 0x117   : > { %v1283_v26 = vadd.s32 %v1282_v47, %v1273_v25  ;;  %vm1286_vm7 = vc.u32 %v7098_v44, %v7100_v45  ;;  %v1180_v62 = vadd.s32 3, %v1163_v5  ;;  %v7115_v11 = vand.u32 3, %v1163_v5 }
 0x118   : > { %v1158_v20 = vxor.u32 2147483648, %v1157_v52  ;;  %v7113_v27 = vsub.s32 32, %v1360_v15  ;;  %v1353_v2 = vand.u32 8388607, %v1346_v61  ;;  %v7119_v10 = vshrl.u32 %v1358_v22, 5 }
 0x119   : > { %v1287_v31 = vadd.s32 1, %v1283_v26  ;;  %v1366_v59 = vshll.u32 %v6135_v34, %v1360_v15  ;;  %v1369_v35 = vshll.u32 %v6136_v36, %v1360_v15  ;;  %v1372_v43 = vshll.u32 %v6137_v38, %v1360_v15 }
 0x11a   : > { %v1159_v33 = vsel %vm1038_vm1, %v1158_v20, %v1157_v52  ;;  %v1375_v46 = vshll.u32 %v6138_v40, %v1360_v15  ;;  %v1367_v48 = vshrl.u32 %v6136_v36, %v7113_v27  ;;  %v1370_v58 = vshrl.u32 %v6137_v38, %v7113_v27 }
 0x11b   : > { %v1162_v16 = vsel %vm1037_vm6, %v6789_v56, %v1159_v33  ;;  %v1288_v54 = vsel %vm1286_vm7, %v1287_v31, %v1283_v26  ;;  %v1373_v18 = vshrl.u32 %v6138_v40, %v7113_v27  ;;  %v1376_v50 = vshrl.u32 %v6139_v49, %v7113_v27 }
 0x11c   : > { %v1164_v13 = vmul.f32 %v1162_v16, %v1162_v16  ;;  %v1289_v9 = vadd.s32 %v1288_v54, %v1284_v17  ;;  %v1181_v1 = vand.u32 3, %v1180_v62  ;;  %vm2422_vm8 = vcmp.eq.s32.totalorder %v7115_v11, 2 }
 0x11d   : > { %v1354_v8 = vor.u32 8388608, %v1353_v2  ;;  %v1363_v63 = vshll.u32 %v6134_v32, %v1360_v15  ;;  %v1364_v36 = vshrl.u32 %v6135_v34, %v7113_v27  ;;  %v1377_v40 = vor.u32 %v1376_v50, %v1375_v46 }
 0x11e   : > { %v1165_v6 = vmul.f32 -0.001358992, %v1164_v13  ;;  %v1172_v19 = vmul.f32 -0.00019511016, %v1164_v13  ;;  %v1290_v41 = vadd.s32 536870912, %v1289_v9  ;;  %vm2419_vm9 = vcmp.eq.s32.totalorder %v7115_v11, 0 }
 0x11f   : > { %v7140_v49 = vor.u32 %v1367_v48, %v1366_v59  ;;  %v7142_v14 = vor.u32 %v1370_v58, %v1369_v35  ;;  %v1374_v4 = vor.u32 %v1373_v18, %v1372_v43  ;;  %vm1381_vm11 = vcmp.lt.s32.totalorder %v7119_v10, 4 }
 0x120   : > { %v1166_v28 = vadd.f32 0.041655596, %v1165_v6  ;;  %v1173_v53 = vadd.f32 0.008332121, %v1172_v19  ;;  %v7137_v39 = vshrl.u32 %v1290_v41, 30  ;;  %vm2418_vm14 = vcmp.lt.s32.totalorder %v7115_v11, 2 }
 0x121   : > { %vm1378_vm13 = vcmp.lt.s32.totalorder %v7119_v10, 1  ;;  %vm1183_vm12 = vcmp.eq.s32.totalorder %v1181_v1, 0  ;;  %v7148_v42 = vor.u32 %v1364_v36, %v1363_v63  ;;  %vm1380_vm15 = vcmp.lt.s32.totalorder %v7119_v10, 3 }
 0x122   : > { %v1167_v23 = vmul.f32 %v1166_v28, %v1164_v13  ;;  %v1174_v38 = vmul.f32 %v1173_v53, %v1164_v13  ;;  %v1292_v34 = vshll.u32 %v7137_v39, 30  ;;  %v7151_v57 = vshll.u32 %v1354_v8, 8 }
 0x123   : > { %v1391_v0 = vsel %vm1381_vm11, %v1377_v40, 1326507024  ;;  %vm1182_vm0 = vcmp.lt.s32.totalorder %v1181_v1, 2  ;;  %vm1379_vm1 = vcmp.lt.s32.totalorder %v7119_v10, 2  ;;  %v1387_v25 = vsel %vm1381_vm11, %v1374_v4, 920167782 }
 0x124   : > { %v1168_v30 = vadd.f32 -0.4999988, %v1167_v23  ;;  %v1175_v3 = vadd.f32 -0.16666654, %v1174_v38  ;;  %v1293_v37 = vsub.s32 %v1289_v9, %v1292_v34  ;;  %v1390_v51 = vsel %vm1378_vm13, %v7140_v49, %v7142_v14 }
 0x125   : > { %vm1186_vm3 = vcmp.eq.s32.totalorder %v1181_v1, 2  ;;  %v1386_v22 = vsel %vm1378_vm13, %v7148_v42, %v7140_v49  ;;  %v1392_v20 = vsel %vm1380_vm15, %v1374_v4, %v1391_v0  ;;  %v1395_v5 = vand.u32 65535, %v7151_v57 }
 0x126   : > { %v1169_v12 = vmul.f32 %v1168_v30, %v1164_v13  ;;  %v1176_v60 = vmul.f32 %v1175_v3, %v1164_v13  ;;  %vm1294_vm2 = vcmp.lt.s32.totalorder %v1293_v37, 0  ;;  %v1295_v47 = vsub.s32 0, %v1293_v37 }
 0x127   : > { %v1393_v17 = vsel %vm1379_vm1, %v1390_v51, %v1392_v20  ;;  %v1388_v31 = vsel %vm1380_vm15, %v7142_v14, %v1387_v25  ;;  %v1396_v13 = vshrl.u32 %v7151_v57, 16  ;;  %vm1179_vm4 = vweird.f32 %v6789_v56 }
 0x128   : > { %v1170_v52 = vadd.f32 1.0, %v1169_v12  ;;  %v1177_v24 = vadd.f32 1.0, %v1176_v60  ;;  %v1296_v33 = vsel %vm1294_vm2, %v1295_v47, %v1293_v37  ;;  %v1398_v2 = vshrl.u32 %v1393_v17, 16 }
 0x129   : > { %v1297_v62 = vclz %v1296_v33  ;;  %v1397_v43 = vand.u32 65535, %v1393_v17  ;;  %v1285_v9 = vadd.s32 %v7100_v45, %v7098_v44  ;;  %v1389_v18 = vsel %vm1379_vm1, %v1386_v22, %v1388_v31 }
 0x12a   : > { %v1178_v15 = vmul.f32 %v1177_v24, %v1162_v16  ;;  %v1187_v26 = vxor.u32 2147483648, %v1170_v52  ;;  %v1400_v46 = vmul.u32 %v1398_v2, %v1395_v5  ;;  %v1419_v63 = vand.u32 65535, %v1389_v18 }
 0x12b   : > { %v5605_v16 = vadd.s32 4294967294, %v1297_v62  ;;  %v1401_v53 = vmul.u32 %v1397_v43, %v1396_v13  ;;  %v1399_v8 = vmul.u32 %v1397_v43, %v1395_v5  ;;  %v1420_v1 = vshrl.u32 %v1389_v18, 16 }
 0x12c   : > { %v1184_v54 = vxor.u32 2147483648, %v1178_v15  ;;  %v2424_v59 = vsel %vm2422_vm8, %v1187_v26, %v1178_v15  ;;  %v1188_v35 = vsel %vm1186_vm3, %v1187_v26, %v1178_v15  ;;  %v1403_v11 = vshll.u32 %v1400_v46, 16 }
 0x12d   : > { %vm5606_vm5 = vcmp.lt.s32.totalorder %v5605_v16, 0  ;;  %v1402_v38 = vmul.u32 %v1398_v2, %v1396_v13  ;;  %v1404_v40 = vshrl.u32 %v1400_v46, 16  ;;  %v1405_v4 = vshll.u32 %v1401_v53, 16 }
 0x12e   : > { %v2421_v6 = vsel %vm2419_vm9, %v1170_v52, %v1184_v54  ;;  %v1185_v19 = vsel %vm1183_vm12, %v1170_v52, %v1184_v54  ;;  %v1300_v28 = vsel %vm5606_vm5, 0, %v5605_v16  ;;  %vm1407_vm6 = vc.u32 %v1399_v8, %v1403_v11 }
 0x12f   : > { %v2425_v48 = vsel %vm2418_vm14, %v2421_v6, %v2424_v59  ;;  %v1189_v58 = vsel %vm1182_vm0, %v1185_v19, %v1188_v35  ;;  %v1301_v41 = vsub.s32 32, %v1300_v28  ;;  %v1302_v44 = vshll.u32 %v1293_v37, %v1300_v28 }
 0x130   : > { %v2426_v56 = vsel %vm1179_vm4, nan, %v2425_v48  ;;  %v1190_v50 = vsel %vm1179_vm4, nan, %v1189_v58  ;;  %v1305_v45 = vsub.s32 4294967266, %v1300_v28  ;;  %v1409_v34 = vadd.s32 %v1403_v11, %v1399_v8 }
 0x131   : > { %5639 = vmatmul.msk.f32.vlgmr.msra.gmra.mxu2 %vm2737_vm10, %v2426_v56  ;;  %5647 = vmatmul.msk.f32.gmra.mxu3 %vm2737_vm10, %v1190_v50  ;;  %v1303_v36 = vshrl.u32 %v1285_v9, %v1301_v41  ;;  %v1408_v12 = vsel %vm1407_vm6, 1, %v6140_v55  ;;  %v1421_v60 = vmul.u32 %v1419_v63, %v1395_v5  ;;  %v1422_v0 = vmul.u32 %v1420_v1, %v1395_v5 }
 0x132   : > { %v1306_v23 = vadd.s32 127, %v1305_v45  ;;  %v1423_v25 = vmul.u32 %v1419_v63, %v1396_v13  ;;  %v1410_v52 = vadd.s32 %v1408_v12, %v1402_v38  ;;  %vm1411_vm7 = vc.u32 %v1409_v34, %v1405_v4 }
 0x133   : > { %v1304_v30 = vor.u32 %v1303_v36, %v1302_v44  ;;  %vm1193_vm8 = vcmp.lt.s32.totalorder %v6891_v7, 0  ;;  %v1412_v24 = vsel %vm1411_vm7, 1, %v6140_v55  ;;  %v1424_v47 = vmul.u32 %v1420_v1, %v1396_v13 }
 0x134   : > { %v1307_v3 = vshll.u32 %v1306_v23, 23  ;;  %v1425_v22 = vshll.u32 %v1422_v0, 16  ;;  %v1362_v15 = vshrl.u32 %v6134_v32, %v7113_v27  ;;  %v1414_v26 = vadd.s32 %v1412_v24, %v1410_v52 }
 0x135   : > { %v1311_v51 = vcvt.s32.f32 %v1304_v30  ;;  %v1427_v33 = vshll.u32 %v1423_v25, 16  ;;  %v1315_v17 = vsub.s32 4, %v7137_v39  ;;  %v1383_v5 = vsel %vm1381_vm11, %v7142_v14, 2102212464 }
 0x136   : > { %v1308_v37 = vor.u32 4788187, %v1307_v3  ;;  %vm1429_vm9 = vc.u32 %v1421_v60, %v1425_v22  ;;  %v1431_v62 = vadd.s32 %v1425_v22, %v1421_v60  ;;  %v1406_v2 = vshrl.u32 %v1401_v53, 16 }
 0x137   : > { %v1415_v54 = vadd.s32 %v1414_v26, %v1404_v40  ;;  %v1430_v13 = vsel %vm1429_vm9, 1, %v6140_v55  ;;  %vm7202_vm14 = vcmp.le.f32.partialorder %v1191_v29, 0.7853982  ;;  %v1426_v32 = vshrl.u32 %v1422_v0, 16 }
 0x138   : > { %v1309_v20 = vand.u32 2147483647, %v1308_v37  ;;  %v1432_v27 = vadd.s32 %v1430_v13, %v1424_v47  ;;  %vm1433_vm12 = vc.u32 %v1431_v62, %v1427_v33  ;;  %v1382_v14 = vsel %vm1378_vm13, %v1362_v15, %v7148_v42 }
 0x139   : > { %v1384_v43 = vsel %vm1380_vm15, %v7140_v49, %v1383_v5  ;;  %v1434_v16 = vsel %vm1433_vm12, 1, %v6140_v55  ;;  %v1428_v6 = vshrl.u32 %v1423_v25, 16  ;;  %v1316_v9 = vsel %vm1193_vm8, %v1315_v17, %v7137_v39 }
 0x13a   : > { %v1312_v31 = vmul.f32 %v1311_v51, %v1309_v20  ;;  %v1436_v19 = vadd.s32 %v1434_v16, %v1432_v27  ;;  %v1416_v46 = vadd.s32 %v1415_v54, %v1406_v2  ;;  %v1435_v48 = vadd.s32 %v1431_v62, %v1427_v33 }
 0x13b   : > { %v1385_v49 = vsel %vm1379_vm1, %v1382_v14, %v1384_v43  ;;  %v1318_v18 = vsel %vm7202_vm14, 0, %v1316_v9  ;;  %vm1334_vm5 = vweird.f32 %v6891_v7  ;;  %v2875_v14 = vld [vmem:[%s9354_s2 + $0x1f8] sm:$0xff]  ;;  %v2874_v43 = vld [vmem:[%s9354_s2 + $0x1f0] sm:$0xff]  ;;  %v2872_v9 = vld [vmem:[%s9354_s2 + $0x1e0] sm:$0xff]  ;;  %vm1348_vm7 = vcmp.lt.s32.totalorder %v7061_v21, 0 }
 0x13c   : > { %v1313_v35 = vxor.u32 2147483648, %v1312_v31  ;;  %v1437_v58 = vadd.s32 %v1436_v19, %v1426_v32  ;;  %v1439_v53 = vmul.u32 %v7151_v57, %v1385_v49  ;;  %vm1441_vm11 = vc.u32 %v1416_v46, %v1435_v48  ;;  %2911 = vmatpush.msrb.mxu2 %v2875_v14  ;;  %2992 = vmatpush.msrb.mxu3 %v2875_v14  ;;  %v2873_v19 = vld [vmem:[%s9354_s2 + $0x1e8] sm:$0xff] }
 0x13d   : > { %v1335_v45 = vadd.s32 3, %v1318_v18  ;;  %v2571_v38 = vand.u32 3, %v1318_v18 }
 0x13e   : > { %v1314_v29 = vsel %vm1193_vm8, %v1313_v35, %v1312_v31  ;;  %v1438_v56 = vadd.s32 %v1437_v58, %v1428_v6  ;;  %v1440_v31 = vadd.s32 %v1435_v48, %v1416_v46  ;;  %2912 = vmatpush.msrb.mxu2 %v2874_v43  ;;  %2993 = vmatpush.msrb.mxu3 %v2874_v43  ;;  %vm1347_vm8 = vcmp.le.f32.partialorder %v1346_v61, 0.7853982  ;;  %v2870_v58 = vld [vmem:[%s9354_s2 + $0x1d0] sm:$0xff]  ;;  %v2868_v61 = vld [vmem:[%s9354_s2 + $0x1c0] sm:$0xff] }
 0x13f   : > { %v1317_v42 = vsel %vm7202_vm14, %v6891_v7, %v1314_v29  ;;  %v1336_v40 = vand.u32 3, %v1335_v45  ;;  %vm2576_vm13 = vcmp.eq.s32.totalorder %v2571_v38, 2  ;;  %vm2572_vm0 = vcmp.lt.s32.totalorder %v2571_v38, 2 }
 0x140   : > { %v1319_v55 = vmul.f32 %v1317_v42, %v1317_v42  ;;  %v1442_v39 = vadd.s32 1, %v1438_v56  ;;  %vm2573_vm1 = vcmp.eq.s32.totalorder %v2571_v38, 0  ;;  %2913 = vmatpush.msrb.mxu2 %v2873_v19  ;;  %2994 = vmatpush.msrb.mxu3 %v2873_v19 }
 0x141   : > { %vm1341_vm15 = vcmp.eq.s32.totalorder %v1336_v40, 2  ;;  %vm1337_vm2 = vcmp.lt.s32.totalorder %v1336_v40, 2  ;;  %vm1338_vm3 = vcmp.eq.s32.totalorder %v1336_v40, 0 }
 0x142   : > { %v1320_v50 = vmul.f32 -0.001358992, %v1319_v55  ;;  %v1327_v28 = vmul.f32 -0.00019511016, %v1319_v55  ;;  %v1443_v8 = vsel %vm1441_vm11, %v1442_v39, %v1438_v56  ;;  %2914 = vmatpush.msrb.mxu2 %v2872_v9  ;;  %2995 = vmatpush.msrb.mxu3 %v2872_v9 }
 0x143   : > { %v1444_v10 = vadd.s32 %v1443_v8, %v1439_v53 }
 0x144   : > { %v1321_v41 = vadd.f32 0.041655596, %v1320_v50  ;;  %v1328_v44 = vadd.f32 0.008332121, %v1327_v28  ;;  %v2869_v50 = vld [vmem:[%s9354_s2 + $0x1c8] sm:$0xff] }
 0x145   : > { %v1445_v23 = vadd.s32 536870912, %v1444_v10 }
 0x146   : > { %v1322_v11 = vmul.f32 %v1321_v41, %v1319_v55  ;;  %v1329_v63 = vmul.f32 %v1328_v44, %v1319_v55 }
 0x147   : > { %v7226_v3 = vshrl.u32 %v1445_v23, 30 }
 0x148   : > { %v1323_v1 = vadd.f32 -0.4999988, %v1322_v11  ;;  %v1330_v36 = vadd.f32 -0.16666654, %v1329_v63 }
 0x149   : > { %v1447_v12 = vshll.u32 %v7226_v3, 30  ;;  %v1470_v48 = vsub.s32 4, %v7226_v3 }
 0x14a   : > { %v1324_v4 = vmul.f32 %v1323_v1, %v1319_v55  ;;  %v1331_v30 = vmul.f32 %v1330_v36, %v1319_v55 }
 0x14b   : > { %v1448_v25 = vsub.s32 %v1444_v10, %v1447_v12  ;;  %v1471_v18 = vsel %vm1348_vm7, %v1470_v48, %v7226_v3 }
 0x14c   : > { %v1325_v34 = vadd.f32 1.0, %v1324_v4  ;;  %v1332_v57 = vadd.f32 1.0, %v1331_v30  ;;  %v1473_v53 = vsel %vm1347_vm8, 0, %v1471_v18 }
 0x14d   : > { %vm1449_vm4 = vcmp.lt.s32.totalorder %v1448_v25, 0  ;;  %v1450_v24 = vsub.s32 0, %v1448_v25  ;;  %v1490_v8 = vadd.s32 3, %v1473_v53  ;;  %v2725_v36 = vand.u32 3, %v1473_v53 }
 0x14e   : > { %v1333_v60 = vmul.f32 %v1332_v57, %v1317_v42  ;;  %v1342_v0 = vxor.u32 2147483648, %v1325_v34  ;;  %v2871_v42 = vld [vmem:[%s9354_s2 + $0x1d8] sm:$0xff]  ;;  %v2779_v57 = vpop.f32.mrf.mxu0 }
 0x14f   : > { %v1451_v26 = vsel %vm1449_vm4, %v1450_v24, %v1448_v25  ;;  %2915 = vmatpush.msrb.mxu2 %v2871_v42  ;;  %2996 = vmatpush.msrb.mxu3 %v2871_v42  ;;  %v1491_v23 = vand.u32 3, %v1490_v8  ;;  %vm2730_vm9 = vcmp.eq.s32.totalorder %v2725_v36, 2  ;;  %vm2726_vm12 = vcmp.lt.s32.totalorder %v2725_v36, 2 }
 0x150   : > { %v1339_v37 = vxor.u32 2147483648, %v1333_v60  ;;  %v2578_v51 = vsel %vm2576_vm13, %v1342_v0, %v1333_v60  ;;  %v1343_v52 = vsel %vm1341_vm15, %v1342_v0, %v1333_v60  ;;  %v1452_v5 = vclz %v1451_v26 }
 0x151   : > { %2916 = vmatpush.msrb.mxu2 %v2870_v58  ;;  %2997 = vmatpush.msrb.mxu3 %v2870_v58  ;;  %vm1496_vm14 = vcmp.eq.s32.totalorder %v1491_v23, 2  ;;  %vm2727_vm11 = vcmp.eq.s32.totalorder %v2725_v36, 0  ;;  %vm1493_vm13 = vcmp.eq.s32.totalorder %v1491_v23, 0  ;;  %vm1492_vm15 = vcmp.lt.s32.totalorder %v1491_v23, 2  ;;  %v3136_v36 = vld [vmem:[%s9354_s2 + $0x28] sm:$0xff]  ;;  %v3135_v23 = vld [vmem:[%s9354_s2 + $0x20] sm:$0xff] }
 0x152   : > { %v2575_v47 = vsel %vm2573_vm1, %v1325_v34, %v1339_v37  ;;  %v1340_v22 = vsel %vm1338_vm3, %v1325_v34, %v1339_v37  ;;  %v5608_v62 = vadd.s32 4294967294, %v1452_v5  ;;  %vm2878_vm1 = vcmask 523264  }
 0x153   : > { %v2579_v20 = vsel %vm2572_vm0, %v2575_v47, %v2578_v51  ;;  %v1344_v15 = vsel %vm1337_vm2, %v1340_v22, %v1343_v52  ;;  %2917 = vmatpush.msrb.mxu2 %v2869_v50  ;;  %2998 = vmatpush.msrb.mxu3 %v2869_v50  ;;  %vm1489_vm0 = vweird.f32 %v7061_v21 }
 0x154   : > { %v2580_v33 = vsel %vm1334_vm5, nan, %v2579_v20  ;;  %v1345_v17 = vsel %vm1334_vm5, nan, %v1344_v15  ;;  %vm5609_vm6 = vcmp.lt.s32.totalorder %v5608_v62, 0 }
 0x155   : > { %5640 = vmatmul.msk.f32.gmra.mxu2 %vm2737_vm10, %v2580_v33  ;;  %5648 = vmatmul.msk.f32.gmra.mxu3 %vm2737_vm10, %v1345_v17  ;;  %v1455_v2 = vsel %vm5609_vm6, 0, %v5608_v62 }
 0x156   : > { %v1456_v54 = vsub.s32 32, %v1455_v2  ;;  %v1457_v13 = vshll.u32 %v1448_v25, %v1455_v2  ;;  %v1460_v7 = vsub.s32 4294967266, %v1455_v2  ;;  %2918 = vmatpush.msrb.mxu2 %v2868_v61  ;;  %2999 = vmatpush.msrb.mxu3 %v2868_v61  ;;  %v2844_v25 = vpop.f32.mrf.mxu1  ;;  %v2782_v20 = vpop.f32.mrf.mxu0 }
 0x157   : > { %v7265_v15 = vadd.f32 %v2844_v25, %v2779_v57  ;;  %v3260_v57 = vld [vmem:[%s9354_s2 + $0xb8] sm:$0xff] }
 0x158   : > { %v1458_v59 = vshrl.u32 %v1440_v31, %v1456_v54  ;;  %v1461_v32 = vadd.s32 127, %v1460_v7  ;;  %3269 = vmatpush.msra.mxu2 %v3260_v57 }
 0x159   : > { %9413 = vst [vmem:[#allocation5_spill] sm:$0xff] %v7265_v15 }
 0x15a   : > { %v1459_v27 = vor.u32 %v1458_v59, %v1457_v13  ;;  %v1462_v35 = vshll.u32 %v1461_v32, 23 }
 0x15c   : > { %v1463_v16 = vor.u32 4788187, %v1462_v35  ;;  %v1466_v6 = vcvt.s32.f32 %v1459_v27 }
 0x15e   : > { %v1464_v29 = vand.u32 2147483647, %v1463_v16  ;;  %v2847_v26 = vpop.f32.mrf.mxu1 }
 0x15f   : > { %v7269_v33 = vadd.f32 %v2847_v26, %v2782_v20  ;;  %v3256_v20 = vld [vmem:[%s9354_s2 + $0x98] sm:$0xff]  ;;  %v3131_v26 = vld [vmem:[%s9354_s2] sm:$0xff] }
 0x160   : > { %v1467_v46 = vmul.f32 %v1466_v6, %v1464_v29 }
 0x161   : > { %9414 = vst [vmem:[#allocation6_spill] sm:$0xff] %v7269_v33 }
 0x162   : > { %v1468_v49 = vxor.u32 2147483648, %v1467_v46 }
 0x164   : > { %v1469_v55 = vsel %vm1348_vm7, %v1468_v49, %v1467_v46 }
 0x165   : > { %v1472_v56 = vsel %vm1347_vm8, %v7061_v21, %v1469_v55  ;;  %v2785_v21 = vpop.f32.mrf.mxu0 }
 0x166   : > { %v1474_v28 = vmul.f32 %v1472_v56, %v1472_v56  ;;  %v2850_v17 = vpop.f32.mrf.mxu1 }
 0x167   : > { %v7273_v5 = vadd.f32 %v2850_v17, %v2785_v21  ;;  %v3206_v21 = vld [vmem:[%s9354_s2 + $0x50] sm:$0xff] }
 0x168   : > { %v1475_v39 = vmul.f32 -0.001358992, %v1474_v28  ;;  %v1482_v41 = vmul.f32 -0.00019511016, %v1474_v28  ;;  %v3255_v17 = vld [vmem:[%s9354_s2 + $0x90] sm:$0xff] }
 0x169   : > { %9415 = vst [vmem:[#allocation7_spill] sm:$0xff] %v7273_v5 }
 0x16a   : > { %v1476_v44 = vadd.f32 0.041655596, %v1475_v39  ;;  %v1483_v45 = vadd.f32 0.008332121, %v1482_v41 }
 0x16c   : > { %v1477_v11 = vmul.f32 %v1476_v44, %v1474_v28  ;;  %v1484_v63 = vmul.f32 %v1483_v45, %v1474_v28 }
 0x16d   : > { %v2788_v62 = vpop.f32.mrf.mxu0 }
 0x16e   : > { %v1478_v10 = vadd.f32 -0.4999988, %v1477_v11  ;;  %v1485_v1 = vadd.f32 -0.16666654, %v1484_v63  ;;  %v2853_v31 = vpop.f32.mrf.mxu1 }
 0x16f   : > { %v7277_v2 = vadd.f32 %v2853_v31, %v2788_v62 }
 0x170   : > { %v1479_v38 = vmul.f32 %v1478_v10, %v1474_v28  ;;  %v1486_v40 = vmul.f32 %v1485_v1, %v1474_v28  ;;  %v3138_v10 = vld [vmem:[%s9354_s2 + $0x38] sm:$0xff]  ;;  %v3137_v1 = vld [vmem:[%s9354_s2 + $0x30] sm:$0xff] }
 0x171   : > { %9416 = vst [vmem:[#allocation8_spill] sm:$0xff] %v7277_v2  ;;  %3171 = vmatpush.msrb.mxu0 %v3138_v10 }
 0x172   : > { %v1480_v4 = vadd.f32 1.0, %v1479_v38  ;;  %v1487_v30 = vadd.f32 1.0, %v1486_v40  ;;  %v3134_v38 = vld [vmem:[%s9354_s2 + $0x18] sm:$0xff] }
 0x173   : > { %3172 = vmatpush.msrb.mxu0 %v3137_v1 }
 0x174   : > { %v1488_v3 = vmul.f32 %v1487_v30, %v1472_v56  ;;  %v1497_v34 = vxor.u32 2147483648, %v1480_v4 }
 0x175   : > { %3173 = vmatpush.msrb.mxu0 %v3136_v36 }
 0x176   : > { %v1494_v12 = vxor.u32 2147483648, %v1488_v3  ;;  %v2732_v60 = vsel %vm2730_vm9, %v1497_v34, %v1488_v3  ;;  %v1498_v0 = vsel %vm1496_vm14, %v1497_v34, %v1488_v3  ;;  %v3133_v3 = vld [vmem:[%s9354_s2 + $0x10] sm:$0xff]  ;;  %v3211_v34 = vld [vmem:[%s9354_s2 + $0x78] sm:$0xff] }
 0x177   : > { %3174 = vmatpush.msrb.mxu0 %v3135_v23  ;;  %3220 = vmatpush.msrb.mxu1 %v3211_v34 }
 0x178   : > { %v2729_v37 = vsel %vm2727_vm11, %v1480_v4, %v1494_v12  ;;  %v1495_v51 = vsel %vm1493_vm13, %v1480_v4, %v1494_v12  ;;  %v3210_v12 = vld [vmem:[%s9354_s2 + $0x70] sm:$0xff] }
 0x179   : > { %v2733_v52 = vsel %vm2726_vm12, %v2729_v37, %v2732_v60  ;;  %v1499_v24 = vsel %vm1492_vm15, %v1495_v51, %v1498_v0  ;;  %3175 = vmatpush.msrb.mxu0 %v3134_v38  ;;  %v3259_v60 = vld [vmem:[%s9354_s2 + $0xb0] sm:$0xff]  ;;  %3221 = vmatpush.msrb.mxu1 %v3210_v12  ;;  %v3209_v37 = vld [vmem:[%s9354_s2 + $0x68] sm:$0xff] }
 0x17a   : > { %v2734_v47 = vsel %vm1489_vm0, nan, %v2733_v52  ;;  %v1500_v22 = vsel %vm1489_vm0, nan, %v1499_v24  ;;  %3270 = vmatpush.msra.mxu2 %v3259_v60  ;;  %v3258_v51 = vld [vmem:[%s9354_s2 + $0xa8] sm:$0xff]  ;;  %v3208_v24 = vld [vmem:[%s9354_s2 + $0x60] sm:$0xff] }
 0x17b   : > { %5641 = vmatmul.msk.f32.gmra.mxu2 %vm2737_vm10, %v2734_v47  ;;  %5649 = vmatmul.msk.f32.gmra.mxu3 %vm2737_vm10, %v1500_v22  ;;  %v3132_v52 = vld [vmem:[%s9354_s2 + $0x8] sm:$0xff]  ;;  %v3257_v47 = vld [vmem:[%s9354_s2 + $0xa0] sm:$0xff]  ;;  %v3207_v22 = vld [vmem:[%s9354_s2 + $0x58] sm:$0xff] }
 0x17c   : > { %3176 = vmatpush.msrb.mxu0 %v3133_v3  ;;  %3222 = vmatpush.msrb.mxu1 %v3209_v37 }
 0x17d   : > { %3271 = vmatpush.msra.mxu2 %v3258_v51 }
 0x17e   : > { %3177 = vmatpush.msrb.mxu0 %v3132_v52  ;;  %3223 = vmatpush.msrb.mxu1 %v3208_v24 }
 0x17f   : > { %3272 = vmatpush.msra.mxu2 %v3257_v47 }
 0x180   : > { %3178 = vmatpush.msrb.mxu0 %v3131_v26  ;;  %3224 = vmatpush.msrb.mxu1 %v3207_v22 }
 0x181   : > { %3273 = vmatpush.msra.mxu2 %v3256_v20 }
 0x182   : > { %3225 = vmatpush.msrb.mxu1 %v3206_v21 }
 0x183   : > { %5650 = vmatmul.msk.f32.vlgmr.msrb.gmra.mxu2 %vm2878_vm1, %v7265_v15 }
 0x184   : > { %v2791_v54 = vpop.f32.mrf.mxu0  ;;  %3274 = vmatpush.msra.mxu2 %v3255_v17 }
 0x18a   : > { %v2856_v13 = vpop.f32.mrf.mxu3 }
 0x18b   : > { %5651 = vmatmul.msk.f32.gmra.mxu2 %vm2878_vm1, %v7269_v33  ;;  %v7281_v7 = vadd.f32 %v2856_v13, %v2791_v54 }
 0x18d   : > { %9417 = vst [vmem:[#allocation9_spill] sm:$0xff] %v7281_v7 }
 0x193   : > { %5652 = vmatmul.msk.f32.gmra.mxu2 %vm2878_vm1, %v7273_v5 }
 0x19b   : > { %5653 = vmatmul.msk.f32.gmra.mxu2 %vm2878_vm1, %v7277_v2 }
 0x1a3   : > { %5654 = vmatmul.msk.f32.gmra.mxu2 %vm2878_vm1, %v7281_v7 }
 0x1b4   : > { %v2794_v59 = vpop.f32.mrf.mxu2  ;;  %v2859_v32 = vpop.f32.mrf.mxu3 }
 0x1b5   : > { %v7285_v27 = vadd.f32 %v2859_v32, %v2794_v59  ;;  %v3205_v59 = vld [vmem:[%s9354_s2 + $0x48] sm:$0xff] }
 0x1b6   : > { %v3254_v32 = vld [vmem:[%s9354_s2 + $0x88] sm:$0xff]  ;;  %3226 = vmatpush.msrb.mxu1 %v3205_v59 }
 0x1b7   : > { %9418 = vst [vmem:[#allocation10_spill] sm:$0xff] %v7285_v27  ;;  %5655 = vmatmul.msk.f32.gmra.mxu2 %vm2878_vm1, %v7285_v27 }
 0x1b8   : > { %3275 = vmatpush.msra.mxu2 %v3254_v32 }
 0x1d8   : > { %v2797_v35 = vpop.f32.mrf.mxu2  ;;  %v2862_v14 = vpop.f32.mrf.mxu3 }
 0x1d9   : > { %v7289_v43 = vadd.f32 %v2862_v14, %v2797_v35  ;;  %v3204_v35 = vld [vmem:[%s9354_s2 + $0x40] sm:$0xff] }
 0x1da   : > { %v3253_v14 = vld [vmem:[%s9354_s2 + $0x80] sm:$0xff]  ;;  %3227 = vmatpush.msrb.mxu1 %v3204_v35 }
 0x1db   : > { %9419 = vst [vmem:[#allocation11_spill] sm:$0xff] %v7289_v43  ;;  %5656 = vmatmul.msk.f32.gmra.mxu2 %vm2878_vm1, %v7289_v43 }
 0x1dc   : > { %3276 = vmatpush.msra.mxu2 %v3253_v14 }
 0x1fe   : > { %v2800_v16 = vpop.f32.mrf.mxu2  ;;  %v2865_v6 = vpop.f32.mrf.mxu3 }
 0x1ff   : > { %v7293_v19 = vadd.f32 %v2865_v6, %v2800_v16 }
 0x201   : > { %9420 = vst [vmem:[#allocation12_spill] sm:$0xff] %v7293_v19  ;;  %5657 = vmatmul.msk.f32.gmra.mxu2 %vm2878_vm1, %v7293_v19 }
 0x206   : > { %v2920_v29 = vpop.f32.mrf.mxu2 }
 0x207   : > { %v7298_v9 = vsub.f32 %v7265_v15, %v2920_v29  ;;  %v8285_v15 = vld [vmem:[%s9354_s2 + $0x2c0] sm:$0xff] }
 0x209   : > { %v2952_v46 = vmul.f32 %v7298_v9, %v7298_v9 }
 0x20b   : > { %5658 = vmatmul.msk.f32.vlgmr.msrb.gmra.mxu3 %vm2878_vm1, %v2952_v46 }
 0x20e   : > { %v2923_v48 = vpop.f32.mrf.mxu2 }
 0x20f   : > { %v7304_v42 = vsub.f32 %v7269_v33, %v2923_v48  ;;  %v8277_v33 = vld [vmem:[%s9354_s2 + $0x3c0] sm:$0xff] }
 0x211   : > { %v2953_v49 = vmul.f32 %v7304_v42, %v7304_v42 }
 0x213   : > { %5659 = vmatmul.msk.f32.gmra.mxu3 %vm2878_vm1, %v2953_v49 }
 0x216   : > { %v2926_v58 = vpop.f32.mrf.mxu2 }
 0x217   : > { %v7310_v55 = vsub.f32 %v7273_v5, %v2926_v58  ;;  %v8272_v5 = vld [vmem:[%s9354_s2 + $0x348] sm:$0xff] }
 0x219   : > { %v2954_v18 = vmul.f32 %v7310_v55, %v7310_v55 }
 0x21b   : > { %5660 = vmatmul.msk.f32.gmra.mxu3 %vm2878_vm1, %v2954_v18 }
 0x21e   : > { %v2929_v56 = vpop.f32.mrf.mxu2 }
 0x21f   : > { %v7316_v50 = vsub.f32 %v7277_v2, %v2929_v56  ;;  %v7420_v56 = vld [vmem:[%s9356_s4] ss:$0 sm:$0xff]  ;;  %v8267_v2 = vld [vmem:[%s9354_s2 + $0x238] sm:$0xff] }
 0x221   : > { %v2955_v28 = vmul.f32 %v7316_v50, %v7316_v50 }
 0x223   : > { %5661 = vmatmul.msk.f32.gmra.mxu3 %vm2878_vm1, %v2955_v28 }
 0x226   : > { %v2932_v61 = vpop.f32.mrf.mxu2 }
 0x227   : > { %v7322_v53 = vsub.f32 %v7281_v7, %v2932_v61  ;;  %v8259_v7 = vld [vmem:[%s9354_s2 + $0x2c8] sm:$0xff] }
 0x229   : > { %v2956_v39 = vmul.f32 %v7322_v53, %v7322_v53 }
 0x22b   : > { %5662 = vmatmul.msk.f32.gmra.mxu3 %vm2878_vm1, %v2956_v39 }
 0x23a   : > { %v2935_v41 = vpop.f32.mrf.mxu2 }
 0x23b   : > { %v7328_v44 = vsub.f32 %v7285_v27, %v2935_v41  ;;  %v7426_v41 = vld [vmem:[%s9356_s4 + $0x1] ss:$0 sm:$0xff]  ;;  %v8254_v27 = vld [vmem:[%s9354_s2 + $0x3c8] sm:$0xff] }
 0x23d   : > { %v2957_v45 = vmul.f32 %v7328_v44, %v7328_v44 }
 0x23f   : > { %5663 = vmatmul.msk.f32.gmra.mxu3 %vm2878_vm1, %v2957_v45 }
 0x25e   : > { %v2938_v8 = vpop.f32.mrf.mxu2 }
 0x25f   : > { %v7334_v11 = vsub.f32 %v7289_v43, %v2938_v8  ;;  %v8219_v43 = vld [vmem:[%s9354_s2 + $0x248] sm:$0xff] }
 0x261   : > { %v2958_v63 = vmul.f32 %v7334_v11, %v7334_v11 }
 0x263   : > { %5664 = vmatmul.msk.f32.gmra.mxu3 %vm2878_vm1, %v2958_v63 }
 0x284   : > { %v2941_v40 = vpop.f32.mrf.mxu2 }
 0x285   : > { %v7355_v4 = vsub.f32 %v7293_v19, %v2941_v40 }
 0x287   : > { %v2959_v30 = vmul.f32 %v7355_v4, %v7355_v4 }
 0x289   : > { %5665 = vmatmul.msk.f32.gmra.mxu3 %vm2878_vm1, %v2959_v30 }
 0x28e   : > { %v3001_v0 = vpop.f32.mrf.mxu3 }
 0x28f   : > { %v3002_v25 = vadd.f32 1e-05, %v3001_v0 }
 0x291   : > { %5917 = vrsqrt.f32 %v3002_v25  ;;  %vm3031_vm2 = vweird.f32 %v3002_v25 }
 0x296   : > { %v3004_v62 = vpop.f32.mrf.mxu3 }
 0x297   : > { %v5918_v31 = vpop.eup %5917  ;;  %v3005_v54 = vadd.f32 1e-05, %v3004_v62 }
 0x298   : > { %v3026_v13 = vmul.f32 %v5918_v31, %v3002_v25  ;;  %vm3032_vm10 = vweird.f32 %v5918_v31 }
 0x299   : > { %5919 = vrsqrt.f32 %v3005_v54  ;;  %vm3033_vm3 = vmor %vm3031_vm2, %vm3032_vm10  ;;  %vm3041_vm5 = vweird.f32 %v3005_v54 }
 0x29a   : > { %v3027_v16 = vmul.f32 %v5918_v31, %v3026_v13 }
 0x29c   : > { %v3028_v6 = vmul.f32 0.5, %v3027_v16 }
 0x29e   : > { %v3029_v29 = vsub.f32 1.5, %v3028_v6  ;;  %v3007_v46 = vpop.f32.mrf.mxu3 }
 0x29f   : > { %v5920_v48 = vpop.eup %5919  ;;  %v3008_v49 = vadd.f32 1e-05, %v3007_v46 }
 0x2a0   : > { %v3030_v58 = vmul.f32 %v5918_v31, %v3029_v29  ;;  %v3036_v18 = vmul.f32 %v5920_v48, %v3005_v54  ;;  %vm3042_vm4 = vweird.f32 %v5920_v48 }
 0x2a1   : > { %5921 = vrsqrt.f32 %v3008_v49  ;;  %vm3043_vm6 = vmor %vm3041_vm5, %vm3042_vm4  ;;  %vm3051_vm8 = vweird.f32 %v3008_v49 }
 0x2a2   : > { %v3034_v28 = vsel %vm3033_vm3, %v5918_v31, %v3030_v58  ;;  %v3037_v61 = vmul.f32 %v5920_v48, %v3036_v18 }
 0x2a3   : > { %v3105_v39 = vmul.f32 %v3034_v28, %v7298_v9 }
 0x2a4   : > { %v3038_v45 = vmul.f32 0.5, %v3037_v61 }
 0x2a5   : > { %v3114_v8 = vmul.f32 %v7420_v56, %v3105_v39 }
 0x2a6   : > { %v3039_v63 = vsub.f32 1.5, %v3038_v45  ;;  %v3010_v60 = vpop.f32.mrf.mxu3 }
 0x2a7   : > { %v5922_v10 = vpop.eup %5921  ;;  %v3123_v1 = vadd.f32 %v7426_v41, %v3114_v8  ;;  %v3011_v25 = vadd.f32 1e-05, %v3010_v60  ;;  %v3330_v60 = vld [vmem:[%s9355_s3 + $0xe0] sm:$0xff] }
 0x2a8   : > { %v3040_v36 = vmul.f32 %v5920_v48, %v3039_v63  ;;  %v3046_v23 = vmul.f32 %v5922_v10, %v3008_v49  ;;  %vm3052_vm7 = vweird.f32 %v5922_v10  ;;  %3462 = vmatpush.msra.mxu3 %v3330_v60 }
 0x2a9   : > { %5666 = vmatmul.msk.f32.vlgmr.msrb.gmra.mxu0 %vm2878_vm1, %v3123_v1  ;;  %5674 = vmatmul.msk.f32.vlgmr.msrb.gmra.mxu1 %vm2878_vm1, %v3123_v1  ;;  %vm3053_vm9 = vmor %vm3051_vm8, %vm3052_vm7  ;;  %5923 = vrsqrt.f32 %v3011_v25  ;;  %vm3061_vm12 = vweird.f32 %v3011_v25 }
 0x2aa   : > { %v3047_v9 = vmul.f32 %v5922_v10, %v3046_v23  ;;  %5682 = vmatmul.msk.f32.vlgmr.msra.gmra.mxu2 %vm2878_vm1, %v3123_v1  ;;  %v3044_v38 = vsel %vm3043_vm6, %v5920_v48, %v3040_v36 }
 0x2ab   : > { %v3106_v40 = vmul.f32 %v3044_v38, %v7304_v42 }
 0x2ac   : > { %v3048_v30 = vmul.f32 0.5, %v3047_v9 }
 0x2ad   : > { %v3115_v3 = vmul.f32 %v7420_v56, %v3106_v40 }
 0x2ae   : > { %v3049_v34 = vsub.f32 1.5, %v3048_v30  ;;  %v3013_v47 = vpop.f32.mrf.mxu3 }
 0x2af   : > { %v3124_v57 = vadd.f32 %v7426_v41, %v3115_v3  ;;  %v5924_v52 = vpop.eup %5923  ;;  %v3014_v20 = vadd.f32 1e-05, %v3013_v47  ;;  %v3325_v47 = vld [vmem:[%s9355_s3 + $0xb8] sm:$0xff] }
 0x2b0   : > { %v3050_v12 = vmul.f32 %v5922_v10, %v3049_v34  ;;  %v3056_v24 = vmul.f32 %v5924_v52, %v3011_v25  ;;  %vm3062_vm14 = vweird.f32 %v5924_v52  ;;  %v3326_v25 = vld [vmem:[%s9355_s3 + $0xc0] sm:$0xff] }
 0x2b1   : > { %5667 = vmatmul.msk.f32.gmra.mxu0 %vm2878_vm1, %v3124_v57  ;;  %5675 = vmatmul.msk.f32.gmra.mxu1 %vm2878_vm1, %v3124_v57  ;;  %5925 = vrsqrt.f32 %v3014_v20  ;;  %vm3063_vm11 = vmor %vm3061_vm12, %vm3062_vm14  ;;  %vm3071_vm15 = vweird.f32 %v3014_v20 }
 0x2b2   : > { %5683 = vmatmul.msk.f32.gmra.mxu2 %vm2878_vm1, %v3124_v57  ;;  %v3054_v0 = vsel %vm3053_vm9, %v5922_v10, %v3050_v12  ;;  %v3057_v22 = vmul.f32 %v5924_v52, %v3056_v24  ;;  %v3328_v24 = vld [vmem:[%s9355_s3 + $0xd0] sm:$0xff]  ;;  %3463 = vmatpush.msra.mxu3 %v3326_v25 }
 0x2b3   : > { %v3107_v42 = vmul.f32 %v3054_v0, %v7310_v55  ;;  %v3333_v0 = vld [vmem:[%s9355_s3 + $0xf8] sm:$0xff]  ;;  %v7659_v25 = vld [vmem:[%s9355_s3 + $0x1b0] sm:$0xff] }
 0x2b4   : > { %v3058_v26 = vmul.f32 0.5, %v3057_v22  ;;  %3585 = vmatpush.msrb.mxu2 %v3333_v0  ;;  %v3323_v22 = vld [vmem:[%s9355_s3 + $0xa8] sm:$0xff] }
 0x2b5   : > { %v3116_v37 = vmul.f32 %v7420_v56, %v3107_v42  ;;  %v3332_v42 = vld [vmem:[%s9355_s3 + $0xf0] sm:$0xff] }
 0x2b6   : > { %v3059_v21 = vsub.f32 1.5, %v3058_v26  ;;  %3544 = vmatpush.msra.mxu1 %v3332_v42  ;;  %v3318_v26 = vld [vmem:[%s9355_s3 + $0x80] sm:$0xff]  ;;  %v7664_v42 = vld [vmem:[%s9355_s3 + $0x198] sm:$0xff] }
 0x2b7   : > { %v3125_v51 = vadd.f32 %v7426_v41, %v3116_v37  ;;  %v5926_v31 = vpop.eup %5925  ;;  %v3329_v37 = vld [vmem:[%s9355_s3 + $0xd8] sm:$0xff] }
 0x2b8   : > { %v3060_v62 = vmul.f32 %v5924_v52, %v3059_v21  ;;  %v3066_v54 = vmul.f32 %v5926_v31, %v3014_v20  ;;  %vm3072_vm13 = vweird.f32 %v5926_v31  ;;  %3586 = vmatpush.msrb.mxu2 %v3329_v37  ;;  %3545 = vmatpush.msra.mxu1 %v3328_v24  ;;  %v3324_v21 = vld [vmem:[%s9355_s3 + $0xb0] sm:$0xff]  ;;  %v7674_v37 = vld [vmem:[%s9355_s3 + $0x188] sm:$0xff]  ;;  %v7691_v24 = vld [vmem:[%s9355_s3 + $0x178] sm:$0xff] }
 0x2b9   : > { %5668 = vmatmul.msk.f32.gmra.mxu0 %vm2878_vm1, %v3125_v51  ;;  %5676 = vmatmul.msk.f32.gmra.mxu1 %vm2878_vm1, %v3125_v51  ;;  %vm3073_vm0 = vmor %vm3071_vm15, %vm3072_vm13 }
 0x2ba   : > { %5684 = vmatmul.msk.f32.gmra.mxu2 %vm2878_vm1, %v3125_v51  ;;  %v3064_v13 = vsel %vm3063_vm11, %v5924_v52, %v3060_v62  ;;  %v3067_v35 = vmul.f32 %v5926_v31, %v3066_v54  ;;  %v3327_v51 = vld [vmem:[%s9355_s3 + $0xc8] sm:$0xff]  ;;  %v3322_v52 = vld [vmem:[%s9355_s3 + $0xa0] sm:$0xff]  ;;  %3546 = vmatpush.msra.mxu1 %v3324_v21 }
 0x2bb   : > { %v3108_v59 = vmul.f32 %v3064_v13, %v7316_v50  ;;  %3464 = vmatpush.msra.mxu3 %v3322_v52  ;;  %3587 = vmatpush.msrb.mxu2 %v3325_v47  ;;  %v3319_v62 = vld [vmem:[%s9355_s3 + $0x88] sm:$0xff]  ;;  %v3314_v54 = vld [vmem:[%s9355_s3 + $0x60] sm:$0xff]  ;;  %v3317_v13 = vld [vmem:[%s9355_s3 + $0x78] sm:$0xff] }
 0x2bc   : > { %v3068_v6 = vmul.f32 0.5, %v3067_v35  ;;  %v3310_v35 = vld [vmem:[%s9355_s3 + $0x40] sm:$0xff]  ;;  %v7686_v52 = vld [vmem:[%s9355_s3 + $0x190] sm:$0xff]  ;;  %v7699_v47 = vld [vmem:[%s9355_s3 + $0x168] sm:$0xff] }
 0x2bd   : > { %v3117_v32 = vmul.f32 %v7420_v56, %v3108_v59  ;;  %3465 = vmatpush.msra.mxu3 %v3318_v26  ;;  %v3315_v59 = vld [vmem:[%s9355_s3 + $0x68] sm:$0xff]  ;;  %v7715_v26 = vld [vmem:[%s9355_s3 + $0x158] sm:$0xff] }
 0x2be   : > { %v3069_v46 = vsub.f32 1.5, %v3068_v6  ;;  %v3312_v6 = vld [vmem:[%s9355_s3 + $0x50] sm:$0xff] }
 0x2bf   : > { %v3126_v16 = vadd.f32 %v7426_v41, %v3117_v32  ;;  %v3316_v32 = vld [vmem:[%s9355_s3 + $0x70] sm:$0xff]  ;;  %3466 = vmatpush.msra.mxu3 %v3314_v54  ;;  %v3339_v54 = vld [vmem:[%s9355_s3 + $0x128] sm:$0xff] }
 0x2c0   : > { %v3070_v18 = vmul.f32 %v5926_v31, %v3069_v46  ;;  %v3309_v46 = vld [vmem:[%s9355_s3 + $0x38] sm:$0xff] }
 0x2c1   : > { %5669 = vmatmul.msk.f32.gmra.mxu0 %vm2878_vm1, %v3126_v16  ;;  %5677 = vmatmul.msk.f32.gmra.mxu1 %vm2878_vm1, %v3126_v16 }
 0x2c2   : > { %v3016_v55 = vpop.f32.mrf.mxu3  ;;  %5685 = vmatmul.msk.f32.gmra.mxu2 %vm2878_vm1, %v3126_v16  ;;  %v3074_v61 = vsel %vm3073_vm0, %v5926_v31, %v3070_v18  ;;  %v3320_v31 = vld [vmem:[%s9355_s3 + $0x90] sm:$0xff]  ;;  %v3311_v16 = vld [vmem:[%s9355_s3 + $0x48] sm:$0xff]  ;;  %3467 = vmatpush.msra.mxu3 %v3310_v35  ;;  %v3305_v18 = vld [vmem:[%s9355_s3 + $0x18] sm:$0xff] }
 0x2c3   : > { %v3017_v17 = vadd.f32 1e-05, %v3016_v55  ;;  %v3109_v39 = vmul.f32 %v3074_v61, %v7322_v53  ;;  %v3321_v55 = vld [vmem:[%s9355_s3 + $0x98] sm:$0xff]  ;;  %3547 = vmatpush.msra.mxu1 %v3320_v31  ;;  %v3304_v61 = vld [vmem:[%s9355_s3 + $0x10] sm:$0xff]  ;;  %v3334_v35 = vld [vmem:[%s9355_s3 + $0x100] sm:$0xff] }
 0x2c4   : > { %3588 = vmatpush.msrb.mxu2 %v3321_v55  ;;  %v3343_v55 = vld [vmem:[%s9355_s3 + $0x148] sm:$0xff]  ;;  %v3341_v31 = vld [vmem:[%s9355_s3 + $0x138] sm:$0xff] }
 0x2c5   : > { %5927 = vrsqrt.f32 %v3017_v17  ;;  %v3118_v8 = vmul.f32 %v7420_v56, %v3109_v39  ;;  %vm3081_vm2 = vweird.f32 %v3017_v17  ;;  %3548 = vmatpush.msra.mxu1 %v3316_v32 }
 0x2c6   : > { %3589 = vmatpush.msrb.mxu2 %v3317_v13 }
 0x2c7   : > { %v3127_v1 = vadd.f32 %v7426_v41, %v3118_v8  ;;  %3549 = vmatpush.msra.mxu1 %v3312_v6  ;;  %v7577_v8 = vld [vmem:[%s9355_s3 + $0x1f8] sm:$0xff]  ;;  %v3335_v6 = vld [vmem:[%s9355_s3 + $0x108] sm:$0xff] }
 0x2c9   : > { %5670 = vmatmul.msk.f32.gmra.mxu0 %vm2878_vm1, %v3127_v1  ;;  %5678 = vmatmul.msk.f32.gmra.mxu1 %vm2878_vm1, %v3127_v1 }
 0x2ca   : > { %5686 = vmatmul.msk.f32.gmra.mxu2 %vm2878_vm1, %v3127_v1  ;;  %v7587_v1 = vld [vmem:[%s9355_s3 + $0x1c0] sm:$0xff] }
 0x2cb   : > { %v5928_v14 = vpop.eup %5927 }
 0x2cc   : > { %v3076_v29 = vmul.f32 %v5928_v14, %v3017_v17  ;;  %vm3082_vm10 = vweird.f32 %v5928_v14 }
 0x2cd   : > { %vm3083_vm3 = vmor %vm3081_vm2, %vm3082_vm10 }
 0x2ce   : > { %v3077_v48 = vmul.f32 %v5928_v14, %v3076_v29  ;;  %v3306_v29 = vld [vmem:[%s9355_s3 + $0x20] sm:$0xff] }
 0x2cf   : > { %3468 = vmatpush.msra.mxu3 %v3306_v29  ;;  %v3336_v29 = vld [vmem:[%s9355_s3 + $0x110] sm:$0xff] }
 0x2d0   : > { %v3078_v50 = vmul.f32 0.5, %v3077_v48  ;;  %v3307_v48 = vld [vmem:[%s9355_s3 + $0x28] sm:$0xff] }
 0x2d2   : > { %v3079_v28 = vsub.f32 1.5, %v3078_v50 }
 0x2d4   : > { %v3080_v63 = vmul.f32 %v5928_v14, %v3079_v28  ;;  %v3303_v28 = vld [vmem:[%s9355_s3 + $0x8] sm:$0xff] }
 0x2d6   : > { %v3084_v9 = vsel %vm3083_vm3, %v5928_v14, %v3080_v63  ;;  %v3313_v14 = vld [vmem:[%s9355_s3 + $0x58] sm:$0xff]  ;;  %v7582_v63 = vld [vmem:[%s9355_s3 + $0x1e8] sm:$0xff] }
 0x2d7   : > { %v3110_v53 = vmul.f32 %v3084_v9, %v7328_v44  ;;  %3590 = vmatpush.msrb.mxu2 %v3313_v14  ;;  %v7604_v9 = vld [vmem:[%s9355_s3 + $0x1c8] sm:$0xff]  ;;  %v3340_v14 = vld [vmem:[%s9355_s3 + $0x130] sm:$0xff] }
 0x2d9   : > { %v3119_v40 = vmul.f32 %v7420_v56, %v3110_v53  ;;  %3591 = vmatpush.msrb.mxu2 %v3309_v46 }
 0x2db   : > { %v3128_v3 = vadd.f32 %v7426_v41, %v3119_v40  ;;  %3592 = vmatpush.msrb.mxu2 %v3305_v18 }
 0x2dd   : > { %5671 = vmatmul.msk.f32.gmra.mxu0 %vm2878_vm1, %v3128_v3  ;;  %5679 = vmatmul.msk.f32.gmra.mxu1 %vm2878_vm1, %v3128_v3 }
 0x2de   : > { %5687 = vmatmul.msk.f32.gmra.mxu2 %vm2878_vm1, %v3128_v3  ;;  %v7615_v3 = vld [vmem:[%s9355_s3 + $0x1a0] sm:$0xff] }
 0x2df   : > { %3773 = vmatpush.msra.mxu2 %v7577_v8 }
 0x2e6   : > { %v3019_v49 = vpop.f32.mrf.mxu3 }
 0x2e7   : > { %v3020_v58 = vadd.f32 1e-05, %v3019_v49  ;;  %v3308_v49 = vld [vmem:[%s9355_s3 + $0x30] sm:$0xff] }
 0x2e8   : > { %3550 = vmatpush.msra.mxu1 %v3308_v49 }
 0x2e9   : > { %5929 = vrsqrt.f32 %v3020_v58  ;;  %vm3091_vm5 = vweird.f32 %v3020_v58 }
 0x2ea   : > { %3551 = vmatpush.msra.mxu1 %v3304_v61 }
 0x2ef   : > { %v5930_v45 = vpop.eup %5929 }
 0x2f0   : > { %v3086_v10 = vmul.f32 %v5930_v45, %v3020_v58  ;;  %vm3092_vm4 = vweird.f32 %v5930_v45  ;;  %v3302_v58 = vld [vmem:[%s9355_s3] sm:$0xff] }
 0x2f1   : > { %vm3093_vm6 = vmor %vm3091_vm5, %vm3092_vm4  ;;  %3469 = vmatpush.msra.mxu3 %v3302_v58 }
 0x2f2   : > { %v3087_v36 = vmul.f32 %v5930_v45, %v3086_v10 }
 0x2f4   : > { %v3088_v23 = vmul.f32 0.5, %v3087_v36  ;;  %v7592_v36 = vld [vmem:[%s9355_s3 + $0x1f0] sm:$0xff] }
 0x2f5   : > { %3732 = vmatpush.msrb.mxu1 %v7592_v36 }
 0x2f6   : > { %v3089_v38 = vsub.f32 1.5, %v3088_v23  ;;  %v7597_v23 = vld [vmem:[%s9355_s3 + $0x1d8] sm:$0xff] }
 0x2f7   : > { %3774 = vmatpush.msra.mxu2 %v7597_v23 }
 0x2f8   : > { %v3090_v30 = vmul.f32 %v5930_v45, %v3089_v38 }
 0x2fa   : > { %v3094_v34 = vsel %vm3093_vm6, %v5930_v45, %v3090_v30  ;;  %v7572_v45 = vld [vmem:[%s9355_s3 + $0x1e0] sm:$0xff] }
 0x2fb   : > { %v3111_v57 = vmul.f32 %v3094_v34, %v7334_v11  ;;  %v3331_v11 = vld [vmem:[%s9355_s3 + $0xe8] sm:$0xff]  ;;  %3650 = vmatpush.msrb.mxu3 %v7572_v45  ;;  %v7620_v34 = vld [vmem:[%s9355_s3 + $0x1d0] sm:$0xff] }
 0x2fc   : > { %3503 = vmatpush.msra.mxu0 %v3331_v11  ;;  %3733 = vmatpush.msrb.mxu1 %v7620_v34 }
 0x2fd   : > { %v3120_v44 = vmul.f32 %v7420_v56, %v3111_v57  ;;  %3651 = vmatpush.msrb.mxu3 %v7587_v1  ;;  %v7625_v57 = vld [vmem:[%s9355_s3 + $0x1b8] sm:$0xff] }
 0x2fe   : > { %3504 = vmatpush.msra.mxu0 %v3327_v51  ;;  %3775 = vmatpush.msra.mxu2 %v7625_v57  ;;  %v7681_v51 = vld [vmem:[%s9355_s3 + $0x160] sm:$0xff] }
 0x2ff   : > { %v3129_v12 = vadd.f32 %v7426_v41, %v3120_v44  ;;  %3652 = vmatpush.msrb.mxu3 %v7615_v3  ;;  %3734 = vmatpush.msrb.mxu1 %v7659_v25 }
 0x300   : > { %3505 = vmatpush.msra.mxu0 %v3323_v22  ;;  %3776 = vmatpush.msra.mxu2 %v7664_v42  ;;  %v7705_v22 = vld [vmem:[%s9355_s3 + $0x140] sm:$0xff] }
 0x301   : > { %5672 = vmatmul.msk.f32.gmra.mxu0 %vm2878_vm1, %v3129_v12  ;;  %5680 = vmatmul.msk.f32.gmra.mxu1 %vm2878_vm1, %v3129_v12 }
 0x302   : > { %5688 = vmatmul.msk.f32.gmra.mxu2 %vm2878_vm1, %v3129_v12  ;;  %3506 = vmatpush.msra.mxu0 %v3319_v62  ;;  %v7633_v12 = vld [vmem:[%s9355_s3 + $0x1a8] sm:$0xff]  ;;  %v3344_v62 = vld [vmem:[%s9355_s3 + $0x150] sm:$0xff] }
 0x303   : > { %3735 = vmatpush.msrb.mxu1 %v7686_v52  ;;  %3777 = vmatpush.msra.mxu2 %v7691_v24 }
 0x304   : > { %3507 = vmatpush.msra.mxu0 %v3315_v59 }
 0x305   : > { %3778 = vmatpush.msra.mxu2 %v7715_v26 }
 0x306   : > { %3508 = vmatpush.msra.mxu0 %v3311_v16  ;;  %v3337_v16 = vld [vmem:[%s9355_s3 + $0x118] sm:$0xff] }
 0x307   : > { %3779 = vmatpush.msra.mxu2 %v3341_v31 }
 0x308   : > { %3509 = vmatpush.msra.mxu0 %v3307_v48 }
 0x309   : > { %3780 = vmatpush.msra.mxu2 %v3337_v16 }
 0x30a   : > { %3510 = vmatpush.msra.mxu0 %v3303_v28 }
 0x30c   : > { %v3022_v20 = vpop.f32.mrf.mxu3  ;;  %3691 = vmatpush.msrb.mxu0 %v7582_v63 }
 0x30d   : > { %v7511_v17 = vadd.f32 1e-05, %v3022_v20  ;;  %v7710_v20 = vld [vmem:[%s9355_s3 + $0x170] sm:$0xff] }
 0x30e   : > { %3692 = vmatpush.msrb.mxu0 %v7604_v9  ;;  %3736 = vmatpush.msrb.mxu1 %v7710_v20 }
 0x30f   : > { %5931 = vrsqrt.f32 %v7511_v17  ;;  %vm3101_vm8 = vweird.f32 %v7511_v17 }
 0x310   : > { %3693 = vmatpush.msrb.mxu0 %v7633_v12  ;;  %3737 = vmatpush.msrb.mxu1 %v3344_v62 }
 0x312   : > { %3694 = vmatpush.msrb.mxu0 %v7674_v37  ;;  %3738 = vmatpush.msrb.mxu1 %v3340_v14 }
 0x314   : > { %3695 = vmatpush.msrb.mxu0 %v7699_v47  ;;  %3739 = vmatpush.msrb.mxu1 %v3336_v29 }
 0x315   : > { %v5932_v50 = vpop.eup %5931 }
 0x316   : > { %v3096_v39 = vmul.f32 %v5932_v50, %v7511_v17  ;;  %vm3102_vm7 = vweird.f32 %v5932_v50  ;;  %3696 = vmatpush.msrb.mxu0 %v3343_v55  ;;  %v3338_v17 = vld [vmem:[%s9355_s3 + $0x120] sm:$0xff] }
 0x317   : > { %vm3103_vm9 = vmor %vm3101_vm8, %vm3102_vm7 }
 0x318   : > { %v3097_v10 = vmul.f32 %v5932_v50, %v3096_v39  ;;  %3697 = vmatpush.msrb.mxu0 %v3339_v54 }
 0x31a   : > { %v3098_v53 = vmul.f32 0.5, %v3097_v10  ;;  %3698 = vmatpush.msrb.mxu0 %v3335_v6 }
 0x31c   : > { %v3099_v38 = vsub.f32 1.5, %v3098_v53 }
 0x31e   : > { %v3100_v40 = vmul.f32 %v5932_v50, %v3099_v38 }
 0x320   : > { %v3104_v30 = vsel %vm3103_vm9, %v5932_v50, %v3100_v40 }
 0x321   : > { %v3112_v44 = vmul.f32 %v3104_v30, %v7355_v4 }
 0x323   : > { %v3121_v60 = vmul.f32 %v7420_v56, %v3112_v44 }
 0x325   : > { %v3130_v0 = vadd.f32 %v7426_v41, %v3121_v60  ;;  %v7654_v41 = vld [vmem:[%s9355_s3 + $0x180] sm:$0xff] }
 0x326   : > { %v3180_v11 = vpop.f32.mrf.mxu0  ;;  %3653 = vmatpush.msrb.mxu3 %v7654_v41  ;;  %v3229_v46 = vpop.f32.mrf.mxu1 }
 0x327   : > { %5673 = vmatmul.msk.f32.gmra.mxu0 %vm2878_vm1, %v3130_v0  ;;  %5681 = vmatmul.msk.f32.gmra.mxu1 %vm2878_vm1, %v3130_v0 }
 0x328   : > { %5689 = vmatmul.msk.f32.gmra.mxu2 %vm2878_vm1, %v3130_v0  ;;  %5690 = vmatmul.msk.f32.vlgmr.msra.gmra.mxu3 %vm2878_vm1, %v3180_v11 }
 0x329   : > { %3654 = vmatpush.msrb.mxu3 %v7681_v51 }
 0x32b   : > { %3655 = vmatpush.msrb.mxu3 %v7705_v22 }
 0x32d   : > { %3656 = vmatpush.msrb.mxu3 %v3338_v17  ;;  %v7786_v48 = vpop.f32.mrf.mxu2 }
 0x32e   : > { %v3183_v4 = vpop.f32.mrf.mxu0  ;;  %v3232_v49 = vpop.f32.mrf.mxu1 }
 0x32f   : > { %5698 = vmatmul.msk.f32.vlgmr.msra.gmra.mxu0 %vm2878_vm1, %v3180_v11  ;;  %5706 = vmatmul.msk.f32.vlgmr.msra.gmra.mxu1 %vm2878_vm1, %v3180_v11 }
 0x330   : > { %5714 = vmatmul.msk.f32.vlgmr.msrb.gmra.mxu2 %vm2878_vm1, %v3180_v11  ;;  %5691 = vmatmul.msk.f32.gmra.mxu3 %vm2878_vm1, %v3183_v4 }
 0x331   : > { %3657 = vmatpush.msrb.mxu3 %v3334_v35  ;;  %3961 = vmatpush.msrb.mxu2 %v7577_v8 }
 0x332   : > { %3879 = vmatpush.msra.mxu0 %v7582_v63  ;;  %3920 = vmatpush.msra.mxu1 %v7592_v36 }
 0x333   : > { %3838 = vmatpush.msra.mxu3 %v7572_v45  ;;  %3962 = vmatpush.msrb.mxu2 %v7597_v23 }
 0x334   : > { %3880 = vmatpush.msra.mxu0 %v7604_v9  ;;  %3921 = vmatpush.msra.mxu1 %v7620_v34 }
 0x335   : > { %3839 = vmatpush.msra.mxu3 %v7587_v1  ;;  %3963 = vmatpush.msrb.mxu2 %v7625_v57  ;;  %v7790_v58 = vpop.f32.mrf.mxu2 }
 0x336   : > { %v3186_v56 = vpop.f32.mrf.mxu0  ;;  %3881 = vmatpush.msra.mxu0 %v7633_v12  ;;  %3922 = vmatpush.msra.mxu1 %v7659_v25  ;;  %v3235_v18 = vpop.f32.mrf.mxu1 }
 0x337   : > { %5699 = vmatmul.msk.f32.gmra.mxu0 %vm2878_vm1, %v3183_v4  ;;  %5707 = vmatmul.msk.f32.gmra.mxu1 %vm2878_vm1, %v3183_v4 }
 0x338   : > { %5715 = vmatmul.msk.f32.gmra.mxu2 %vm2878_vm1, %v3183_v4  ;;  %5692 = vmatmul.msk.f32.gmra.mxu3 %vm2878_vm1, %v3186_v56 }
 0x339   : > { %3840 = vmatpush.msra.mxu3 %v7615_v3  ;;  %3964 = vmatpush.msrb.mxu2 %v7664_v42 }
 0x33a   : > { %3882 = vmatpush.msra.mxu0 %v7674_v37  ;;  %3923 = vmatpush.msra.mxu1 %v7686_v52 }
 0x33b   : > { %3841 = vmatpush.msra.mxu3 %v7654_v41  ;;  %3965 = vmatpush.msrb.mxu2 %v7691_v24 }
 0x33c   : > { %3883 = vmatpush.msra.mxu0 %v7699_v47  ;;  %3924 = vmatpush.msra.mxu1 %v7710_v20 }
 0x33d   : > { %3842 = vmatpush.msra.mxu3 %v7681_v51  ;;  %3966 = vmatpush.msrb.mxu2 %v7715_v26  ;;  %v7796_v28 = vpop.f32.mrf.mxu2 }
 0x33e   : > { %v3189_v21 = vpop.f32.mrf.mxu0  ;;  %3884 = vmatpush.msra.mxu0 %v3343_v55  ;;  %3925 = vmatpush.msra.mxu1 %v3344_v62  ;;  %v3238_v61 = vpop.f32.mrf.mxu1 }
 0x33f   : > { %5700 = vmatmul.msk.f32.gmra.mxu0 %vm2878_vm1, %v3186_v56  ;;  %5708 = vmatmul.msk.f32.gmra.mxu1 %vm2878_vm1, %v3186_v56 }
 0x340   : > { %5716 = vmatmul.msk.f32.gmra.mxu2 %vm2878_vm1, %v3186_v56  ;;  %5693 = vmatmul.msk.f32.gmra.mxu3 %vm2878_vm1, %v3189_v21 }
 0x341   : > { %3843 = vmatpush.msra.mxu3 %v7705_v22  ;;  %3967 = vmatpush.msrb.mxu2 %v3341_v31 }
 0x342   : > { %3885 = vmatpush.msra.mxu0 %v3339_v54  ;;  %3926 = vmatpush.msra.mxu1 %v3340_v14 }
 0x343   : > { %3844 = vmatpush.msra.mxu3 %v3338_v17  ;;  %3968 = vmatpush.msrb.mxu2 %v3337_v16 }
 0x344   : > { %3886 = vmatpush.msra.mxu0 %v3335_v6  ;;  %3927 = vmatpush.msra.mxu1 %v3336_v29 }
 0x345   : > { %3845 = vmatpush.msra.mxu3 %v3334_v35  ;;  %v7802_v39 = vpop.f32.mrf.mxu2 }
 0x346   : > { %v3192_v13 = vpop.f32.mrf.mxu0  ;;  %v3241_v45 = vpop.f32.mrf.mxu1 }
 0x347   : > { %5701 = vmatmul.msk.f32.gmra.mxu0 %vm2878_vm1, %v3189_v21  ;;  %5709 = vmatmul.msk.f32.gmra.mxu1 %vm2878_vm1, %v3189_v21 }
 0x348   : > { %5717 = vmatmul.msk.f32.gmra.mxu2 %vm2878_vm1, %v3189_v21  ;;  %5694 = vmatmul.msk.f32.gmra.mxu3 %vm2878_vm1, %v3192_v13 }
 0x34d   : > { %v7808_v8 = vpop.f32.mrf.mxu2 }
 0x34f   : > { %5702 = vmatmul.msk.f32.gmra.mxu0 %vm2878_vm1, %v3192_v13  ;;  %5710 = vmatmul.msk.f32.gmra.mxu1 %vm2878_vm1, %v3192_v13 }
 0x350   : > { %5718 = vmatmul.msk.f32.gmra.mxu2 %vm2878_vm1, %v3192_v13 }
 0x35a   : > { %v3195_v59 = vpop.f32.mrf.mxu0  ;;  %v3244_v63 = vpop.f32.mrf.mxu1 }
 0x35b   : > { %5695 = vmatmul.msk.f32.gmra.mxu3 %vm2878_vm1, %v3195_v59  ;;  %5703 = vmatmul.msk.f32.gmra.mxu0 %vm2878_vm1, %v3195_v59 }
 0x35c   : > { %5711 = vmatmul.msk.f32.gmra.mxu1 %vm2878_vm1, %v3195_v59  ;;  %5719 = vmatmul.msk.f32.gmra.mxu2 %vm2878_vm1, %v3195_v59 }
 0x361   : > { %v7818_v10 = vpop.f32.mrf.mxu2 }
 0x37e   : > { %v3198_v32 = vpop.f32.mrf.mxu0  ;;  %v3247_v1 = vpop.f32.mrf.mxu1 }
 0x37f   : > { %5696 = vmatmul.msk.f32.gmra.mxu3 %vm2878_vm1, %v3198_v32  ;;  %5704 = vmatmul.msk.f32.gmra.mxu0 %vm2878_vm1, %v3198_v32 }
 0x380   : > { %5712 = vmatmul.msk.f32.gmra.mxu1 %vm2878_vm1, %v3198_v32  ;;  %5720 = vmatmul.msk.f32.gmra.mxu2 %vm2878_vm1, %v3198_v32 }
 0x385   : > { %v7824_v36 = vpop.f32.mrf.mxu2 }
 0x3a4   : > { %v3201_v50 = vpop.f32.mrf.mxu0  ;;  %v3250_v23 = vpop.f32.mrf.mxu1 }
 0x3a5   : > { %5697 = vmatmul.msk.f32.gmra.mxu3 %vm2878_vm1, %v3201_v50  ;;  %5705 = vmatmul.msk.f32.gmra.mxu0 %vm2878_vm1, %v3201_v50 }
 0x3a6   : > { %5713 = vmatmul.msk.f32.gmra.mxu1 %vm2878_vm1, %v3201_v50  ;;  %5721 = vmatmul.msk.f32.gmra.mxu2 %vm2878_vm1, %v3201_v50 }
 0x3ab   : > { %v7830_v9 = vpop.f32.mrf.mxu2  ;;  %v7840_v40 = vpop.f32.mrf.mxu3 }
 0x3ac   : > { %v7832_v53 = vpop.f32.mrf.mxu0  ;;  %v7836_v38 = vpop.f32.mrf.mxu1 }
 0x3ad   : > { %5722 = vmatmul.msk.f32.vlgmr.msrb.gmra.mxu3 %vm2878_vm1, %v3229_v46  ;;  %5730 = vmatmul.msk.f32.vlgmr.msrb.gmra.mxu0 %vm2878_vm1, %v3229_v46 }
 0x3ae   : > { %5738 = vmatmul.msk.f32.vlgmr.msrb.gmra.mxu1 %vm2878_vm1, %v3229_v46  ;;  %5746 = vmatmul.msk.f32.vlgmr.msra.gmra.mxu2 %vm2878_vm1, %v3229_v46 }
 0x3b3   : > { %v7842_v30 = vpop.f32.mrf.mxu2  ;;  %v7852_v57 = vpop.f32.mrf.mxu3 }
 0x3b4   : > { %v7848_v3 = vpop.f32.mrf.mxu0  ;;  %v7850_v34 = vpop.f32.mrf.mxu1 }
 0x3b5   : > { %5723 = vmatmul.msk.f32.gmra.mxu3 %vm2878_vm1, %v3232_v49  ;;  %5731 = vmatmul.msk.f32.gmra.mxu0 %vm2878_vm1, %v3232_v49 }
 0x3b6   : > { %5739 = vmatmul.msk.f32.gmra.mxu1 %vm2878_vm1, %v3232_v49  ;;  %5747 = vmatmul.msk.f32.gmra.mxu2 %vm2878_vm1, %v3232_v49 }
 0x3bb   : > { %v7858_v44 = vpop.f32.mrf.mxu2  ;;  %v7876_v0 = vpop.f32.mrf.mxu3 }
 0x3bc   : > { %v7864_v12 = vpop.f32.mrf.mxu0  ;;  %v7866_v60 = vpop.f32.mrf.mxu1 }
 0x3bd   : > { %5724 = vmatmul.msk.f32.gmra.mxu3 %vm2878_vm1, %v3235_v18  ;;  %5732 = vmatmul.msk.f32.gmra.mxu0 %vm2878_vm1, %v3235_v18 }
 0x3be   : > { %5740 = vmatmul.msk.f32.gmra.mxu1 %vm2878_vm1, %v3235_v18  ;;  %5748 = vmatmul.msk.f32.gmra.mxu2 %vm2878_vm1, %v3235_v18 }
 0x3c3   : > { %v7878_v11 = vpop.f32.mrf.mxu2  ;;  %v7892_v41 = vpop.f32.mrf.mxu3 }
 0x3c4   : > { %v7880_v4 = vpop.f32.mrf.mxu0  ;;  %v7882_v56 = vpop.f32.mrf.mxu1 }
 0x3c5   : > { %5725 = vmatmul.msk.f32.gmra.mxu3 %vm2878_vm1, %v3238_v61  ;;  %5733 = vmatmul.msk.f32.gmra.mxu0 %vm2878_vm1, %v3238_v61 }
 0x3c6   : > { %5741 = vmatmul.msk.f32.gmra.mxu1 %vm2878_vm1, %v3238_v61  ;;  %5749 = vmatmul.msk.f32.gmra.mxu2 %vm2878_vm1, %v3238_v61 }
 0x3cb   : > { %v7894_v25 = vpop.f32.mrf.mxu2  ;;  %v7908_v51 = vpop.f32.mrf.mxu3 }
 0x3cc   : > { %v7896_v42 = vpop.f32.mrf.mxu0  ;;  %v7902_v37 = vpop.f32.mrf.mxu1 }
 0x3cd   : > { %5726 = vmatmul.msk.f32.gmra.mxu3 %vm2878_vm1, %v3241_v45  ;;  %5734 = vmatmul.msk.f32.gmra.mxu0 %vm2878_vm1, %v3241_v45 }
 0x3ce   : > { %5742 = vmatmul.msk.f32.gmra.mxu1 %vm2878_vm1, %v3241_v45  ;;  %5750 = vmatmul.msk.f32.gmra.mxu2 %vm2878_vm1, %v3241_v45 }
 0x3d3   : > { %v7910_v52 = vpop.f32.mrf.mxu2 }
 0x3d5   : > { %5727 = vmatmul.msk.f32.gmra.mxu3 %vm2878_vm1, %v3244_v63  ;;  %5735 = vmatmul.msk.f32.gmra.mxu0 %vm2878_vm1, %v3244_v63 }
 0x3d6   : > { %5743 = vmatmul.msk.f32.gmra.mxu1 %vm2878_vm1, %v3244_v63  ;;  %5751 = vmatmul.msk.f32.gmra.mxu2 %vm2878_vm1, %v3244_v63 }
 0x3d8   : > { %v7920_v24 = vpop.f32.mrf.mxu0 }
 0x3d9   : > { %v7922_v47 = vpop.f32.mrf.mxu1 }
 0x3dd   : > { %5728 = vmatmul.msk.f32.gmra.mxu3 %vm2878_vm1, %v3247_v1  ;;  %5736 = vmatmul.msk.f32.gmra.mxu0 %vm2878_vm1, %v3247_v1 }
 0x3de   : > { %5744 = vmatmul.msk.f32.gmra.mxu1 %vm2878_vm1, %v3247_v1  ;;  %5752 = vmatmul.msk.f32.gmra.mxu2 %vm2878_vm1, %v3247_v1  ;;  %v7924_v22 = vpop.f32.mrf.mxu3 }
 0x3df   : > { %v7930_v20 = vpop.f32.mrf.mxu2 }
 0x3e5   : > { %5729 = vmatmul.msk.f32.gmra.mxu3 %vm2878_vm1, %v3250_v23  ;;  %5737 = vmatmul.msk.f32.gmra.mxu0 %vm2878_vm1, %v3250_v23 }
 0x3e6   : > { %5745 = vmatmul.msk.f32.gmra.mxu1 %vm2878_vm1, %v3250_v23  ;;  %5753 = vmatmul.msk.f32.gmra.mxu2 %vm2878_vm1, %v3250_v23 }
 0x3ed   : > { %5754 = vmatmul.msk.f32.vlgmr.msra.gmra.mxu3 %vm2878_vm1, %v7786_v48  ;;  %5762 = vmatmul.msk.f32.vlgmr.msra.gmra.mxu0 %vm2878_vm1, %v7786_v48 }
 0x3ee   : > { %5770 = vmatmul.msk.f32.vlgmr.msra.gmra.mxu1 %vm2878_vm1, %v7786_v48  ;;  %5778 = vmatmul.msk.f32.vlgmr.msrb.gmra.mxu2 %vm2878_vm1, %v7786_v48 }
 0x3f5   : > { %5755 = vmatmul.msk.f32.gmra.mxu3 %vm2878_vm1, %v7790_v58  ;;  %5763 = vmatmul.msk.f32.gmra.mxu0 %vm2878_vm1, %v7790_v58 }
 0x3f6   : > { %5771 = vmatmul.msk.f32.gmra.mxu1 %vm2878_vm1, %v7790_v58  ;;  %5779 = vmatmul.msk.f32.gmra.mxu2 %vm2878_vm1, %v7790_v58 }
 0x3fc   : > { %v7936_v26 = vpop.f32.mrf.mxu0 }
 0x3fd   : > { %5756 = vmatmul.msk.f32.gmra.mxu3 %vm2878_vm1, %v7796_v28  ;;  %5764 = vmatmul.msk.f32.gmra.mxu0 %vm2878_vm1, %v7796_v28  ;;  %v7938_v21 = vpop.f32.mrf.mxu1 }
 0x3fe   : > { %5772 = vmatmul.msk.f32.gmra.mxu1 %vm2878_vm1, %v7796_v28  ;;  %5780 = vmatmul.msk.f32.gmra.mxu2 %vm2878_vm1, %v7796_v28 }
 0x402   : > { %v7948_v55 = vpop.f32.mrf.mxu3 }
 0x403   : > { %v7950_v17 = vpop.f32.mrf.mxu2 }
 0x405   : > { %5757 = vmatmul.msk.f32.gmra.mxu3 %vm2878_vm1, %v7802_v39  ;;  %5765 = vmatmul.msk.f32.gmra.mxu0 %vm2878_vm1, %v7802_v39 }
 0x406   : > { %5773 = vmatmul.msk.f32.gmra.mxu1 %vm2878_vm1, %v7802_v39  ;;  %5781 = vmatmul.msk.f32.gmra.mxu2 %vm2878_vm1, %v7802_v39 }
 0x40d   : > { %5758 = vmatmul.msk.f32.gmra.mxu3 %vm2878_vm1, %v7808_v8  ;;  %5766 = vmatmul.msk.f32.gmra.mxu0 %vm2878_vm1, %v7808_v8 }
 0x40e   : > { %5774 = vmatmul.msk.f32.gmra.mxu1 %vm2878_vm1, %v7808_v8  ;;  %5782 = vmatmul.msk.f32.gmra.mxu2 %vm2878_vm1, %v7808_v8 }
 0x415   : > { %5759 = vmatmul.msk.f32.gmra.mxu3 %vm2878_vm1, %v7818_v10  ;;  %5767 = vmatmul.msk.f32.gmra.mxu0 %vm2878_vm1, %v7818_v10 }
 0x416   : > { %5775 = vmatmul.msk.f32.gmra.mxu1 %vm2878_vm1, %v7818_v10  ;;  %5783 = vmatmul.msk.f32.gmra.mxu2 %vm2878_vm1, %v7818_v10 }
 0x41d   : > { %5760 = vmatmul.msk.f32.gmra.mxu3 %vm2878_vm1, %v7824_v36  ;;  %5768 = vmatmul.msk.f32.gmra.mxu0 %vm2878_vm1, %v7824_v36 }
 0x41e   : > { %5776 = vmatmul.msk.f32.gmra.mxu1 %vm2878_vm1, %v7824_v36  ;;  %5784 = vmatmul.msk.f32.gmra.mxu2 %vm2878_vm1, %v7824_v36 }
 0x422   : > { %v7952_v62 = vpop.f32.mrf.mxu0 }
 0x423   : > { %v7954_v31 = vpop.f32.mrf.mxu1 }
 0x425   : > { %5761 = vmatmul.msk.f32.gmra.mxu3 %vm2878_vm1, %v7830_v9  ;;  %5769 = vmatmul.msk.f32.gmra.mxu0 %vm2878_vm1, %v7830_v9 }
 0x426   : > { %5777 = vmatmul.msk.f32.gmra.mxu1 %vm2878_vm1, %v7830_v9  ;;  %5785 = vmatmul.msk.f32.gmra.mxu2 %vm2878_vm1, %v7830_v9 }
 0x428   : > { %v7964_v54 = vpop.f32.mrf.mxu3 }
 0x429   : > { %v7966_v13 = vpop.f32.mrf.mxu2 }
 0x42a   : > { %v3700_v59 = vpop.f32.mrf.mxu0 }
 0x42b   : > { %v3741_v32 = vpop.f32.mrf.mxu1  ;;  %v7969_v14 = vmul.f32 %v3700_v59, %v7832_v53 }
 0x42c   : > { %v7975_v46 = vmul.f32 %v3741_v32, %v7836_v38 }
 0x430   : > { %v3659_v35 = vpop.f32.mrf.mxu3 }
 0x431   : > { %v7972_v16 = vmul.f32 %v3659_v35, %v7840_v40  ;;  %v3782_v6 = vpop.f32.mrf.mxu2 }
 0x432   : > { %v3703_v29 = vpop.f32.mrf.mxu0  ;;  %v7980_v58 = vmul.f32 %v3782_v6, %v7842_v30 }
 0x433   : > { %v4026_v48 = vmax.f32 %v7972_v16, %v7969_v14  ;;  %v3744_v49 = vpop.f32.mrf.mxu1  ;;  %v7985_v61 = vmul.f32 %v3703_v29, %v7848_v3 }
 0x434   : > { %v7991_v63 = vmul.f32 %v3744_v49, %v7850_v34 }
 0x435   : > { %v4027_v18 = vmax.f32 %v4026_v48, %v7975_v46 }
 0x437   : > { %v4028_v50 = vmax.f32 %v4027_v18, %v7980_v58 }
 0x438   : > { %v3662_v28 = vpop.f32.mrf.mxu3 }
 0x439   : > { %v7988_v39 = vmul.f32 %v3662_v28, %v7852_v57  ;;  %v3785_v45 = vpop.f32.mrf.mxu2  ;;  %4029 = vmax.xlane.f32.xlu0 %v4028_v50 }
 0x43a   : > { %v3706_v8 = vpop.f32.mrf.mxu0  ;;  %v7996_v36 = vmul.f32 %v3785_v45, %v7858_v44 }
 0x43b   : > { %v4031_v10 = vmax.f32 %v7988_v39, %v7985_v61  ;;  %v3747_v1 = vpop.f32.mrf.mxu1  ;;  %v8001_v38 = vmul.f32 %v3706_v8, %v7864_v12 }
 0x43c   : > { %9421 = vst [vmem:[#allocation13_spill] sm:$0xff] %v7996_v36  ;;  %v8007_v34 = vmul.f32 %v3747_v1, %v7866_v60 }
 0x43d   : > { %v4032_v23 = vmax.f32 %v4031_v10, %v7991_v63  ;;  %9422 = vst [vmem:[#allocation14_spill] sm:$0xff] %v8001_v38 }
 0x43e   : > { %9424 = vst [vmem:[#allocation16_spill] sm:$0xff] %v8007_v34 }
 0x43f   : > { %v4033_v9 = vmax.f32 %v4032_v23, %v7996_v36  ;;  %v8444_v36 = vld [vmem:[%s9354_s2 + $0x388] sm:$0xff] }
 0x440   : > { %v3665_v53 = vpop.f32.mrf.mxu3  ;;  %9452 = vst [vmem:[#allocation44_spill] sm:$0xff] %v8444_v36 }
 0x441   : > { %v8004_v40 = vmul.f32 %v3665_v53, %v7876_v0  ;;  %v3788_v30 = vpop.f32.mrf.mxu2  ;;  %4034 = vmax.xlane.f32.xlu0 %v4033_v9 }
 0x442   : > { %v3709_v3 = vpop.f32.mrf.mxu0  ;;  %v8012_v59 = vmul.f32 %v3788_v30, %v7878_v11 }
 0x443   : > { %9423 = vst [vmem:[#allocation15_spill] sm:$0xff] %v8004_v40  ;;  %v4036_v57 = vmax.f32 %v8004_v40, %v8001_v38  ;;  %v3750_v44 = vpop.f32.mrf.mxu1  ;;  %v8017_v0 = vmul.f32 %v3709_v3, %v7880_v4  ;;  %v8057_v3 = vld [vmem:[%s9354_s2 + $0x278] sm:$0xff]  ;;  %v8422_v38 = vld [vmem:[%s9354_s2 + $0x390] sm:$0xff] }
 0x444   : > { %9425 = vst [vmem:[#allocation17_spill] sm:$0xff] %v8012_v59  ;;  %v8023_v48 = vmul.f32 %v3750_v44, %v7882_v56  ;;  %4162 = vmatpush.msrb.mxu3 %v8057_v3  ;;  %v8078_v44 = vld [vmem:[%s9354_s2 + $0x2f8] sm:$0xff]  ;;  %v8427_v40 = vld [vmem:[%s9354_s2 + $0x290] sm:$0xff] }
 0x445   : > { %v4037_v32 = vmax.f32 %v4036_v57, %v8007_v34  ;;  %9426 = vst [vmem:[#allocation18_spill] sm:$0xff] %v8017_v0  ;;  %4203 = vmatpush.msrb.mxu0 %v8078_v44  ;;  %v8416_v34 = vld [vmem:[%s9354_s2 + $0x208] sm:$0xff] }
 0x446   : > { %9428 = vst [vmem:[#allocation20_spill] sm:$0xff] %v8023_v48 }
 0x447   : > { %v4038_v12 = vmax.f32 %v4037_v32, %v8012_v59  ;;  %v8410_v59 = vld [vmem:[%s9354_s2 + $0x318] sm:$0xff]  ;;  %9448 = vst [vmem:[#allocation40_spill] sm:$0xff] %v8416_v34 }
 0x448   : > { %v3668_v35 = vpop.f32.mrf.mxu3  ;;  %9447 = vst [vmem:[#allocation39_spill] sm:$0xff] %v8410_v59 }
 0x449   : > { %v8020_v6 = vmul.f32 %v3668_v35, %v7892_v41  ;;  %v3791_v60 = vpop.f32.mrf.mxu2  ;;  %4039 = vmax.xlane.f32.xlu1 %v4038_v12  ;;  %9449 = vst [vmem:[#allocation41_spill] sm:$0xff] %v8422_v38 }
 0x44a   : > { %v3712_v29 = vpop.f32.mrf.mxu0  ;;  %v8028_v18 = vmul.f32 %v3791_v60, %v7894_v25 }
 0x44b   : > { %9427 = vst [vmem:[#allocation19_spill] sm:$0xff] %v8020_v6  ;;  %v4041_v11 = vmax.f32 %v8020_v6, %v8017_v0  ;;  %v3753_v49 = vpop.f32.mrf.mxu1  ;;  %v8033_v41 = vmul.f32 %v3712_v29, %v7896_v42  ;;  %v8397_v0 = vld [vmem:[%s9354_s2 + $0x398] sm:$0xff] }
 0x44c   : > { %9429 = vst [vmem:[#allocation21_spill] sm:$0xff] %v8028_v18  ;;  %v8039_v10 = vmul.f32 %v3753_v49, %v7902_v37  ;;  %v8405_v6 = vld [vmem:[%s9354_s2 + $0x298] sm:$0xff] }
 0x44d   : > { %v4042_v50 = vmax.f32 %v4041_v11, %v8023_v48  ;;  %9430 = vst [vmem:[#allocation22_spill] sm:$0xff] %v8033_v41  ;;  %v8390_v48 = vld [vmem:[%s9354_s2 + $0x320] sm:$0xff] }
 0x44e   : > { %9432 = vst [vmem:[#allocation24_spill] sm:$0xff] %v8039_v10 }
 0x44f   : > { %v4043_v4 = vmax.f32 %v4042_v50, %v8028_v18  ;;  %v8385_v18 = vld [vmem:[%s9354_s2 + $0x210] sm:$0xff]  ;;  %9446 = vst [vmem:[#allocation38_spill] sm:$0xff] %v8405_v6 }
 0x450   : > { %v3671_v28 = vpop.f32.mrf.mxu3 }
 0x451   : > { %v8036_v45 = vmul.f32 %v3671_v28, %v7908_v51  ;;  %v3794_v56 = vpop.f32.mrf.mxu2  ;;  %4044 = vmax.xlane.f32.xlu1 %v4043_v4  ;;  %v8102_v4 = vld [vmem:[%s9354_s2 + $0x378] sm:$0xff] }
 0x452   : > { %v3715_v8 = vpop.f32.mrf.mxu0  ;;  %v8044_v23 = vmul.f32 %v3794_v56, %v7910_v52  ;;  %4244 = vmatpush.msrb.mxu1 %v8102_v4  ;;  %v8120_v56 = vld [vmem:[%s9354_s2 + $0x2f0] sm:$0xff] }
 0x453   : > { %9431 = vst [vmem:[#allocation23_spill] sm:$0xff] %v8036_v45  ;;  %v4046_v25 = vmax.f32 %v8036_v45, %v8033_v41  ;;  %v3756_v1 = vpop.f32.mrf.mxu1  ;;  %v8049_v51 = vmul.f32 %v3715_v8, %v7920_v24  ;;  %v8068_v24 = vld [vmem:[%s9354_s2 + $0x270] sm:$0xff]  ;;  %v8125_v8 = vld [vmem:[%s9354_s2 + $0x260] sm:$0xff]  ;;  %4204 = vmatpush.msrb.mxu0 %v8120_v56 }
 0x454   : > { %9433 = vst [vmem:[#allocation25_spill] sm:$0xff] %v8044_v23  ;;  %v8061_v52 = vmul.f32 %v3756_v1, %v7922_v47  ;;  %4163 = vmatpush.msrb.mxu3 %v8068_v24  ;;  %v8142_v1 = vld [vmem:[%s9354_s2 + $0x2e8] sm:$0xff]  ;;  %v8373_v41 = vld [vmem:[%s9354_s2 + $0x3a0] sm:$0xff] }
 0x455   : > { %v4047_v9 = vmax.f32 %v4046_v25, %v8039_v10  ;;  %9434 = vst [vmem:[#allocation26_spill] sm:$0xff] %v8049_v51  ;;  %v8137_v25 = vld [vmem:[%s9354_s2 + $0x3e8] sm:$0xff]  ;;  %4205 = vmatpush.msrb.mxu0 %v8142_v1  ;;  %v8380_v45 = vld [vmem:[%s9354_s2 + $0x2a0] sm:$0xff] }
 0x456   : > { %9436 = vst [vmem:[#allocation28_spill] sm:$0xff] %v8061_v52  ;;  %v8368_v10 = vld [vmem:[%s9354_s2 + $0x328] sm:$0xff] }
 0x457   : > { %v4048_v42 = vmax.f32 %v4047_v9, %v8044_v23  ;;  %v8363_v23 = vld [vmem:[%s9354_s2 + $0x218] sm:$0xff] }
 0x458   : > { %v3674_v53 = vpop.f32.mrf.mxu3 }
 0x459   : > { %v8052_v30 = vmul.f32 %v3674_v53, %v7924_v22  ;;  %v3797_v37 = vpop.f32.mrf.mxu2  ;;  %4049 = vmax.xlane.f32.xlu2 %v4048_v42  ;;  %v8073_v22 = vld [vmem:[%s9354_s2 + $0x3f8] sm:$0xff] }
 0x45a   : > { %v3718_v47 = vpop.f32.mrf.mxu0  ;;  %4285 = vmatpush.msra.mxu2 %v8073_v22  ;;  %v8083_v32 = vmul.f32 %v3797_v37, %v7930_v20  ;;  %v8097_v20 = vld [vmem:[%s9354_s2 + $0x268] sm:$0xff] }
 0x45b   : > { %9435 = vst [vmem:[#allocation27_spill] sm:$0xff] %v8052_v30  ;;  %v4051_v57 = vmax.f32 %v8052_v30, %v8049_v51  ;;  %v3759_v35 = vpop.f32.mrf.mxu1  ;;  %v8089_v11 = vmul.f32 %v3718_v47, %v7936_v26  ;;  %v8107_v26 = vld [vmem:[%s9354_s2 + $0x3f0] sm:$0xff]  ;;  %4164 = vmatpush.msrb.mxu3 %v8097_v20  ;;  %v8350_v51 = vld [vmem:[%s9354_s2 + $0x3a8] sm:$0xff] }
 0x45c   : > { %9437 = vst [vmem:[#allocation29_spill] sm:$0xff] %v8083_v32  ;;  %4286 = vmatpush.msra.mxu2 %v8107_v26  ;;  %v8355_v30 = vld [vmem:[%s9354_s2 + $0x2a8] sm:$0xff] }
 0x45d   : > { %v4052_v12 = vmax.f32 %v4051_v57, %v8061_v52  ;;  %9438 = vst [vmem:[#allocation30_spill] sm:$0xff] %v8089_v11  ;;  %4165 = vmatpush.msrb.mxu3 %v8125_v8  ;;  %v8343_v52 = vld [vmem:[%s9354_s2 + $0x330] sm:$0xff] }
 0x45e   : > { %4287 = vmatpush.msra.mxu2 %v8137_v25 }
 0x45f   : > { %v4053_v60 = vmax.f32 %v4052_v12, %v8083_v32  ;;  %v8338_v32 = vld [vmem:[%s9354_s2 + $0x220] sm:$0xff] }
 0x460   : > { %v3677_v29 = vpop.f32.mrf.mxu3 }
 0x461   : > { %v8092_v49 = vmul.f32 %v3677_v29, %v7948_v55  ;;  %v3800_v50 = vpop.f32.mrf.mxu2  ;;  %4054 = vmax.xlane.f32.xlu2 %v4053_v60  ;;  %v8112_v55 = vmul.f32 %v3759_v35, %v7938_v21  ;;  %v8130_v21 = vld [vmem:[%s9354_s2 + $0x370] sm:$0xff]  ;;  %v8166_v60 = vld [vmem:[%s9354_s2 + $0x368] sm:$0xff]  ;;  %v8171_v29 = vld [vmem:[%s9354_s2 + $0x3e0] sm:$0xff] }
 0x462   : > { %v8145_v9 = vmul.f32 %v3800_v50, %v7950_v17  ;;  %4245 = vmatpush.msrb.mxu1 %v8130_v21  ;;  %v3721_v53 = vpop.f32.mrf.mxu0  ;;  %v8161_v17 = vld [vmem:[%s9354_s2 + $0x258] sm:$0xff]  ;;  %4288 = vmatpush.msra.mxu2 %v8171_v29 }
 0x463   : > { %9439 = vst [vmem:[#allocation31_spill] sm:$0xff] %v8092_v49  ;;  %v4056_v28 = vmax.f32 %v8092_v49, %v8089_v11  ;;  %v3762_v57 = vpop.f32.mrf.mxu1  ;;  %v8153_v12 = vmul.f32 %v3721_v53, %v7952_v62  ;;  %4166 = vmatpush.msrb.mxu3 %v8161_v17  ;;  %v8201_v53 = vld [vmem:[%s9354_s2 + $0x3d8] sm:$0xff]  ;;  %v8325_v11 = vld [vmem:[%s9354_s2 + $0x3b0] sm:$0xff] }
 0x464   : > { %9440 = vst [vmem:[#allocation32_spill] sm:$0xff] %v8112_v55  ;;  %4246 = vmatpush.msrb.mxu1 %v8166_v60  ;;  %4289 = vmatpush.msra.mxu2 %v8201_v53  ;;  %v8333_v49 = vld [vmem:[%s9354_s2 + $0x2b0] sm:$0xff] }
 0x465   : > { %9441 = vst [vmem:[#allocation33_spill] sm:$0xff] %v8145_v9  ;;  %v4057_v42 = vmax.f32 %v4056_v28, %v8112_v55  ;;  %v8184_v28 = vld [vmem:[%s9354_s2 + $0x2e0] sm:$0xff]  ;;  %v8320_v55 = vld [vmem:[%s9354_s2 + $0x338] sm:$0xff] }
 0x466   : > { %9442 = vst [vmem:[#allocation34_spill] sm:$0xff] %v8153_v12  ;;  %4206 = vmatpush.msrb.mxu0 %v8184_v28 }
 0x467   : > { %v4058_v37 = vmax.f32 %v4057_v42, %v8145_v9  ;;  %v8189_v42 = vld [vmem:[%s9354_s2 + $0x250] sm:$0xff]  ;;  %v8315_v9 = vld [vmem:[%s9354_s2 + $0x228] sm:$0xff] }
 0x468   : > { %v3680_v47 = vpop.f32.mrf.mxu3  ;;  %4167 = vmatpush.msrb.mxu3 %v8189_v42 }
 0x469   : > { %v8156_v35 = vmul.f32 %v3680_v47, %v7964_v54  ;;  %4059 = vmax.xlane.f32.xlu0 %v4058_v37  ;;  %v3803_v62 = vpop.f32.mrf.mxu2  ;;  %v8176_v54 = vmul.f32 %v3762_v57, %v7954_v31  ;;  %v8194_v31 = vld [vmem:[%s9354_s2 + $0x360] sm:$0xff]  ;;  %v8206_v37 = vld [vmem:[%s9354_s2 + $0x2d8] sm:$0xff] }
 0x46a   : > { %v8209_v57 = vmul.f32 %v3803_v62, %v7966_v13  ;;  %4247 = vmatpush.msrb.mxu1 %v8194_v31  ;;  %4207 = vmatpush.msrb.mxu0 %v8206_v37  ;;  %v8224_v13 = vld [vmem:[%s9354_s2 + $0x358] sm:$0xff]  ;;  %v8229_v62 = vld [vmem:[%s9354_s2 + $0x3d0] sm:$0xff] }
 0x46b   : > { %9443 = vst [vmem:[#allocation35_spill] sm:$0xff] %v8156_v35  ;;  %v4061_v50 = vmax.f32 %v8156_v35, %v8153_v12  ;;  %4168 = vmatpush.msrb.mxu3 %v8219_v43  ;;  %4290 = vmatpush.msra.mxu2 %v8229_v62  ;;  %v8302_v12 = vld [vmem:[%s9354_s2 + $0x3b8] sm:$0xff] }
 0x46c   : > { %9444 = vst [vmem:[#allocation36_spill] sm:$0xff] %v8176_v54  ;;  %4248 = vmatpush.msrb.mxu1 %v8224_v13  ;;  %v8307_v35 = vld [vmem:[%s9354_s2 + $0x2b8] sm:$0xff] }
 0x46d   : > { %9445 = vst [vmem:[#allocation37_spill] sm:$0xff] %v8209_v57  ;;  %v4062_v47 = vmax.f32 %v4061_v50, %v8176_v54  ;;  %v8242_v50 = vld [vmem:[%s9354_s2 + $0x240] sm:$0xff]  ;;  %4291 = vmatpush.msra.mxu2 %v8254_v27 }
 0x46e   : > { %4169 = vmatpush.msrb.mxu3 %v8242_v50  ;;  %v8295_v54 = vld [vmem:[%s9354_s2 + $0x340] sm:$0xff] }
 0x46f   : > { %v4063_v19 = vmax.f32 %v4062_v47, %v8209_v57  ;;  %v8247_v47 = vld [vmem:[%s9354_s2 + $0x350] sm:$0xff]  ;;  %4292 = vmatpush.msra.mxu2 %v8277_v33 }
 0x470   : > { %4249 = vmatpush.msrb.mxu1 %v8247_v47  ;;  %4170 = vmatpush.msrb.mxu3 %v8267_v2  ;;  %v8290_v57 = vld [vmem:[%s9354_s2 + $0x230] sm:$0xff] }
 0x471   : > { %4064 = vmax.xlane.f32.xlu1 %v4063_v19  ;;  %v8237_v19 = vld [vmem:[%s9354_s2 + $0x2d0] sm:$0xff]  ;;  %4293 = vmatpush.msra.mxu2 %v8302_v12 }
 0x472   : > { %4208 = vmatpush.msrb.mxu0 %v8237_v19  ;;  %4250 = vmatpush.msrb.mxu1 %v8272_v5 }
 0x473   : > { %4171 = vmatpush.msrb.mxu3 %v8290_v57  ;;  %4294 = vmatpush.msra.mxu2 %v8325_v11 }
 0x474   : > { %4209 = vmatpush.msrb.mxu0 %v8259_v7  ;;  %4251 = vmatpush.msrb.mxu1 %v8295_v54 }
 0x475   : > { %4172 = vmatpush.msrb.mxu3 %v8315_v9  ;;  %4295 = vmatpush.msra.mxu2 %v8350_v51 }
 0x476   : > { %4210 = vmatpush.msrb.mxu0 %v8285_v15  ;;  %4252 = vmatpush.msrb.mxu1 %v8320_v55 }
 0x477   : > { %4173 = vmatpush.msrb.mxu3 %v8338_v32  ;;  %4296 = vmatpush.msra.mxu2 %v8373_v41 }
 0x478   : > { %4211 = vmatpush.msrb.mxu0 %v8307_v35  ;;  %4253 = vmatpush.msrb.mxu1 %v8343_v52 }
 0x479   : > { %4174 = vmatpush.msrb.mxu3 %v8363_v23  ;;  %4297 = vmatpush.msra.mxu2 %v8397_v0 }
 0x47a   : > { %4212 = vmatpush.msrb.mxu0 %v8333_v49  ;;  %4254 = vmatpush.msrb.mxu1 %v8368_v10 }
 0x47b   : > { %4175 = vmatpush.msrb.mxu3 %v8385_v18  ;;  %4298 = vmatpush.msra.mxu2 %v8422_v38  ;;  %v8453_v38 = vld [vmem:[%s9354_s2 + $0x288] sm:$0xff] }
 0x47c   : > { %4213 = vmatpush.msrb.mxu0 %v8355_v30  ;;  %4255 = vmatpush.msrb.mxu1 %v8390_v48 }
 0x47d   : > { %4176 = vmatpush.msrb.mxu3 %v8416_v34  ;;  %4299 = vmatpush.msra.mxu2 %v8444_v36  ;;  %v8458_v34 = vld [vmem:[%s9354_s2 + $0x308] sm:$0xff]  ;;  %v8470_v36 = vld [vmem:[%s9354_s2 + $0x300] sm:$0xff] }
 0x47e   : > { %4214 = vmatpush.msrb.mxu0 %v8380_v45  ;;  %4256 = vmatpush.msrb.mxu1 %v8410_v59  ;;  %v8439_v59 = vld [vmem:[%s9354_s2 + $0x200] sm:$0xff] }
 0x47f   : > { %9451 = vst [vmem:[#allocation43_spill] sm:$0xff] %v8439_v59  ;;  %4177 = vmatpush.msrb.mxu3 %v8439_v59  ;;  %v8465_v59 = vld [vmem:[%s9354_s2 + $0x280] sm:$0xff] }
 0x480   : > { %4215 = vmatpush.msrb.mxu0 %v8405_v6  ;;  %v8434_v6 = vld [vmem:[%s9354_s2 + $0x310] sm:$0xff] }
 0x481   : > { %9450 = vst [vmem:[#allocation42_spill] sm:$0xff] %v8434_v6  ;;  %4257 = vmatpush.msrb.mxu1 %v8434_v6  ;;  %v8475_v6 = vld [vmem:[%s9354_s2 + $0x380] sm:$0xff]  ;;  %4358 = vmatpush.msra.mxu3 %v8057_v3 }
 0x482   : > { %4216 = vmatpush.msrb.mxu0 %v8427_v40  ;;  %4300 = vmatpush.msra.mxu2 %v8475_v6 }
 0x483   : > { %4258 = vmatpush.msrb.mxu1 %v8458_v34  ;;  %4359 = vmatpush.msra.mxu3 %v8068_v24 }
 0x484   : > { %4217 = vmatpush.msrb.mxu0 %v8453_v38  ;;  %4481 = vmatpush.msrb.mxu2 %v8073_v22 }
 0x485   : > { %4259 = vmatpush.msrb.mxu1 %v8470_v36  ;;  %4360 = vmatpush.msra.mxu3 %v8097_v20 }
 0x486   : > { %4218 = vmatpush.msrb.mxu0 %v8465_v59  ;;  %4482 = vmatpush.msrb.mxu2 %v8107_v26 }
 0x487   : > { %4440 = vmatpush.msra.mxu1 %v8102_v4  ;;  %4361 = vmatpush.msra.mxu3 %v8125_v8  ;;  %v9462_v4 = vld [vmem:[#allocation14_spill] sm:$0xff]  ;;  %v9464_v8 = vld [vmem:[#allocation17_spill] sm:$0xff] }
 0x488   : > { %4399 = vmatpush.msra.mxu0 %v8078_v44  ;;  %4483 = vmatpush.msrb.mxu2 %v8137_v25  ;;  %v9459_v44 = vld [vmem:[#allocation43_spill] sm:$0xff] }
 0x489   : > { %4441 = vmatpush.msra.mxu1 %v8130_v21  ;;  %4362 = vmatpush.msra.mxu3 %v8161_v17  ;;  %v6064_v17 = vld [vmem:[%s9354_s2 + $0x1e8] sm:$0xff] }
 0x48a   : > { %4400 = vmatpush.msra.mxu0 %v8120_v56  ;;  %4484 = vmatpush.msrb.mxu2 %v8171_v29  ;;  %v6065_v29 = vld [vmem:[%s9354_s2 + $0x1e0] sm:$0xff] }
 0x48b   : > { %4442 = vmatpush.msra.mxu1 %v8166_v60  ;;  %4363 = vmatpush.msra.mxu3 %v8189_v42  ;;  %v9466_v42 = vld [vmem:[#allocation18_spill] sm:$0xff] }
 0x48c   : > { %4401 = vmatpush.msra.mxu0 %v8142_v1  ;;  %4485 = vmatpush.msrb.mxu2 %v8201_v53  ;;  %v9467_v53 = vld [vmem:[#allocation20_spill] sm:$0xff] }
 0x48d   : > { %4443 = vmatpush.msra.mxu1 %v8194_v31  ;;  %4364 = vmatpush.msra.mxu3 %v8219_v43 }
 0x48e   : > { %4402 = vmatpush.msra.mxu0 %v8184_v28  ;;  %4486 = vmatpush.msrb.mxu2 %v8229_v62  ;;  %v6066_v62 = vld [vmem:[%s9354_s2 + $0x1d8] sm:$0xff] }
 0x48f   : > { %4444 = vmatpush.msra.mxu1 %v8224_v13  ;;  %4365 = vmatpush.msra.mxu3 %v8242_v50 }
 0x490   : > { %4403 = vmatpush.msra.mxu0 %v8206_v37  ;;  %4487 = vmatpush.msrb.mxu2 %v8254_v27 }
 0x491   : > { %4445 = vmatpush.msra.mxu1 %v8247_v47  ;;  %4366 = vmatpush.msra.mxu3 %v8267_v2 }
 0x492   : > { %4404 = vmatpush.msra.mxu0 %v8237_v19  ;;  %4488 = vmatpush.msrb.mxu2 %v8277_v33 }
 0x493   : > { %4446 = vmatpush.msra.mxu1 %v8272_v5  ;;  %4367 = vmatpush.msra.mxu3 %v8290_v57  ;;  %v9468_v57 = vld [vmem:[#allocation21_spill] sm:$0xff] }
 0x494   : > { %4405 = vmatpush.msra.mxu0 %v8259_v7  ;;  %4489 = vmatpush.msrb.mxu2 %v8302_v12 }
 0x495   : > { %4447 = vmatpush.msra.mxu1 %v8295_v54  ;;  %4368 = vmatpush.msra.mxu3 %v8315_v9  ;;  %v9465_v54 = vld [vmem:[#allocation19_spill] sm:$0xff] }
 0x496   : > { %4406 = vmatpush.msra.mxu0 %v8285_v15  ;;  %4490 = vmatpush.msrb.mxu2 %v8325_v11 }
 0x497   : > { %4448 = vmatpush.msra.mxu1 %v8320_v55  ;;  %4369 = vmatpush.msra.mxu3 %v8338_v32  ;;  %v9463_v55 = vld [vmem:[#allocation16_spill] sm:$0xff] }
 0x498   : > { %4407 = vmatpush.msra.mxu0 %v8307_v35  ;;  %4491 = vmatpush.msrb.mxu2 %v8350_v51 }
 0x499   : > { %4449 = vmatpush.msra.mxu1 %v8343_v52  ;;  %4370 = vmatpush.msra.mxu3 %v8363_v23 }
 0x49a   : > { %4408 = vmatpush.msra.mxu0 %v8333_v49  ;;  %4492 = vmatpush.msrb.mxu2 %v8373_v41  ;;  %v9454_v41 = vld [vmem:[#allocation38_spill] sm:$0xff]  ;;  %v9461_v49 = vld [vmem:[#allocation15_spill] sm:$0xff] }
 0x49b   : > { %4450 = vmatpush.msra.mxu1 %v8368_v10  ;;  %4371 = vmatpush.msra.mxu3 %v8385_v18  ;;  %v9453_v10 = vld [vmem:[#allocation13_spill] sm:$0xff] }
 0x49c   : > { %4409 = vmatpush.msra.mxu0 %v8355_v30  ;;  %4493 = vmatpush.msrb.mxu2 %v8397_v0  ;;  %v9455_v30 = vld [vmem:[#allocation40_spill] sm:$0xff]  ;;  %v9457_v0 = vld [vmem:[#allocation41_spill] sm:$0xff] }
 0x49d   : > { %4451 = vmatpush.msra.mxu1 %v8390_v48  ;;  %4372 = vmatpush.msra.mxu3 %v9455_v30 }
 0x49e   : > { %4410 = vmatpush.msra.mxu0 %v8380_v45  ;;  %v9456_v45 = vld [vmem:[#allocation39_spill] sm:$0xff]  ;;  %4494 = vmatpush.msrb.mxu2 %v9457_v0 }
 0x49f   : > { %4452 = vmatpush.msra.mxu1 %v9456_v45  ;;  %4373 = vmatpush.msra.mxu3 %v9459_v44 }
 0x4a0   : > { %4411 = vmatpush.msra.mxu0 %v9454_v41  ;;  %v9472_v41 = vld [vmem:[#allocation25_spill] sm:$0xff] }
 0x4a2   : > { %4412 = vmatpush.msra.mxu0 %v8427_v40  ;;  %v9460_v40 = vld [vmem:[#allocation44_spill] sm:$0xff] }
 0x4a3   : > { %4495 = vmatpush.msrb.mxu2 %v9460_v40 }
 0x4a4   : > { %4413 = vmatpush.msra.mxu0 %v8453_v38  ;;  %v6062_v38 = vld [vmem:[%s9354_s2 + $0x1f8] sm:$0xff] }
 0x4a5   : > { %4496 = vmatpush.msrb.mxu2 %v8475_v6 }
 0x4a6   : > { %4414 = vmatpush.msra.mxu0 %v8465_v59 }
 0x4ac   : > { %v4030_v43 = vpop.xlane.xlu0 %4029 }
 0x4ad   : > { %v4066_v27 = vsub.f32 %v7972_v16, %v4030_v43  ;;  %v4067_v7 = vsub.f32 %v7969_v14, %v4030_v43  ;;  %v4068_v2 = vsub.f32 %v7975_v46, %v4030_v43  ;;  %v4069_v5 = vsub.f32 %v7980_v58, %v4030_v43 }
 0x4af   : > { %v4098_v15 = vmul.f32 1.442695, %v4066_v27  ;;  %v4100_v33 = vmul.f32 1.442695, %v4067_v7  ;;  %v4102_v3 = vmul.f32 1.442695, %v4068_v2 }
 0x4b0   : > { %v4104_v16 = vmul.f32 1.442695, %v4069_v5  ;;  %v6067_v2 = vld [vmem:[%s9354_s2 + $0x1d0] sm:$0xff] }
 0x4b1   : > { %5933 = vpow2.f32 %v4098_v15 }
 0x4b2   : > { %5935 = vpow2.f32 %v4100_v33  ;;  %v6068_v33 = vld [vmem:[%s9354_s2 + $0x1c8] sm:$0xff] }
 0x4b3   : > { %5937 = vpow2.f32 %v4102_v3 }
 0x4b4   : > { %5939 = vpow2.f32 %v4104_v16  ;;  %v4035_v14 = vpop.xlane.xlu0 %4034  ;;  %v6069_v16 = vld [vmem:[%s9354_s2 + $0x1c0] sm:$0xff] }
 0x4b5   : > { %v4070_v46 = vsub.f32 %v7988_v39, %v4035_v14  ;;  %v4071_v58 = vsub.f32 %v7985_v61, %v4035_v14  ;;  %v4072_v23 = vsub.f32 %v7991_v63, %v4035_v14  ;;  %v4073_v51 = vsub.f32 %v9453_v10, %v4035_v14  ;;  %v9458_v63 = vld [vmem:[#allocation42_spill] sm:$0xff]  ;;  %v9469_v14 = vld [vmem:[#allocation23_spill] sm:$0xff]  ;;  %v9471_v10 = vld [vmem:[#allocation24_spill] sm:$0xff] }
 0x4b6   : > { %4453 = vmatpush.msra.mxu1 %v9458_v63 }
 0x4b7   : > { %v8542_v18 = vpop.eup %5933  ;;  %v4106_v52 = vmul.f32 1.442695, %v4070_v46  ;;  %v4108_v48 = vmul.f32 1.442695, %v4071_v58  ;;  %v4110_v24 = vmul.f32 1.442695, %v4072_v23 }
 0x4b8   : > { %v8546_v61 = vpop.eup %5935  ;;  %v4112_v39 = vmul.f32 1.442695, %v4073_v51  ;;  %4178 = vmatmul.f32.vlgmr.msrb.gmra.mxu3 %v8542_v18  ;;  %4454 = vmatpush.msra.mxu1 %v8458_v34  ;;  %v9470_v58 = vld [vmem:[#allocation22_spill] sm:$0xff] }
 0x4b9   : > { %v8550_v22 = vpop.eup %5937  ;;  %5941 = vpow2.f32 %v4106_v52  ;;  %4219 = vmatmul.f32.vlgmr.msrb.gmra.mxu0 %v8546_v61 }
 0x4ba   : > { %v8554_v32 = vpop.eup %5939  ;;  %5943 = vpow2.f32 %v4108_v48  ;;  %4260 = vmatmul.f32.vlgmr.msrb.gmra.mxu1 %v8550_v22  ;;  %4653 = vmatpush.msrb.mxu0 %v6062_v38 }
 0x4bb   : > { %5945 = vpow2.f32 %v4110_v24  ;;  %4301 = vmatmul.f32.vlgmr.msra.gmra.mxu2 %v8554_v32  ;;  %4455 = vmatpush.msra.mxu1 %v8470_v36  ;;  %v6063_v36 = vld [vmem:[%s9354_s2 + $0x1f0] sm:$0xff] }
 0x4bc   : > { %5947 = vpow2.f32 %v4112_v39  ;;  %v4040_v11 = vpop.xlane.xlu1 %4039  ;;  %4654 = vmatpush.msrb.mxu0 %v6063_v36 }
 0x4bd   : > { %v4074_v20 = vsub.f32 %v9461_v49, %v4040_v11  ;;  %v4075_v26 = vsub.f32 %v9462_v4, %v4040_v11  ;;  %v4076_v56 = vsub.f32 %v9463_v55, %v4040_v11  ;;  %v4077_v21 = vsub.f32 %v9464_v8, %v4040_v11  ;;  %4734 = vmatpush.msrb.mxu1 %v6062_v38  ;;  %v9473_v11 = vld [vmem:[#allocation27_spill] sm:$0xff] }
 0x4be   : > { %4655 = vmatpush.msrb.mxu0 %v6064_v17 }
 0x4bf   : > { %v8571_v34 = vpop.eup %5941  ;;  %v4114_v6 = vmul.f32 1.442695, %v4074_v20  ;;  %v4116_v25 = vmul.f32 1.442695, %v4075_v26  ;;  %v4118_v1 = vmul.f32 1.442695, %v4076_v56  ;;  %4735 = vmatpush.msrb.mxu1 %v6063_v36 }
 0x4c0   : > { %v8573_v9 = vpop.eup %5943  ;;  %v4120_v12 = vmul.f32 1.442695, %v4077_v21  ;;  %4181 = vmatmul.f32.gmra.mxu3 %v8571_v34  ;;  %4656 = vmatpush.msrb.mxu0 %v6065_v29  ;;  %v9474_v20 = vld [vmem:[#allocation26_spill] sm:$0xff]  ;;  %v9475_v26 = vld [vmem:[#allocation28_spill] sm:$0xff]  ;;  %v9476_v56 = vld [vmem:[#allocation29_spill] sm:$0xff] }
 0x4c1   : > { %v8579_v59 = vpop.eup %5945  ;;  %5949 = vpow2.f32 %v4114_v6  ;;  %4222 = vmatmul.f32.gmra.mxu0 %v8573_v9  ;;  %4736 = vmatpush.msrb.mxu1 %v6064_v17 }
 0x4c2   : > { %v8582_v35 = vpop.eup %5947  ;;  %5951 = vpow2.f32 %v4116_v25  ;;  %4263 = vmatmul.f32.gmra.mxu1 %v8579_v59  ;;  %4657 = vmatpush.msrb.mxu0 %v6066_v62 }
 0x4c3   : > { %5953 = vpow2.f32 %v4118_v1  ;;  %4304 = vmatmul.f32.gmra.mxu2 %v8582_v35  ;;  %4737 = vmatpush.msrb.mxu1 %v6065_v29  ;;  %v9477_v29 = vld [vmem:[#allocation31_spill] sm:$0xff] }
 0x4c4   : > { %5955 = vpow2.f32 %v4120_v12  ;;  %v4045_v60 = vpop.xlane.xlu1 %4044  ;;  %4658 = vmatpush.msrb.mxu0 %v6067_v2 }
 0x4c5   : > { %v4078_v28 = vsub.f32 %v9465_v54, %v4045_v60  ;;  %v4079_v31 = vsub.f32 %v9466_v42, %v4045_v60  ;;  %v4080_v37 = vsub.f32 %v9467_v53, %v4045_v60  ;;  %v4081_v13 = vsub.f32 %v9468_v57, %v4045_v60  ;;  %4738 = vmatpush.msrb.mxu1 %v6066_v62 }
 0x4c6   : > { %4659 = vmatpush.msrb.mxu0 %v6068_v33 }
 0x4c7   : > { %v8599_v19 = vpop.eup %5949  ;;  %v4122_v50 = vmul.f32 1.442695, %v4078_v28  ;;  %v4124_v47 = vmul.f32 1.442695, %v4079_v31  ;;  %v4126_v43 = vmul.f32 1.442695, %v4080_v37  ;;  %4739 = vmatpush.msrb.mxu1 %v6067_v2 }
 0x4c8   : > { %v8601_v27 = vpop.eup %5951  ;;  %v4128_v7 = vmul.f32 1.442695, %v4081_v13  ;;  %4184 = vmatmul.f32.gmra.mxu3 %v8599_v19  ;;  %4660 = vmatpush.msrb.mxu0 %v6069_v16  ;;  %v9478_v28 = vld [vmem:[#allocation30_spill] sm:$0xff]  ;;  %v9479_v31 = vld [vmem:[#allocation32_spill] sm:$0xff]  ;;  %v9480_v37 = vld [vmem:[#allocation33_spill] sm:$0xff] }
 0x4c9   : > { %v8607_v5 = vpop.eup %5953  ;;  %5957 = vpow2.f32 %v4122_v50  ;;  %4225 = vmatmul.f32.gmra.mxu0 %v8601_v27  ;;  %4740 = vmatpush.msrb.mxu1 %v6068_v33 }
 0x4ca   : > { %v8610_v15 = vpop.eup %5955  ;;  %5959 = vpow2.f32 %v4124_v47  ;;  %4266 = vmatmul.f32.gmra.mxu1 %v8607_v5 }
 0x4cb   : > { %5961 = vpow2.f32 %v4126_v43  ;;  %4307 = vmatmul.f32.gmra.mxu2 %v8610_v15  ;;  %4741 = vmatpush.msrb.mxu1 %v6069_v16  ;;  %v9481_v16 = vld [vmem:[#allocation35_spill] sm:$0xff] }
 0x4cc   : > { %5963 = vpow2.f32 %v4128_v7  ;;  %v4050_v3 = vpop.xlane.xlu2 %4049 }
 0x4cd   : > { %v4082_v46 = vsub.f32 %v9469_v14, %v4050_v3  ;;  %v4083_v23 = vsub.f32 %v9470_v58, %v4050_v3  ;;  %v4084_v51 = vsub.f32 %v9471_v10, %v4050_v3  ;;  %v4085_v30 = vsub.f32 %v9472_v41, %v4050_v3 }
 0x4cf   : > { %v8624_v45 = vpop.eup %5957  ;;  %v4130_v52 = vmul.f32 1.442695, %v4082_v46  ;;  %v4132_v48 = vmul.f32 1.442695, %v4083_v23  ;;  %v4134_v24 = vmul.f32 1.442695, %v4084_v51 }
 0x4d0   : > { %v8626_v0 = vpop.eup %5959  ;;  %v4136_v39 = vmul.f32 1.442695, %v4085_v30  ;;  %4187 = vmatmul.f32.gmra.mxu3 %v8624_v45  ;;  %v9482_v46 = vld [vmem:[#allocation34_spill] sm:$0xff]  ;;  %v9483_v23 = vld [vmem:[#allocation36_spill] sm:$0xff]  ;;  %v9484_v51 = vld [vmem:[#allocation37_spill] sm:$0xff] }
 0x4d1   : > { %v8629_v63 = vpop.eup %5961  ;;  %5965 = vpow2.f32 %v4130_v52  ;;  %4228 = vmatmul.f32.gmra.mxu0 %v8626_v0  ;;  %v3847_v52 = vpop.f32.mrf.mxu3 }
 0x4d2   : > { %v8632_v44 = vpop.eup %5963  ;;  %5967 = vpow2.f32 %v4132_v48  ;;  %4269 = vmatmul.f32.gmra.mxu1 %v8629_v63 }
 0x4d3   : > { %5969 = vpow2.f32 %v4134_v24  ;;  %4310 = vmatmul.f32.gmra.mxu2 %v8632_v44 }
 0x4d4   : > { %5971 = vpow2.f32 %v4136_v39  ;;  %v4055_v40 = vpop.xlane.xlu2 %4054 }
 0x4d5   : > { %v4086_v49 = vsub.f32 %v9473_v11, %v4055_v40  ;;  %v4087_v4 = vsub.f32 %v9474_v20, %v4055_v40  ;;  %v4088_v55 = vsub.f32 %v9475_v26, %v4055_v40  ;;  %v4089_v8 = vsub.f32 %v9476_v56, %v4055_v40  ;;  %v3888_v11 = vpop.f32.mrf.mxu0 }
 0x4d7   : > { %v8640_v21 = vpop.eup %5965  ;;  %v4138_v38 = vmul.f32 1.442695, %v4086_v49  ;;  %v4140_v6 = vmul.f32 1.442695, %v4087_v4  ;;  %v4142_v25 = vmul.f32 1.442695, %v4088_v55  ;;  %v3929_v4 = vpop.f32.mrf.mxu1 }
 0x4d8   : > { %v8642_v1 = vpop.eup %5967  ;;  %v4144_v12 = vmul.f32 1.442695, %v4089_v8  ;;  %4190 = vmatmul.f32.gmra.mxu3 %v8640_v21  ;;  %v3970_v55 = vpop.f32.mrf.mxu2 }
 0x4d9   : > { %v8645_v36 = vpop.eup %5969  ;;  %5973 = vpow2.f32 %v4138_v38  ;;  %4231 = vmatmul.f32.gmra.mxu0 %v8642_v1 }
 0x4da   : > { %v8648_v17 = vpop.eup %5971  ;;  %5975 = vpow2.f32 %v4140_v6  ;;  %4272 = vmatmul.f32.gmra.mxu1 %v8645_v36  ;;  %v3850_v6 = vpop.f32.mrf.mxu3 }
 0x4db   : > { %5977 = vpow2.f32 %v4142_v25  ;;  %4313 = vmatmul.f32.gmra.mxu2 %v8648_v17 }
 0x4dc   : > { %5979 = vpow2.f32 %v4144_v12  ;;  %v4060_v60 = vpop.xlane.xlu0 %4059 }
 0x4dd   : > { %v4090_v54 = vsub.f32 %v9477_v29, %v4060_v60  ;;  %v4091_v42 = vsub.f32 %v9478_v28, %v4060_v60  ;;  %v4092_v53 = vsub.f32 %v9479_v31, %v4060_v60  ;;  %v4093_v57 = vsub.f32 %v9480_v37, %v4060_v60  ;;  %v3891_v12 = vpop.f32.mrf.mxu0 }
 0x4de   : > { %v4327_v28 = vmul.f32 %v8546_v61, %v3888_v11  ;;  %v4329_v31 = vmul.f32 %v8554_v32, %v3970_v55 }
 0x4df   : > { %v8656_v13 = vpop.eup %5973  ;;  %v4146_v62 = vmul.f32 1.442695, %v4090_v54  ;;  %v4148_v50 = vmul.f32 1.442695, %v4091_v42  ;;  %v4150_v47 = vmul.f32 1.442695, %v4092_v53  ;;  %v3932_v60 = vpop.f32.mrf.mxu1  ;;  %v4326_v54 = vmul.f32 %v8542_v18, %v3847_v52 }
 0x4e0   : > { %v8658_v43 = vpop.eup %5975  ;;  %v4152_v7 = vmul.f32 1.442695, %v4093_v57  ;;  %4193 = vmatmul.f32.gmra.mxu3 %v8656_v13  ;;  %v3973_v29 = vpop.f32.mrf.mxu2  ;;  %v4328_v42 = vmul.f32 %v8550_v22, %v3929_v4  ;;  %v4332_v18 = vmul.f32 %v8579_v59, %v3932_v60 }
 0x4e1   : > { %v8661_v2 = vpop.eup %5977  ;;  %5981 = vpow2.f32 %v4146_v62  ;;  %4234 = vmatmul.f32.gmra.mxu0 %v8658_v43  ;;  %v4333_v61 = vmul.f32 %v8582_v35, %v3973_v29 }
 0x4e2   : > { %v8664_v33 = vpop.eup %5979  ;;  %5983 = vpow2.f32 %v4148_v50  ;;  %4275 = vmatmul.f32.gmra.mxu1 %v8661_v2  ;;  %v3853_v53 = vpop.f32.mrf.mxu3  ;;  %v4330_v50 = vmul.f32 %v8571_v34, %v3850_v6 }
 0x4e3   : > { %5985 = vpow2.f32 %v4150_v47  ;;  %4316 = vmatmul.f32.gmra.mxu2 %v8664_v33  ;;  %v4331_v47 = vmul.f32 %v8573_v9, %v3891_v12  ;;  %v4544_v12 = vld [vmem:[%s9354_s2 + $0xf0] sm:$0xff] }
 0x4e4   : > { %5987 = vpow2.f32 %v4152_v7  ;;  %v4065_v3 = vpop.xlane.xlu1 %4064  ;;  %v4334_v7 = vmul.f32 %v8599_v19, %v3853_v53 }
 0x4e5   : > { %v4094_v14 = vsub.f32 %v9481_v16, %v4065_v3  ;;  %v4095_v58 = vsub.f32 %v9482_v46, %v4065_v3  ;;  %v4096_v10 = vsub.f32 %v9483_v23, %v4065_v3  ;;  %v4097_v41 = vsub.f32 %v9484_v51, %v4065_v3  ;;  %v3894_v37 = vpop.f32.mrf.mxu0 }
 0x4e6   : > { %v4335_v16 = vmul.f32 %v8601_v27, %v3894_v37 }
 0x4e7   : > { %v8672_v30 = vpop.eup %5981  ;;  %v4154_v48 = vmul.f32 1.442695, %v4094_v14  ;;  %v4156_v24 = vmul.f32 1.442695, %v4095_v58  ;;  %v4158_v39 = vmul.f32 1.442695, %v4096_v10  ;;  %v3935_v57 = vpop.f32.mrf.mxu1 }
 0x4e8   : > { %v8674_v40 = vpop.eup %5983  ;;  %v4160_v49 = vmul.f32 1.442695, %v4097_v41  ;;  %4196 = vmatmul.f32.gmra.mxu3 %v8672_v30  ;;  %v3976_v62 = vpop.f32.mrf.mxu2  ;;  %v4336_v34 = vmul.f32 %v8607_v5, %v3935_v57  ;;  %v4541_v57 = vld [vmem:[%s9354_s2 + $0xd8] sm:$0xff] }
 0x4e9   : > { %v8677_v20 = vpop.eup %5985  ;;  %5989 = vpow2.f32 %v4154_v48  ;;  %4237 = vmatmul.f32.gmra.mxu0 %v8674_v40  ;;  %v4337_v9 = vmul.f32 %v8610_v15, %v3976_v62 }
 0x4ea   : > { %v8680_v26 = vpop.eup %5987  ;;  %5991 = vpow2.f32 %v4156_v24  ;;  %4278 = vmatmul.f32.gmra.mxu1 %v8677_v20  ;;  %v3856_v22 = vpop.f32.mrf.mxu3 }
 0x4eb   : > { %5993 = vpow2.f32 %v4158_v39  ;;  %4319 = vmatmul.f32.gmra.mxu2 %v8680_v26  ;;  %v4338_v59 = vmul.f32 %v8624_v45, %v3856_v22 }
 0x4ec   : > { %5995 = vpow2.f32 %v4160_v49 }
 0x4ed   : > { %v3897_v32 = vpop.f32.mrf.mxu0 }
 0x4ee   : > { %v4339_v46 = vmul.f32 %v8626_v0, %v3897_v32 }
 0x4ef   : > { %v8684_v56 = vpop.eup %5989  ;;  %v3938_v3 = vpop.f32.mrf.mxu1 }
 0x4f0   : > { %v8686_v8 = vpop.eup %5991  ;;  %4199 = vmatmul.f32.gmra.mxu3 %v8684_v56  ;;  %v3979_v14 = vpop.f32.mrf.mxu2  ;;  %v4340_v19 = vmul.f32 %v8629_v63, %v3938_v3 }
 0x4f1   : > { %v8689_v38 = vpop.eup %5993  ;;  %4240 = vmatmul.f32.gmra.mxu0 %v8686_v8  ;;  %v4341_v27 = vmul.f32 %v8632_v44, %v3979_v14 }
 0x4f2   : > { %v8692_v25 = vpop.eup %5995  ;;  %4281 = vmatmul.f32.gmra.mxu1 %v8689_v38  ;;  %v3859_v35 = vpop.f32.mrf.mxu3 }
 0x4f3   : > { %4322 = vmatmul.f32.gmra.mxu2 %v8692_v25  ;;  %v4342_v5 = vmul.f32 %v8640_v21, %v3859_v35  ;;  %v4538_v35 = vld [vmem:[%s9354_s2 + $0xc0] sm:$0xff] }
 0x4f5   : > { %v3900_v58 = vpop.f32.mrf.mxu0 }
 0x4f6   : > { %v4343_v15 = vmul.f32 %v8642_v1, %v3900_v58 }
 0x4f7   : > { %v3941_v23 = vpop.f32.mrf.mxu1 }
 0x4f8   : > { %4374 = vmatmul.f32.vlgmr.msra.gmra.mxu3 %v4326_v54  ;;  %v3982_v10 = vpop.f32.mrf.mxu2  ;;  %v4344_v45 = vmul.f32 %v8645_v36, %v3941_v23 }
 0x4f9   : > { %4415 = vmatmul.f32.vlgmr.msra.gmra.mxu0 %v4327_v28  ;;  %v4345_v0 = vmul.f32 %v8648_v17, %v3982_v10 }
 0x4fa   : > { %4456 = vmatmul.f32.vlgmr.msra.gmra.mxu1 %v4328_v42  ;;  %v3862_v51 = vpop.f32.mrf.mxu3 }
 0x4fb   : > { %4497 = vmatmul.f32.vlgmr.msrb.gmra.mxu2 %v4329_v31  ;;  %v4346_v44 = vmul.f32 %v8656_v13, %v3862_v51 }
 0x4fd   : > { %v3903_v41 = vpop.f32.mrf.mxu0 }
 0x4fe   : > { %v4347_v48 = vmul.f32 %v8658_v43, %v3903_v41 }
 0x4ff   : > { %v3944_v63 = vpop.f32.mrf.mxu1 }
 0x500   : > { %4377 = vmatmul.f32.gmra.mxu3 %v4330_v50  ;;  %v3985_v52 = vpop.f32.mrf.mxu2  ;;  %v4348_v21 = vmul.f32 %v8661_v2, %v3944_v63  ;;  %v4545_v2 = vld [vmem:[%s9354_s2 + $0xf8] sm:$0xff] }
 0x501   : > { %4418 = vmatmul.f32.gmra.mxu0 %v4331_v47  ;;  %v4349_v1 = vmul.f32 %v8664_v33, %v3985_v52  ;;  %4578 = vmatpush.msrb.mxu3 %v4545_v2 }
 0x502   : > { %4459 = vmatmul.f32.gmra.mxu1 %v4332_v18  ;;  %v3865_v36 = vpop.f32.mrf.mxu3 }
 0x503   : > { %4500 = vmatmul.f32.gmra.mxu2 %v4333_v61  ;;  %v4350_v11 = vmul.f32 %v8672_v30, %v3865_v36  ;;  %4579 = vmatpush.msrb.mxu3 %v4544_v12  ;;  %v4540_v61 = vld [vmem:[%s9354_s2 + $0xd0] sm:$0xff] }
 0x505   : > { %v3906_v24 = vpop.f32.mrf.mxu0 }
 0x506   : > { %v4351_v49 = vmul.f32 %v8674_v40, %v3906_v24 }
 0x507   : > { %v3947_v17 = vpop.f32.mrf.mxu1 }
 0x508   : > { %4380 = vmatmul.f32.gmra.mxu3 %v4334_v7  ;;  %v3988_v39 = vpop.f32.mrf.mxu2  ;;  %v4352_v13 = vmul.f32 %v8677_v20, %v3947_v17 }
 0x509   : > { %4421 = vmatmul.f32.gmra.mxu0 %v4335_v16  ;;  %v4353_v43 = vmul.f32 %v8680_v26, %v3988_v39  ;;  %v4539_v16 = vld [vmem:[%s9354_s2 + $0xc8] sm:$0xff] }
 0x50a   : > { %4462 = vmatmul.f32.gmra.mxu1 %v4336_v34  ;;  %v3868_v33 = vpop.f32.mrf.mxu3 }
 0x50b   : > { %4503 = vmatmul.f32.gmra.mxu2 %v4337_v9  ;;  %v4354_v55 = vmul.f32 %v8684_v56, %v3868_v33  ;;  %v4543_v56 = vld [vmem:[%s9354_s2 + $0xe8] sm:$0xff] }
 0x50c   : > { %4580 = vmatpush.msrb.mxu3 %v4543_v56 }
 0x50d   : > { %v3909_v4 = vpop.f32.mrf.mxu0 }
 0x50e   : > { %v4355_v40 = vmul.f32 %v8686_v8, %v3909_v4 }
 0x50f   : > { %v3950_v30 = vpop.f32.mrf.mxu1 }
 0x510   : > { %4383 = vmatmul.f32.gmra.mxu3 %v4338_v59  ;;  %v3991_v6 = vpop.f32.mrf.mxu2  ;;  %v4356_v20 = vmul.f32 %v8689_v38, %v3950_v30 }
 0x511   : > { %4424 = vmatmul.f32.gmra.mxu0 %v4339_v46  ;;  %v4357_v26 = vmul.f32 %v8692_v25, %v3991_v6  ;;  %v4542_v25 = vld [vmem:[%s9354_s2 + $0xe0] sm:$0xff] }
 0x512   : > { %4465 = vmatmul.f32.gmra.mxu1 %v4340_v19  ;;  %4581 = vmatpush.msrb.mxu3 %v4542_v25 }
 0x513   : > { %4506 = vmatmul.f32.gmra.mxu2 %v4341_v27 }
 0x514   : > { %4582 = vmatpush.msrb.mxu3 %v4541_v57 }
 0x516   : > { %4583 = vmatpush.msrb.mxu3 %v4540_v61 }
 0x518   : > { %4386 = vmatmul.f32.gmra.mxu3 %v4342_v5 }
 0x519   : > { %4427 = vmatmul.f32.gmra.mxu0 %v4343_v15  ;;  %4584 = vmatpush.msrb.mxu3 %v4539_v16 }
 0x51a   : > { %4468 = vmatmul.f32.gmra.mxu1 %v4344_v45 }
 0x51b   : > { %4509 = vmatmul.f32.gmra.mxu2 %v4345_v0  ;;  %4585 = vmatpush.msrb.mxu3 %v4538_v35 }
 0x520   : > { %4389 = vmatmul.f32.gmra.mxu3 %v4346_v44 }
 0x521   : > { %4430 = vmatmul.f32.gmra.mxu0 %v4347_v48 }
 0x522   : > { %4471 = vmatmul.f32.gmra.mxu1 %v4348_v21 }
 0x523   : > { %4512 = vmatmul.f32.gmra.mxu2 %v4349_v1 }
 0x528   : > { %4392 = vmatmul.f32.gmra.mxu3 %v4350_v11 }
 0x529   : > { %4433 = vmatmul.f32.gmra.mxu0 %v4351_v49 }
 0x52a   : > { %4474 = vmatmul.f32.gmra.mxu1 %v4352_v13 }
 0x52b   : > { %4515 = vmatmul.f32.gmra.mxu2 %v4353_v43 }
 0x530   : > { %4395 = vmatmul.f32.gmra.mxu3 %v4354_v55 }
 0x531   : > { %4436 = vmatmul.f32.gmra.mxu0 %v4355_v40 }
 0x532   : > { %4477 = vmatmul.f32.gmra.mxu1 %v4356_v20 }
 0x533   : > { %4518 = vmatmul.f32.gmra.mxu2 %v4357_v26 }
 0x536   : > { %v4220_v60 = vpop.f32.mrf.mxu0 }
 0x537   : > { %v4261_v29 = vpop.f32.mrf.mxu1 }
 0x53b   : > { %v4179_v8 = vpop.f32.mrf.mxu3 }
 0x53c   : > { %v4221_v15 = vadd.f32 %v4220_v60, %v4179_v8 }
 0x53e   : > { %v4302_v54 = vpop.f32.mrf.mxu2  ;;  %v4223_v38 = vpop.f32.mrf.mxu0  ;;  %v4262_v51 = vadd.f32 %v4261_v29, %v4221_v15 }
 0x53f   : > { %v4264_v28 = vpop.f32.mrf.mxu1 }
 0x540   : > { %v4303_v52 = vadd.f32 %v4302_v54, %v4262_v51 }
 0x542   : > { %5997 = vrcp.f32 %v4303_v52 }
 0x543   : > { %v4182_v42 = vpop.f32.mrf.mxu3 }
 0x544   : > { %v4224_v44 = vadd.f32 %v4223_v38, %v4182_v42 }
 0x546   : > { %v4305_v31 = vpop.f32.mrf.mxu2  ;;  %v4226_v53 = vpop.f32.mrf.mxu0  ;;  %v4265_v21 = vadd.f32 %v4264_v28, %v4224_v44 }
 0x547   : > { %v4267_v37 = vpop.f32.mrf.mxu1 }
 0x548   : > { %v4306_v11 = vadd.f32 %v4305_v31, %v4265_v21  ;;  %v5998_v2 = vpop.eup %5997 }
 0x54a   : > { %5999 = vrcp.f32 %v4306_v11 }
 0x54b   : > { %v4185_v62 = vpop.f32.mrf.mxu3 }
 0x54c   : > { %v4227_v49 = vadd.f32 %v4226_v53, %v4185_v62 }
 0x54e   : > { %v4308_v50 = vpop.f32.mrf.mxu2  ;;  %v4229_v47 = vpop.f32.mrf.mxu0  ;;  %v4268_v4 = vadd.f32 %v4267_v37, %v4227_v49 }
 0x54f   : > { %v4270_v18 = vpop.f32.mrf.mxu1 }
 0x550   : > { %v4309_v26 = vadd.f32 %v4308_v50, %v4268_v4  ;;  %v6000_v56 = vpop.eup %5999 }
 0x552   : > { %6001 = vrcp.f32 %v4309_v26 }
 0x553   : > { %v4188_v22 = vpop.f32.mrf.mxu3 }
 0x554   : > { %v4230_v12 = vadd.f32 %v4229_v47, %v4188_v22 }
 0x556   : > { %v4311_v32 = vpop.f32.mrf.mxu2  ;;  %v4232_v7 = vpop.f32.mrf.mxu0  ;;  %v4271_v54 = vadd.f32 %v4270_v18, %v4230_v12 }
 0x557   : > { %v8746_v3 = vpop.f32.mrf.mxu1 }
 0x558   : > { %v4312_v53 = vadd.f32 %v4311_v32, %v4271_v54  ;;  %v6002_v61 = vpop.eup %6001 }
 0x55a   : > { %6003 = vrcp.f32 %v4312_v53  ;;  %v9486_v53 = vld [vmem:[#allocation6_spill] sm:$0xff] }
 0x55b   : > { %v4191_v14 = vpop.f32.mrf.mxu3 }
 0x55c   : > { %v4233_v37 = vadd.f32 %v4232_v7, %v4191_v14 }
 0x55e   : > { %v8751_v34 = vpop.f32.mrf.mxu2  ;;  %v8753_v9 = vpop.f32.mrf.mxu0  ;;  %v4274_v47 = vadd.f32 %v8746_v3, %v4233_v37 }
 0x55f   : > { %v8755_v59 = vpop.f32.mrf.mxu1 }
 0x560   : > { %v4315_v51 = vadd.f32 %v8751_v34, %v4274_v47  ;;  %v9488_v47 = vld [vmem:[#allocation8_spill] sm:$0xff] }
 0x562   : > { %6005 = vrcp.f32 %v4315_v51  ;;  %v9490_v51 = vld [vmem:[#allocation10_spill] sm:$0xff] }
 0x563   : > { %v8760_v46 = vpop.f32.mrf.mxu3 }
 0x564   : > { %v4236_v32 = vadd.f32 %v8753_v9, %v8760_v46 }
 0x566   : > { %v8762_v58 = vpop.f32.mrf.mxu2  ;;  %v8764_v19 = vpop.f32.mrf.mxu0  ;;  %v4277_v44 = vadd.f32 %v8755_v59, %v4236_v32 }
 0x567   : > { %v8766_v23 = vpop.f32.mrf.mxu1 }
 0x56b   : > { %v8768_v27 = vpop.f32.mrf.mxu3 }
 0x56c   : > { %v4239_v34 = vadd.f32 %v8764_v19, %v8768_v27 }
 0x56e   : > { %v8770_v10 = vpop.f32.mrf.mxu2  ;;  %v8772_v5 = vpop.f32.mrf.mxu0  ;;  %v4280_v11 = vadd.f32 %v8766_v23, %v4239_v34 }
 0x56f   : > { %v8774_v45 = vpop.f32.mrf.mxu1 }
 0x573   : > { %v8776_v0 = vpop.f32.mrf.mxu3 }
 0x576   : > { %v8778_v41 = vpop.f32.mrf.mxu2  ;;  %v4416_v63 = vpop.f32.mrf.mxu0 }
 0x577   : > { %v4457_v48 = vpop.f32.mrf.mxu1 }
 0x57b   : > { %v4375_v1 = vpop.f32.mrf.mxu3 }
 0x57c   : > { %v4417_v36 = vadd.f32 %v4416_v63, %v4375_v1  ;;  %v6004_v63 = vpop.eup %6003 }
 0x57d   : > { %v6006_v46 = vpop.eup %6005 }
 0x57e   : > { %v4458_v24 = vadd.f32 %v4457_v48, %v4417_v36  ;;  %v4498_v17 = vpop.f32.mrf.mxu2  ;;  %v4419_v39 = vpop.f32.mrf.mxu0  ;;  %v4318_v36 = vadd.f32 %v8762_v58, %v4277_v44  ;;  %v4242_v58 = vadd.f32 %v8772_v5, %v8776_v0  ;;  %v9492_v44 = vld [vmem:[#allocation12_spill] sm:$0xff] }
 0x57f   : > { %v4460_v13 = vpop.f32.mrf.mxu1 }
 0x580   : > { %v4499_v43 = vadd.f32 %v4498_v17, %v4458_v24  ;;  %6007 = vrcp.f32 %v4318_v36 }
 0x582   : > { %v4530_v33 = vmul.f32 %v5998_v2, %v4499_v43  ;;  %v4321_v2 = vadd.f32 %v8770_v10, %v4280_v11 }
 0x583   : > { %v4378_v55 = vpop.f32.mrf.mxu3 }
 0x584   : > { %v4420_v30 = vadd.f32 %v4419_v39, %v4378_v55  ;;  %5786 = vmatmul.msk.f32.vlgmr.msrb.gmra.mxu3 %vm2878_vm1, %v4530_v33  ;;  %6009 = vrcp.f32 %v4321_v2  ;;  %v4283_v55 = vadd.f32 %v8774_v45, %v4242_v58 }
 0x586   : > { %v4461_v40 = vadd.f32 %v4460_v13, %v4420_v30  ;;  %v4501_v6 = vpop.f32.mrf.mxu2  ;;  %v4422_v20 = vpop.f32.mrf.mxu0  ;;  %v4324_v26 = vadd.f32 %v8778_v41, %v4283_v55 }
 0x587   : > { %v4463_v60 = vpop.f32.mrf.mxu1  ;;  %v6008_v27 = vpop.eup %6007 }
 0x588   : > { %v4502_v29 = vadd.f32 %v4501_v6, %v4461_v40  ;;  %6011 = vrcp.f32 %v4324_v26 }
 0x58a   : > { %v4531_v8 = vmul.f32 %v6000_v56, %v4502_v29  ;;  %v6010_v12 = vpop.eup %6009 }
 0x58b   : > { %v4381_v38 = vpop.f32.mrf.mxu3 }
 0x58c   : > { %v4423_v28 = vadd.f32 %v4422_v20, %v4381_v38  ;;  %5787 = vmatmul.msk.f32.gmra.mxu3 %vm2878_vm1, %v4531_v8 }
 0x58e   : > { %v4464_v25 = vadd.f32 %v4463_v60, %v4423_v28  ;;  %v4504_v42 = vpop.f32.mrf.mxu2  ;;  %v4425_v31 = vpop.f32.mrf.mxu0 }
 0x58f   : > { %v4466_v57 = vpop.f32.mrf.mxu1  ;;  %v6012_v38 = vpop.eup %6011 }
 0x590   : > { %v4505_v62 = vadd.f32 %v4504_v42, %v4464_v25  ;;  %v9485_v42 = vld [vmem:[#allocation5_spill] sm:$0xff] }
 0x592   : > { %v4532_v50 = vmul.f32 %v6002_v61, %v4505_v62  ;;  %v9487_v62 = vld [vmem:[#allocation7_spill] sm:$0xff] }
 0x593   : > { %v4384_v22 = vpop.f32.mrf.mxu3 }
 0x594   : > { %v4426_v16 = vadd.f32 %v4425_v31, %v4384_v22  ;;  %5788 = vmatmul.msk.f32.gmra.mxu3 %vm2878_vm1, %v4532_v50 }
 0x596   : > { %v4467_v18 = vadd.f32 %v4466_v57, %v4426_v16  ;;  %v4507_v35 = vpop.f32.mrf.mxu2  ;;  %v4428_v15 = vpop.f32.mrf.mxu0 }
 0x597   : > { %v4469_v7 = vpop.f32.mrf.mxu1 }
 0x598   : > { %v4508_v14 = vadd.f32 %v4507_v35, %v4467_v18  ;;  %v9489_v18 = vld [vmem:[#allocation9_spill] sm:$0xff] }
 0x59a   : > { %v4533_v52 = vmul.f32 %v6004_v63, %v4508_v14  ;;  %v9491_v14 = vld [vmem:[#allocation11_spill] sm:$0xff] }
 0x59b   : > { %v4387_v3 = vpop.f32.mrf.mxu3 }
 0x59c   : > { %v4429_v48 = vadd.f32 %v4428_v15, %v4387_v3  ;;  %5789 = vmatmul.msk.f32.gmra.mxu3 %vm2878_vm1, %v4533_v52 }
 0x59e   : > { %v4470_v21 = vadd.f32 %v4469_v7, %v4429_v48  ;;  %v4510_v1 = vpop.f32.mrf.mxu2  ;;  %v4431_v24 = vpop.f32.mrf.mxu0 }
 0x59f   : > { %v4472_v17 = vpop.f32.mrf.mxu1 }
 0x5a0   : > { %v4511_v9 = vadd.f32 %v4510_v1, %v4470_v21 }
 0x5a2   : > { %v4534_v39 = vmul.f32 %v6006_v46, %v4511_v9 }
 0x5a3   : > { %v4390_v59 = vpop.f32.mrf.mxu3 }
 0x5a4   : > { %v4432_v49 = vadd.f32 %v4431_v24, %v4390_v59  ;;  %5790 = vmatmul.msk.f32.gmra.mxu3 %vm2878_vm1, %v4534_v39 }
 0x5a6   : > { %v4473_v13 = vadd.f32 %v4472_v17, %v4432_v49  ;;  %v4513_v43 = vpop.f32.mrf.mxu2  ;;  %v4434_v33 = vpop.f32.mrf.mxu0  ;;  %v4955_v49 = vld [vmem:[%s9354_s2 + $0x178] sm:$0xff] }
 0x5a7   : > { %v4475_v30 = vpop.f32.mrf.mxu1  ;;  %4966 = vmatpush.msra.mxu3 %v4955_v49 }
 0x5a8   : > { %v4514_v19 = vadd.f32 %v4513_v43, %v4473_v13  ;;  %v4954_v13 = vld [vmem:[%s9354_s2 + $0x170] sm:$0xff]  ;;  %v4953_v43 = vld [vmem:[%s9354_s2 + $0x168] sm:$0xff] }
 0x5a9   : > { %4967 = vmatpush.msra.mxu3 %v4954_v13 }
 0x5aa   : > { %v4535_v4 = vmul.f32 %v6008_v27, %v4514_v19  ;;  %v4952_v19 = vld [vmem:[%s9354_s2 + $0x160] sm:$0xff] }
 0x5ab   : > { %v4393_v23 = vpop.f32.mrf.mxu3  ;;  %4968 = vmatpush.msra.mxu3 %v4953_v43 }
 0x5ac   : > { %v4435_v40 = vadd.f32 %v4434_v33, %v4393_v23  ;;  %5791 = vmatmul.msk.f32.gmra.mxu3 %vm2878_vm1, %v4535_v4  ;;  %v4951_v33 = vld [vmem:[%s9354_s2 + $0x158] sm:$0xff] }
 0x5ad   : > { %4969 = vmatpush.msra.mxu3 %v4952_v19 }
 0x5ae   : > { %v4476_v6 = vadd.f32 %v4475_v30, %v4435_v40  ;;  %v4516_v20 = vpop.f32.mrf.mxu2  ;;  %v4437_v5 = vpop.f32.mrf.mxu0 }
 0x5af   : > { %v4478_v56 = vpop.f32.mrf.mxu1  ;;  %4970 = vmatpush.msra.mxu3 %v4951_v33 }
 0x5b0   : > { %v4517_v10 = vadd.f32 %v4516_v20, %v4476_v6 }
 0x5b2   : > { %v4536_v60 = vmul.f32 %v6010_v12, %v4517_v10  ;;  %v4880_v12 = vld [vmem:[%s9354_s2 + $0x138] sm:$0xff] }
 0x5b3   : > { %v4396_v0 = vpop.f32.mrf.mxu3  ;;  %4915 = vmatpush.msra.mxu2 %v4880_v12 }
 0x5b4   : > { %v4438_v29 = vadd.f32 %v4437_v5, %v4396_v0  ;;  %5792 = vmatmul.msk.f32.gmra.mxu3 %vm2878_vm1, %v4536_v60  ;;  %v4879_v60 = vld [vmem:[%s9354_s2 + $0x130] sm:$0xff]  ;;  %v4878_v5 = vld [vmem:[%s9354_s2 + $0x128] sm:$0xff]  ;;  %v4877_v0 = vld [vmem:[%s9354_s2 + $0x120] sm:$0xff] }
 0x5b5   : > { %4916 = vmatpush.msra.mxu2 %v4879_v60 }
 0x5b6   : > { %v4479_v45 = vadd.f32 %v4478_v56, %v4438_v29  ;;  %v4519_v8 = vpop.f32.mrf.mxu2  ;;  %v4876_v29 = vld [vmem:[%s9354_s2 + $0x118] sm:$0xff]  ;;  %v4950_v56 = vld [vmem:[%s9354_s2 + $0x150] sm:$0xff] }
 0x5b7   : > { %4917 = vmatpush.msra.mxu2 %v4878_v5  ;;  %4971 = vmatpush.msra.mxu3 %v4950_v56 }
 0x5b8   : > { %v4520_v54 = vadd.f32 %v4519_v8, %v4479_v45  ;;  %v4875_v45 = vld [vmem:[%s9354_s2 + $0x110] sm:$0xff]  ;;  %v4949_v8 = vld [vmem:[%s9354_s2 + $0x148] sm:$0xff] }
 0x5b9   : > { %4918 = vmatpush.msra.mxu2 %v4877_v0  ;;  %4972 = vmatpush.msra.mxu3 %v4949_v8 }
 0x5ba   : > { %v4537_v28 = vmul.f32 %v6012_v38, %v4520_v54  ;;  %v4874_v54 = vld [vmem:[%s9354_s2 + $0x108] sm:$0xff]  ;;  %v4948_v38 = vld [vmem:[%s9354_s2 + $0x140] sm:$0xff] }
 0x5bb   : > { %4919 = vmatpush.msra.mxu2 %v4876_v29  ;;  %4973 = vmatpush.msra.mxu3 %v4948_v38 }
 0x5bc   : > { %5793 = vmatmul.msk.f32.gmra.mxu3 %vm2878_vm1, %v4537_v28  ;;  %v4873_v28 = vld [vmem:[%s9354_s2 + $0x100] sm:$0xff] }
 0x5bd   : > { %4920 = vmatpush.msra.mxu2 %v4875_v45 }
 0x5bf   : > { %4921 = vmatpush.msra.mxu2 %v4874_v54 }
 0x5c1   : > { %4922 = vmatpush.msra.mxu2 %v4873_v28 }
 0x607   : > { %v4587_v25 = vpop.f32.mrf.mxu3 }
 0x608   : > { %v8803_v41 = vadd.f32 %v4587_v25, %v9485_v42 }
 0x60a   : > { %5794 = vmatmul.msk.f32.vlgmr.msrb.gmra.mxu0 %vm2878_vm1, %v8803_v41 }
 0x60f   : > { %v4590_v31 = vpop.f32.mrf.mxu3 }
 0x610   : > { %v8808_v37 = vadd.f32 %v4590_v31, %v9486_v53 }
 0x612   : > { %5795 = vmatmul.msk.f32.gmra.mxu0 %vm2878_vm1, %v8808_v37 }
 0x617   : > { %v4593_v57 = vpop.f32.mrf.mxu3 }
 0x618   : > { %v8813_v61 = vadd.f32 %v4593_v57, %v9487_v62 }
 0x61a   : > { %5796 = vmatmul.msk.f32.gmra.mxu0 %vm2878_vm1, %v8813_v61 }
 0x61f   : > { %v4596_v50 = vpop.f32.mrf.mxu3 }
 0x620   : > { %v8818_v22 = vadd.f32 %v4596_v50, %v9488_v47 }
 0x622   : > { %5797 = vmatmul.msk.f32.gmra.mxu0 %vm2878_vm1, %v8818_v22 }
 0x627   : > { %v4599_v16 = vpop.f32.mrf.mxu3 }
 0x628   : > { %v8823_v35 = vadd.f32 %v4599_v16, %v9489_v18 }
 0x62a   : > { %5798 = vmatmul.msk.f32.gmra.mxu0 %vm2878_vm1, %v8823_v35 }
 0x62f   : > { %v4602_v15 = vpop.f32.mrf.mxu3 }
 0x630   : > { %v8828_v32 = vadd.f32 %v4602_v15, %v9490_v51 }
 0x632   : > { %5799 = vmatmul.msk.f32.gmra.mxu0 %vm2878_vm1, %v8828_v32 }
 0x637   : > { %v4605_v7 = vpop.f32.mrf.mxu3 }
 0x638   : > { %v8833_v63 = vadd.f32 %v4605_v7, %v9491_v14 }
 0x63a   : > { %5800 = vmatmul.msk.f32.gmra.mxu0 %vm2878_vm1, %v8833_v63 }
 0x63f   : > { %v4608_v52 = vpop.f32.mrf.mxu3 }
 0x640   : > { %v8838_v3 = vadd.f32 %v4608_v52, %v9492_v44  ;;  %v8941_v52 = vld [vmem:[%s9356_s4 + $0x2] ss:$0 sm:$0xff] }
 0x642   : > { %5801 = vmatmul.msk.f32.gmra.mxu0 %vm2878_vm1, %v8838_v3 }
 0x687   : > { %v4662_v48 = vpop.f32.mrf.mxu0 }
 0x688   : > { %v8843_v21 = vsub.f32 %v8803_v41, %v4662_v48 }
 0x68a   : > { %v4694_v1 = vmul.f32 %v8843_v21, %v8843_v21 }
 0x68c   : > { %5802 = vmatmul.msk.f32.vlgmr.msrb.gmra.mxu1 %vm2878_vm1, %v4694_v1 }
 0x68f   : > { %v4665_v36 = vpop.f32.mrf.mxu0 }
 0x690   : > { %v8849_v34 = vsub.f32 %v8808_v37, %v4665_v36  ;;  %v8947_v36 = vld [vmem:[%s9356_s4 + $0x3] ss:$0 sm:$0xff] }
 0x692   : > { %v4695_v24 = vmul.f32 %v8849_v34, %v8849_v34 }
 0x694   : > { %5803 = vmatmul.msk.f32.gmra.mxu1 %vm2878_vm1, %v4695_v24 }
 0x697   : > { %v4668_v9 = vpop.f32.mrf.mxu0 }
 0x698   : > { %v8855_v46 = vsub.f32 %v8813_v61, %v4668_v9 }
 0x69a   : > { %v4696_v17 = vmul.f32 %v8855_v46, %v8855_v46 }
 0x69c   : > { %5804 = vmatmul.msk.f32.gmra.mxu1 %vm2878_vm1, %v4696_v17 }
 0x69f   : > { %v4671_v39 = vpop.f32.mrf.mxu0 }
 0x6a0   : > { %v8861_v11 = vsub.f32 %v8818_v22, %v4671_v39 }
 0x6a2   : > { %v4697_v59 = vmul.f32 %v8861_v11, %v8861_v11 }
 0x6a4   : > { %5805 = vmatmul.msk.f32.gmra.mxu1 %vm2878_vm1, %v4697_v59 }
 0x6a7   : > { %v4674_v2 = vpop.f32.mrf.mxu0 }
 0x6a8   : > { %v8876_v58 = vsub.f32 %v8823_v35, %v4674_v2 }
 0x6aa   : > { %v4698_v27 = vmul.f32 %v8876_v58, %v8876_v58 }
 0x6ac   : > { %5806 = vmatmul.msk.f32.gmra.mxu1 %vm2878_vm1, %v4698_v27 }
 0x6af   : > { %v4677_v4 = vpop.f32.mrf.mxu0 }
 0x6b0   : > { %v8888_v55 = vsub.f32 %v8828_v32, %v4677_v4 }
 0x6b2   : > { %v4699_v30 = vmul.f32 %v8888_v55, %v8888_v55 }
 0x6b4   : > { %5807 = vmatmul.msk.f32.gmra.mxu1 %vm2878_vm1, %v4699_v30 }
 0x6b7   : > { %v4680_v23 = vpop.f32.mrf.mxu0 }
 0x6b8   : > { %v8894_v40 = vsub.f32 %v8833_v63, %v4680_v23 }
 0x6ba   : > { %v4700_v6 = vmul.f32 %v8894_v40, %v8894_v40 }
 0x6bc   : > { %5808 = vmatmul.msk.f32.gmra.mxu1 %vm2878_vm1, %v4700_v6 }
 0x6bf   : > { %v4683_v20 = vpop.f32.mrf.mxu0 }
 0x6c0   : > { %v8900_v26 = vsub.f32 %v8838_v3, %v4683_v20 }
 0x6c2   : > { %v4701_v10 = vmul.f32 %v8900_v26, %v8900_v26 }
 0x6c4   : > { %5809 = vmatmul.msk.f32.gmra.mxu1 %vm2878_vm1, %v4701_v10 }
 0x709   : > { %v4743_v25 = vpop.f32.mrf.mxu1 }
 0x70a   : > { %v4744_v42 = vadd.f32 1e-05, %v4743_v25 }
 0x70c   : > { %6013 = vrsqrt.f32 %v4744_v42  ;;  %vm4773_vm12 = vweird.f32 %v4744_v42 }
 0x711   : > { %v4746_v31 = vpop.f32.mrf.mxu1 }
 0x712   : > { %v6014_v53 = vpop.eup %6013  ;;  %v4747_v57 = vadd.f32 1e-05, %v4746_v31 }
 0x713   : > { %v4768_v62 = vmul.f32 %v6014_v53, %v4744_v42  ;;  %vm4774_vm14 = vweird.f32 %v6014_v53 }
 0x714   : > { %6015 = vrsqrt.f32 %v4747_v57  ;;  %vm4775_vm11 = vmor %vm4773_vm12, %vm4774_vm14  ;;  %vm4783_vm15 = vweird.f32 %v4747_v57 }
 0x715   : > { %v4769_v50 = vmul.f32 %v6014_v53, %v4768_v62 }
 0x717   : > { %v4770_v47 = vmul.f32 0.5, %v4769_v50 }
 0x719   : > { %v4771_v16 = vsub.f32 1.5, %v4770_v47  ;;  %v4749_v18 = vpop.f32.mrf.mxu1 }
 0x71a   : > { %v6016_v15 = vpop.eup %6015  ;;  %v4750_v51 = vadd.f32 1e-05, %v4749_v18 }
 0x71b   : > { %v4772_v7 = vmul.f32 %v6014_v53, %v4771_v16  ;;  %v4778_v14 = vmul.f32 %v6016_v15, %v4747_v57  ;;  %vm4784_vm13 = vweird.f32 %v6016_v15 }
 0x71c   : > { %6017 = vrsqrt.f32 %v4750_v51  ;;  %vm4785_vm0 = vmor %vm4783_vm15, %vm4784_vm13  ;;  %vm4793_vm2 = vweird.f32 %v4750_v51 }
 0x71d   : > { %v4776_v44 = vsel %vm4775_vm11, %v6014_v53, %v4772_v7  ;;  %v4779_v48 = vmul.f32 %v6016_v15, %v4778_v14 }
 0x71e   : > { %v4847_v1 = vmul.f32 %v4776_v44, %v8843_v21 }
 0x71f   : > { %v4780_v24 = vmul.f32 0.5, %v4779_v48 }
 0x720   : > { %v4856_v9 = vmul.f32 %v8941_v52, %v4847_v1 }
 0x721   : > { %v4781_v17 = vsub.f32 1.5, %v4780_v24  ;;  %v4752_v39 = vpop.f32.mrf.mxu1 }
 0x722   : > { %v6018_v59 = vpop.eup %6017  ;;  %v4865_v49 = vadd.f32 %v8947_v36, %v4856_v9  ;;  %v4753_v13 = vadd.f32 1e-05, %v4752_v39 }
 0x723   : > { %v4782_v43 = vmul.f32 %v6016_v15, %v4781_v17  ;;  %v4788_v2 = vmul.f32 %v6018_v59, %v4750_v51  ;;  %vm4794_vm10 = vweird.f32 %v6018_v59 }
 0x724   : > { %6019 = vrsqrt.f32 %v4753_v13  ;;  %5810 = vmatmul.msk.f32.vlgmr.msra.gmra.mxu2 %vm2878_vm1, %v4865_v49  ;;  %5818 = vmatmul.msk.f32.vlgmr.msra.gmra.mxu3 %vm2878_vm1, %v4865_v49  ;;  %vm4795_vm3 = vmor %vm4793_vm2, %vm4794_vm10  ;;  %vm4803_vm5 = vweird.f32 %v4753_v13 }
 0x725   : > { %v4786_v21 = vsel %vm4785_vm0, %v6016_v15, %v4782_v43  ;;  %v4789_v19 = vmul.f32 %v6018_v59, %v4788_v2 }
 0x726   : > { %v4848_v27 = vmul.f32 %v4786_v21, %v8849_v34 }
 0x727   : > { %v4790_v33 = vmul.f32 0.5, %v4789_v19 }
 0x728   : > { %v4857_v4 = vmul.f32 %v8941_v52, %v4848_v27 }
 0x729   : > { %v4791_v30 = vsub.f32 1.5, %v4790_v33  ;;  %v4755_v23 = vpop.f32.mrf.mxu1 }
 0x72a   : > { %v6020_v6 = vpop.eup %6019  ;;  %v4756_v20 = vadd.f32 1e-05, %v4755_v23  ;;  %v4866_v10 = vadd.f32 %v8947_v36, %v4857_v4 }
 0x72b   : > { %v4792_v12 = vmul.f32 %v6018_v59, %v4791_v30  ;;  %v4798_v60 = vmul.f32 %v6020_v6, %v4753_v13  ;;  %vm4804_vm4 = vweird.f32 %v6020_v6 }
 0x72c   : > { %6021 = vrsqrt.f32 %v4756_v20  ;;  %5811 = vmatmul.msk.f32.gmra.mxu2 %vm2878_vm1, %v4866_v10  ;;  %5819 = vmatmul.msk.f32.gmra.mxu3 %vm2878_vm1, %v4866_v10  ;;  %vm4805_vm6 = vmor %vm4803_vm5, %vm4804_vm4  ;;  %vm4813_vm8 = vweird.f32 %v4756_v20 }
 0x72d   : > { %v4796_v34 = vsel %vm4795_vm3, %v6018_v59, %v4792_v12  ;;  %v4799_v5 = vmul.f32 %v6020_v6, %v4798_v60 }
 0x72e   : > { %v4849_v0 = vmul.f32 %v4796_v34, %v8855_v46 }
 0x72f   : > { %v4800_v29 = vmul.f32 0.5, %v4799_v5 }
 0x730   : > { %v4858_v56 = vmul.f32 %v8941_v52, %v4849_v0 }
 0x731   : > { %v4801_v45 = vsub.f32 1.5, %v4800_v29  ;;  %v4758_v8 = vpop.f32.mrf.mxu1 }
 0x732   : > { %v6022_v54 = vpop.eup %6021  ;;  %v4759_v38 = vadd.f32 1e-05, %v4758_v8  ;;  %v4867_v28 = vadd.f32 %v8947_v36, %v4858_v56 }
 0x733   : > { %v4802_v25 = vmul.f32 %v6020_v6, %v4801_v45  ;;  %v4808_v42 = vmul.f32 %v6022_v54, %v4756_v20  ;;  %vm4814_vm7 = vweird.f32 %v6022_v54  ;;  %v8991_v45 = vld [vmem:[%s9356_s4 + $0x5] ss:$0 sm:$0xff] }
 0x734   : > { %6023 = vrsqrt.f32 %v4759_v38  ;;  %5812 = vmatmul.msk.f32.gmra.mxu2 %vm2878_vm1, %v4867_v28  ;;  %5820 = vmatmul.msk.f32.gmra.mxu3 %vm2878_vm1, %v4867_v28  ;;  %vm4815_vm9 = vmor %vm4813_vm8, %vm4814_vm7  ;;  %vm4823_vm12 = vweird.f32 %v4759_v38 }
 0x735   : > { %v4806_v46 = vsel %vm4805_vm6, %v6020_v6, %v4802_v25  ;;  %v4809_v31 = vmul.f32 %v6022_v54, %v4808_v42 }
 0x736   : > { %v4850_v53 = vmul.f32 %v4806_v46, %v8861_v11  ;;  %v5334_v46 = vld [vmem:[%s9354_s2 + $0x1b8] sm:$0xff] }
 0x737   : > { %v4810_v57 = vmul.f32 0.5, %v4809_v31  ;;  %5367 = vmatpush.msra.mxu0 %v5334_v46  ;;  %5852 = vmatpush.msrb.mxu2 %v5334_v46 }
 0x738   : > { %v4859_v62 = vmul.f32 %v8941_v52, %v4850_v53  ;;  %v5333_v53 = vld [vmem:[%s9354_s2 + $0x1b0] sm:$0xff] }
 0x739   : > { %v4811_v50 = vsub.f32 1.5, %v4810_v57  ;;  %v4761_v47 = vpop.f32.mrf.mxu1  ;;  %5368 = vmatpush.msra.mxu0 %v5333_v53  ;;  %5853 = vmatpush.msrb.mxu2 %v5333_v53 }
 0x73a   : > { %v6024_v16 = vpop.eup %6023  ;;  %v4762_v18 = vadd.f32 1e-05, %v4761_v47  ;;  %v4868_v15 = vadd.f32 %v8947_v36, %v4859_v62 }
 0x73b   : > { %v4812_v51 = vmul.f32 %v6022_v54, %v4811_v50  ;;  %v4818_v7 = vmul.f32 %v6024_v16, %v4759_v38  ;;  %vm4824_vm14 = vweird.f32 %v6024_v16 }
 0x73c   : > { %6025 = vrsqrt.f32 %v4762_v18  ;;  %5813 = vmatmul.msk.f32.gmra.mxu2 %vm2878_vm1, %v4868_v15  ;;  %5821 = vmatmul.msk.f32.gmra.mxu3 %vm2878_vm1, %v4868_v15  ;;  %vm4825_vm11 = vmor %vm4823_vm12, %vm4824_vm14  ;;  %vm4833_vm15 = vweird.f32 %v4762_v18 }
 0x73d   : > { %v4816_v11 = vsel %vm4815_vm9, %v6022_v54, %v4812_v51  ;;  %v4819_v14 = vmul.f32 %v6024_v16, %v4818_v7  ;;  %v5331_v7 = vld [vmem:[%s9354_s2 + $0x1a0] sm:$0xff] }
 0x73e   : > { %v4851_v44 = vmul.f32 %v4816_v11, %v8876_v58 }
 0x73f   : > { %v4820_v48 = vmul.f32 0.5, %v4819_v14 }
 0x740   : > { %v4860_v1 = vmul.f32 %v8941_v52, %v4851_v44 }
 0x741   : > { %v4821_v24 = vsub.f32 1.5, %v4820_v48  ;;  %v4764_v9 = vpop.f32.mrf.mxu1 }
 0x742   : > { %v6026_v17 = vpop.eup %6025  ;;  %v4765_v39 = vadd.f32 1e-05, %v4764_v9  ;;  %v4869_v59 = vadd.f32 %v8947_v36, %v4860_v1 }
 0x743   : > { %v4822_v49 = vmul.f32 %v6024_v16, %v4821_v24  ;;  %v4828_v13 = vmul.f32 %v6026_v17, %v4762_v18  ;;  %vm4834_vm13 = vweird.f32 %v6026_v17 }
 0x744   : > { %6027 = vrsqrt.f32 %v4765_v39  ;;  %5814 = vmatmul.msk.f32.gmra.mxu2 %vm2878_vm1, %v4869_v59  ;;  %5822 = vmatmul.msk.f32.gmra.mxu3 %vm2878_vm1, %v4869_v59  ;;  %vm4835_vm0 = vmor %vm4833_vm15, %vm4834_vm13  ;;  %vm4843_vm2 = vweird.f32 %v4765_v39 }
 0x745   : > { %v4826_v58 = vsel %vm4825_vm11, %v6024_v16, %v4822_v49  ;;  %v4829_v43 = vmul.f32 %v6026_v17, %v4828_v13  ;;  %v5332_v16 = vld [vmem:[%s9354_s2 + $0x1a8] sm:$0xff] }
 0x746   : > { %v4852_v2 = vmul.f32 %v4826_v58, %v8888_v55  ;;  %5369 = vmatpush.msra.mxu0 %v5332_v16  ;;  %5854 = vmatpush.msrb.mxu2 %v5332_v16 }
 0x747   : > { %v4830_v21 = vmul.f32 0.5, %v4829_v43 }
 0x748   : > { %v4861_v19 = vmul.f32 %v8941_v52, %v4852_v2  ;;  %5370 = vmatpush.msra.mxu0 %v5331_v7  ;;  %5855 = vmatpush.msrb.mxu2 %v5331_v7  ;;  %v5328_v7 = vld [vmem:[%s9354_s2 + $0x188] sm:$0xff] }
 0x749   : > { %v4831_v27 = vsub.f32 1.5, %v4830_v21 }
 0x74a   : > { %v6028_v33 = vpop.eup %6027  ;;  %v4870_v4 = vadd.f32 %v8947_v36, %v4861_v19 }
 0x74b   : > { %v4832_v30 = vmul.f32 %v6026_v17, %v4831_v27  ;;  %v4838_v23 = vmul.f32 %v6028_v33, %v4765_v39  ;;  %vm4844_vm10 = vweird.f32 %v6028_v33  ;;  %v5330_v39 = vld [vmem:[%s9354_s2 + $0x198] sm:$0xff]  ;;  %v9050_v27 = vld [vmem:[%s9356_s4 + $0x4] ss:$0 sm:$0xff] }
 0x74c   : > { %5815 = vmatmul.msk.f32.gmra.mxu2 %vm2878_vm1, %v4870_v4  ;;  %5823 = vmatmul.msk.f32.gmra.mxu3 %vm2878_vm1, %v4870_v4  ;;  %vm4845_vm3 = vmor %vm4843_vm2, %vm4844_vm10  ;;  %v5329_v4 = vld [vmem:[%s9354_s2 + $0x190] sm:$0xff] }
 0x74d   : > { %v4836_v6 = vsel %vm4835_vm0, %v6026_v17, %v4832_v30  ;;  %v4839_v20 = vmul.f32 %v6028_v33, %v4838_v23  ;;  %5371 = vmatpush.msra.mxu0 %v5330_v39  ;;  %5856 = vmatpush.msrb.mxu2 %v5330_v39 }
 0x74e   : > { %v4853_v55 = vmul.f32 %v4836_v6, %v8894_v40 }
 0x74f   : > { %v4840_v10 = vmul.f32 0.5, %v4839_v20  ;;  %5372 = vmatpush.msra.mxu0 %v5329_v4  ;;  %5857 = vmatpush.msrb.mxu2 %v5329_v4 }
 0x750   : > { %v4862_v12 = vmul.f32 %v8941_v52, %v4853_v55 }
 0x751   : > { %v4841_v60 = vsub.f32 1.5, %v4840_v10  ;;  %5373 = vmatpush.msra.mxu0 %v5328_v7  ;;  %5858 = vmatpush.msrb.mxu2 %v5328_v7 }
 0x752   : > { %v4871_v34 = vadd.f32 %v8947_v36, %v4862_v12 }
 0x753   : > { %v4842_v5 = vmul.f32 %v6028_v33, %v4841_v60 }
 0x754   : > { %5816 = vmatmul.msk.f32.gmra.mxu2 %vm2878_vm1, %v4871_v34  ;;  %5824 = vmatmul.msk.f32.gmra.mxu3 %vm2878_vm1, %v4871_v34 }
 0x755   : > { %v4846_v0 = vsel %vm4845_vm3, %v6028_v33, %v4842_v5 }
 0x756   : > { %v4854_v29 = vmul.f32 %v4846_v0, %v8900_v26 }
 0x758   : > { %v4863_v56 = vmul.f32 %v8941_v52, %v4854_v29 }
 0x75a   : > { %v4872_v40 = vadd.f32 %v8947_v36, %v4863_v56 }
 0x75c   : > { %5817 = vmatmul.msk.f32.gmra.mxu2 %vm2878_vm1, %v4872_v40  ;;  %5825 = vmatmul.msk.f32.gmra.mxu3 %vm2878_vm1, %v4872_v40 }
 0x7a7   : > { %v4975_v8 = vpop.f32.mrf.mxu3  ;;  %v4924_v30 = vpop.f32.mrf.mxu2 }
 0x7a8   : > { %v8994_v54 = vadd.f32 %v8991_v45, %v4975_v8  ;;  %v9065_v5 = vadd.f32 %v9050_v27, %v4924_v30 }
 0x7aa   : > { %v8997_v38 = vmul.f32 0.70710677, %v8994_v54 }
 0x7ac   : > { %v5031_v26 = vand.u32 2147483647, %v8997_v38  ;;  %vm5015_vm9 = vcmp.ge.f32.partialorder %v8997_v38, 0.0 }
 0x7ae   : > { %v5039_v52 = vmul.f32 0.3275911, %v5031_v26  ;;  %v5247_v2 = vsub.f32 0.0, %v5031_v26 }
 0x7af   : > { %v4978_v36 = vpop.f32.mrf.mxu3 }
 0x7b0   : > { %v5047_v28 = vadd.f32 1.0, %v5039_v52  ;;  %v9001_v25 = vadd.f32 %v8991_v45, %v4978_v36  ;;  %v5255_v55 = vmul.f32 %v5247_v2, %v5031_v26 }
 0x7b2   : > { %6029 = vrcp.f32 %v5047_v28  ;;  %v9004_v42 = vmul.f32 0.70710677, %v9001_v25  ;;  %v5066_v14 = vand.u32 2147483648, %v5047_v28  ;;  %v5064_v1 = vand.u32 2147483647, %v5047_v28 }
 0x7b3   : > { %vm5060_vm5 = vweird.f32 %v5047_v28  ;;  %v5263_v36 = vmul.f32 1.442695, %v5255_v55 }
 0x7b4   : > { %v9010_v31 = vand.u32 2147483647, %v9004_v42  ;;  %v5067_v59 = vor.u32 1.1754944e-38, %v5066_v14  ;;  %vm5065_vm7 = vcmp.eq.f32.partialorder %v5064_v1, 8.507059e+37  ;;  %vm5016_vm2 = vcmp.ge.f32.partialorder %v9004_v42, 0.0 }
 0x7b6   : > { %v5040_v57 = vmul.f32 0.3275911, %v9010_v31  ;;  %v5248_v29 = vsub.f32 0.0, %v9010_v31 }
 0x7b7   : > { %v4981_v62 = vpop.f32.mrf.mxu3 }
 0x7b8   : > { %v6030_v50 = vpop.eup %6029  ;;  %v9017_v47 = vadd.f32 %v8991_v45, %v4981_v62  ;;  %v9022_v15 = vadd.f32 1.0, %v5040_v57 }
 0x7b9   : > { %v5056_v18 = vmul.f32 %v6030_v50, %v5047_v28  ;;  %vm5061_vm4 = vweird.f32 %v6030_v50 }
 0x7ba   : > { %v9025_v51 = vmul.f32 0.70710677, %v9017_v47  ;;  %6031 = vrcp.f32 %v9022_v15  ;;  %vm5062_vm6 = vmor %vm5060_vm5, %vm5061_vm4  ;;  %v5081_v10 = vand.u32 2147483648, %v9022_v15  ;;  %v5079_v60 = vand.u32 2147483647, %v9022_v15 }
 0x7bb   : > { %v5057_v11 = vsub.f32 1.0, %v5056_v18  ;;  %vm5075_vm14 = vweird.f32 %v9022_v15  ;;  %v5256_v18 = vmul.f32 %v5248_v29, %v9010_v31 }
 0x7bc   : > { %v9032_v44 = vand.u32 2147483647, %v9025_v51  ;;  %v5082_v28 = vor.u32 1.1754944e-38, %v5081_v10  ;;  %vm5080_vm11 = vcmp.eq.f32.partialorder %v5079_v60, 8.507059e+37 }
 0x7bd   : > { %v5058_v48 = vmul.f32 %v6030_v50, %v5057_v11  ;;  %v9086_v11 = vmul.f32 0.5, %v8994_v54  ;;  %v4927_v54 = vpop.f32.mrf.mxu2 }
 0x7be   : > { %v5041_v24 = vmul.f32 0.3275911, %v9032_v44  ;;  %v5249_v30 = vsub.f32 0.0, %v9032_v44 }
 0x7bf   : > { %v5059_v9 = vadd.f32 %v6030_v50, %v5058_v48  ;;  %v4984_v17 = vpop.f32.mrf.mxu3 }
 0x7c0   : > { %v9038_v49 = vadd.f32 1.0, %v5041_v24  ;;  %v9041_v13 = vadd.f32 %v8991_v45, %v4984_v17  ;;  %v6032_v58 = vpop.eup %6031 }
 0x7c1   : > { %v5063_v43 = vsel %vm5062_vm6, %v6030_v50, %v5059_v9  ;;  %v5071_v19 = vmul.f32 %v6032_v58, %v9022_v15  ;;  %vm5076_vm8 = vweird.f32 %v6032_v58  ;;  %v6141_v9 = vmov -1.0  }
 0x7c2   : > { %v9043_v21 = vsel %vm5065_vm7, %v5067_v59, %v5063_v43  ;;  %6033 = vrcp.f32 %v9038_v49  ;;  %v9057_v6 = vmul.f32 0.70710677, %v9041_v13  ;;  %vm5077_vm12 = vmor %vm5075_vm14, %vm5076_vm8  ;;  %v5096_v48 = vand.u32 2147483648, %v9038_v49 }
 0x7c3   : > { %v5175_v33 = vmul.f32 1.0614054, %v9043_v21  ;;  %v5072_v23 = vsub.f32 1.0, %v5071_v19  ;;  %v5094_v31 = vand.u32 2147483647, %v9038_v49  ;;  %v5023_v17 = vsel %vm5015_vm9, 1.0, %v6141_v9 }
 0x7c4   : > { %v9062_v34 = vand.u32 2147483647, %v9057_v6  ;;  %v5265_v43 = vmul.f32 1.442695, %v5256_v18  ;;  %vm5090_vm15 = vweird.f32 %v9038_v49  ;;  %v5097_v4 = vor.u32 1.1754944e-38, %v5096_v48 }
 0x7c5   : > { %v5183_v20 = vadd.f32 -1.4531521, %v5175_v33  ;;  %v5073_v12 = vmul.f32 %v6032_v58, %v5072_v23  ;;  %v5327_v33 = vld [vmem:[%s9354_s2 + $0x180] sm:$0xff]  ;;  %vm5095_vm10 = vcmp.eq.f32.partialorder %v5094_v31, 8.507059e+37  ;;  %vm5017_vm8 = vcmp.ge.f32.partialorder %v9025_v51, 0.0 }
 0x7c6   : > { %v5042_v26 = vmul.f32 0.3275911, %v9062_v34  ;;  %5374 = vmatpush.msra.mxu0 %v5327_v33  ;;  %5859 = vmatpush.msrb.mxu2 %v5327_v33 }
 0x7c7   : > { %v5191_v0 = vmul.f32 %v5183_v20, %v9043_v21  ;;  %v4987_v56 = vpop.f32.mrf.mxu3  ;;  %v5074_v8 = vadd.f32 %v6032_v58, %v5073_v12 }
 0x7c8   : > { %v6034_v40 = vpop.eup %6033  ;;  %v9073_v57 = vadd.f32 1.0, %v5042_v26  ;;  %v9076_v62 = vadd.f32 %v8991_v45, %v4987_v56 }
 0x7c9   : > { %v5199_v52 = vadd.f32 1.4214138, %v5191_v0  ;;  %v5086_v46 = vmul.f32 %v6034_v40, %v9038_v49  ;;  %v5078_v53 = vsel %vm5077_vm12, %v6032_v58, %v5074_v8  ;;  %vm5091_vm13 = vweird.f32 %v6034_v40 }
 0x7ca   : > { %v9079_v16 = vsel %vm5080_vm11, %v5082_v28, %v5078_v53  ;;  %6035 = vrcp.f32 %v9073_v57  ;;  %v9096_v59 = vmul.f32 0.70710677, %v9076_v62  ;;  %vm5092_vm0 = vmor %vm5090_vm15, %vm5091_vm13  ;;  %v9110_v49 = vadd.f32 %v9050_v27, %v4927_v54 }
 0x7cb   : > { %v5207_v50 = vmul.f32 %v5199_v52, %v9043_v21  ;;  %v5087_v15 = vsub.f32 1.0, %v5086_v46  ;;  %v5176_v14 = vmul.f32 1.0614054, %v9079_v16  ;;  %6037 = vpow2.f32 %v5263_v36 }
 0x7cc   : > { %v9107_v23 = vand.u32 2147483647, %v9096_v59  ;;  %6039 = vpow2.f32 %v5265_v43  ;;  %v5257_v36 = vmul.f32 %v5249_v30, %v9032_v44  ;;  %v5109_v18 = vand.u32 2147483647, %v9073_v57 }
 0x7cd   : > { %v5215_v1 = vadd.f32 -0.28449672, %v5207_v50  ;;  %v5088_v24 = vmul.f32 %v6034_v40, %v5087_v15  ;;  %v5184_v39 = vadd.f32 -1.4531521, %v5176_v14  ;;  %v5111_v15 = vand.u32 2147483648, %v9073_v57 }
 0x7ce   : > { %v5043_v0 = vmul.f32 0.3275911, %v9107_v23  ;;  %v9134_v44 = vmul.f32 0.5, %v9001_v25  ;;  %v5267_v54 = vmul.f32 1.442695, %v5257_v36  ;;  %vm5105_vm4 = vweird.f32 %v9073_v57 }
 0x7cf   : > { %v5223_v58 = vmul.f32 %v5215_v1, %v9043_v21  ;;  %v5089_v2 = vadd.f32 %v6034_v40, %v5088_v24  ;;  %v4990_v19 = vpop.f32.mrf.mxu3  ;;  %v5192_v38 = vmul.f32 %v5184_v39, %v9079_v16  ;;  %v5024_v24 = vsel %vm5016_vm2, 1.0, %v6141_v9 }
 0x7d0   : > { %v6036_v10 = vpop.eup %6035  ;;  %v9116_v29 = vadd.f32 %v8991_v45, %v4990_v19  ;;  %v9124_v28 = vadd.f32 1.0, %v5043_v0  ;;  %v5112_v33 = vor.u32 1.1754944e-38, %v5111_v15  ;;  %vm5110_vm6 = vcmp.eq.f32.partialorder %v5109_v18, 8.507059e+37 }
 0x7d1   : > { %v5231_v20 = vadd.f32 0.2548296, %v5223_v58  ;;  %v5093_v55 = vsel %vm5092_vm0, %v6034_v40, %v5089_v2  ;;  %v5200_v12 = vadd.f32 1.4214138, %v5192_v38  ;;  %v5101_v26 = vmul.f32 %v6036_v10, %v9073_v57  ;;  %v6038_v52 = vpop.eup %6037 }
 0x7d2   : > { %v9112_v60 = vsel %vm5095_vm10, %v5097_v4, %v5093_v55  ;;  %6041 = vrcp.f32 %v9124_v28  ;;  %v9130_v7 = vmul.f32 0.70710677, %v9116_v29  ;;  %vm5106_vm3 = vweird.f32 %v6036_v10  ;;  %v6040_v2 = vpop.eup %6039 }
 0x7d3   : > { %v5239_v56 = vmul.f32 %v5231_v20, %v9043_v21  ;;  %v5177_v8 = vmul.f32 1.0614054, %v9112_v60  ;;  %v5208_v40 = vmul.f32 %v5200_v12, %v9079_v16  ;;  %v5102_v50 = vsub.f32 1.0, %v5101_v26  ;;  %vm5107_vm5 = vmor %vm5105_vm4, %vm5106_vm3 }
 0x7d4   : > { %v5250_v38 = vsub.f32 0.0, %v9062_v34  ;;  %v9143_v25 = vand.u32 2147483647, %v9130_v7  ;;  %v9148_v55 = vmul.f32 0.5, %v9017_v47  ;;  %6043 = vpow2.f32 %v5267_v54 }
 0x7d5   : > { %v5279_v46 = vmul.f32 %v6038_v52, %v5239_v56  ;;  %v5185_v53 = vadd.f32 -1.4531521, %v5177_v8  ;;  %v5216_v21 = vadd.f32 -0.28449672, %v5208_v40  ;;  %v5103_v1 = vmul.f32 %v6036_v10, %v5102_v50 }
 0x7d6   : > { %v5044_v12 = vmul.f32 0.3275911, %v9143_v25  ;;  %v5126_v18 = vand.u32 2147483648, %v9124_v28  ;;  %vm5120_vm9 = vweird.f32 %v9124_v28  ;;  %vm5018_vm15 = vcmp.ge.f32.partialorder %v9057_v6, 0.0 }
 0x7d7   : > { %v5287_v14 = vsub.f32 1.0, %v5279_v46  ;;  %v5193_v48 = vmul.f32 %v5185_v53, %v9112_v60  ;;  %v5224_v31 = vmul.f32 %v5216_v21, %v9079_v16  ;;  %v5104_v43 = vadd.f32 %v6036_v10, %v5103_v1  ;;  %v4993_v53 = vpop.f32.mrf.mxu3 }
 0x7d8   : > { %v6042_v20 = vpop.eup %6041  ;;  %v9157_v40 = vadd.f32 1.0, %v5044_v12  ;;  %vm5019_vm3 = vcmp.ge.f32.partialorder %v9096_v59, 0.0 }
 0x7d9   : > { %v5295_v39 = vmul.f32 %v5287_v14, %v5023_v17  ;;  %v5201_v58 = vadd.f32 1.4214138, %v5193_v48  ;;  %v5232_v19 = vadd.f32 0.2548296, %v5224_v31  ;;  %v5108_v30 = vsel %vm5107_vm5, %v6036_v10, %v5104_v43 }
 0x7da   : > { %v9150_v57 = vsel %vm5110_vm6, %v5112_v33, %v5108_v30  ;;  %v5116_v26 = vmul.f32 %v6042_v20, %v9124_v28  ;;  %v5258_v10 = vmul.f32 %v5250_v38, %v9062_v34  ;;  %6045 = vrcp.f32 %v9157_v40 }
 0x7db   : > { %v5303_v4 = vadd.f32 1.0, %v5295_v39  ;;  %v5209_v42 = vmul.f32 %v5201_v58, %v9112_v60  ;;  %v5240_v17 = vmul.f32 %v5232_v19, %v9079_v16  ;;  %v5178_v8 = vmul.f32 1.0614054, %v9150_v57  ;;  %v6044_v39 = vpop.eup %6043 }
 0x7dc   : > { %v5117_v46 = vsub.f32 1.0, %v5116_v26  ;;  %vm5121_vm7 = vweird.f32 %v6042_v20  ;;  %v5269_v14 = vmul.f32 1.442695, %v5258_v10  ;;  %v9168_v48 = vadd.f32 %v8991_v45, %v4993_v53 }
 0x7dd   : > { %v5311_v0 = vmul.f32 %v5303_v4, %v9086_v11  ;;  %v5217_v56 = vadd.f32 -0.28449672, %v5209_v42  ;;  %v5280_v52 = vmul.f32 %v6040_v2, %v5240_v17  ;;  %v5186_v36 = vadd.f32 -1.4531521, %v5178_v8  ;;  %vm5122_vm14 = vmor %vm5120_vm9, %vm5121_vm7  ;;  %v4930_v17 = vpop.f32.mrf.mxu2 }
 0x7de   : > { %v5124_v11 = vand.u32 2147483647, %v9124_v28  ;;  %v5118_v34 = vmul.f32 %v6042_v20, %v5117_v46  ;;  %v5127_v43 = vor.u32 1.1754944e-38, %v5126_v18  ;;  %v5251_v2 = vsub.f32 0.0, %v9107_v23 }
 0x7df   : > { %v5319_v47 = vmul.f32 %v5311_v0, %v9065_v5  ;;  %v5225_v16 = vmul.f32 %v5217_v56, %v9112_v60  ;;  %v5288_v50 = vsub.f32 1.0, %v5280_v52  ;;  %v5194_v15 = vmul.f32 %v5186_v36, %v9150_v57 }
 0x7e0   : > { %v5119_v54 = vadd.f32 %v6042_v20, %v5118_v34  ;;  %vm5125_vm12 = vcmp.eq.f32.partialorder %v5124_v11, 8.507059e+37  ;;  %v6046_v4 = vpop.eup %6045  ;;  %v5025_v28 = vsel %vm5017_vm8, 1.0, %v6141_v9  ;;  %6047 = vpow2.f32 %v5269_v14 }
 0x7e1   : > { %v5233_v21 = vadd.f32 0.2548296, %v5225_v16  ;;  %5826 = vmatmul.msk.f32.vlgmr.msra.gmra.mxu0 %vm2878_vm1, %v5319_v47  ;;  %v5296_v5 = vmul.f32 %v5288_v50, %v5024_v24  ;;  %v5202_v31 = vadd.f32 1.4214138, %v5194_v15  ;;  %v9174_v24 = vmul.f32 0.70710677, %v9168_v48  ;;  %v4996_v16 = vpop.f32.mrf.mxu3 }
 0x7e2   : > { %v5123_v38 = vsel %vm5122_vm14, %v6042_v20, %v5119_v54  ;;  %v5131_v20 = vmul.f32 %v6046_v4, %v9157_v40  ;;  %vm5136_vm11 = vweird.f32 %v6046_v4  ;;  %v5139_v36 = vand.u32 2147483647, %v9157_v40 }
 0x7e3   : > { %v5241_v1 = vmul.f32 %v5233_v21, %v9112_v60  ;;  %v5304_v58 = vadd.f32 1.0, %v5296_v5  ;;  %v5210_v33 = vmul.f32 %v5202_v31, %v9150_v57  ;;  %v9181_v42 = vsel %vm5125_vm12, %v5127_v43, %v5123_v38 }
 0x7e4   : > { %v9184_v30 = vand.u32 2147483647, %v9174_v24  ;;  %v5179_v56 = vmul.f32 1.0614054, %v9181_v42  ;;  %v5132_v47 = vsub.f32 1.0, %v5131_v20  ;;  %v5141_v46 = vand.u32 2147483648, %v9157_v40 }
 0x7e5   : > { %v5281_v19 = vmul.f32 %v6044_v39, %v5241_v1  ;;  %v5312_v60 = vmul.f32 %v5304_v58, %v9134_v44  ;;  %v5218_v0 = vadd.f32 -0.28449672, %v5210_v33  ;;  %v5259_v44 = vmul.f32 %v5251_v2, %v9107_v23  ;;  %v4933_v2 = vpop.f32.mrf.mxu2 }
 0x7e6   : > { %v5045_v51 = vmul.f32 0.3275911, %v9184_v30  ;;  %v5187_v10 = vadd.f32 -1.4531521, %v5179_v56  ;;  %v5133_v11 = vmul.f32 %v6046_v4, %v5132_v47  ;;  %v4931_v18 = vadd.f32 %v9050_v27, %v4930_v17  ;;  %v6048_v1 = vpop.eup %6047 }
 0x7e7   : > { %v5289_v12 = vsub.f32 1.0, %v5281_v19  ;;  %v5320_v8 = vmul.f32 %v5312_v60, %v9110_v49  ;;  %v5226_v52 = vmul.f32 %v5218_v0, %v9150_v57  ;;  %vm5135_vm13 = vweird.f32 %v9157_v40 }
 0x7e8   : > { %v9194_v53 = vadd.f32 1.0, %v5045_v51  ;;  %v5195_v23 = vmul.f32 %v5187_v10, %v9181_v42  ;;  %v9202_v21 = vadd.f32 %v8991_v45, %v4996_v16  ;;  %v5134_v14 = vadd.f32 %v6046_v4, %v5133_v11  ;;  %vm5137_vm0 = vmor %vm5135_vm13, %vm5136_vm11 }
 0x7e9   : > { %v5297_v26 = vmul.f32 %v5289_v12, %v5025_v28  ;;  %5827 = vmatmul.msk.f32.gmra.mxu0 %vm2878_vm1, %v5320_v8  ;;  %v5234_v50 = vadd.f32 0.2548296, %v5226_v52  ;;  %v5271_v31 = vmul.f32 1.442695, %v5259_v44  ;;  %vm5140_vm10 = vcmp.eq.f32.partialorder %v5139_v36, 8.507059e+37 }
 0x7ea   : > { %6049 = vrcp.f32 %v9194_v53  ;;  %v5203_v5 = vadd.f32 1.4214138, %v5195_v23  ;;  %v5142_v54 = vor.u32 1.1754944e-38, %v5141_v46  ;;  %v5138_v45 = vsel %vm5137_vm0, %v6046_v4, %v5134_v14 }
 0x7eb   : > { %v5305_v49 = vadd.f32 1.0, %v5297_v26  ;;  %v5242_v34 = vmul.f32 %v5234_v50, %v9150_v57  ;;  %v9213_v57 = vmul.f32 0.70710677, %v9202_v21  ;;  %v5026_v28 = vsel %vm5018_vm15, 1.0, %v6141_v9 }
 0x7ec   : > { %v5211_v58 = vmul.f32 %v5203_v5, %v9181_v42  ;;  %v9209_v43 = vsel %vm5140_vm10, %v5142_v54, %v5138_v45  ;;  %6051 = vpow2.f32 %v5271_v31  ;;  %v4934_v20 = vadd.f32 %v9050_v27, %v4933_v2 }
 0x7ed   : > { %v5313_v15 = vmul.f32 %v5305_v49, %v9148_v55  ;;  %v5282_v39 = vmul.f32 %v6048_v1, %v5242_v34  ;;  %v5252_v55 = vsub.f32 0.0, %v9143_v25  ;;  %v5180_v38 = vmul.f32 1.0614054, %v9209_v43  ;;  %v4936_v54 = vpop.f32.mrf.mxu2 }
 0x7ee   : > { %v5219_v33 = vadd.f32 -0.28449672, %v5211_v58  ;;  %v9220_v4 = vand.u32 2147483647, %v9213_v57  ;;  %v5002_v8 = vmul.f32 0.5, %v9041_v13  ;;  %v5156_v16 = vand.u32 2147483648, %v9194_v53 }
 0x7ef   : > { %v5321_v40 = vmul.f32 %v5313_v15, %v4931_v18  ;;  %v5290_v19 = vsub.f32 1.0, %v5282_v39  ;;  %v5188_v0 = vadd.f32 -1.4531521, %v5180_v38  ;;  %v5260_v44 = vmul.f32 %v5252_v55, %v9143_v25 }
 0x7f0   : > { %v6050_v60 = vpop.eup %6049  ;;  %v5227_v12 = vmul.f32 %v5219_v33, %v9181_v42  ;;  %v5046_v6 = vmul.f32 0.3275911, %v9220_v4  ;;  %v5154_v47 = vand.u32 2147483647, %v9194_v53  ;;  %vm5150_vm4 = vweird.f32 %v9194_v53 }
 0x7f1   : > { %5828 = vmatmul.msk.f32.gmra.mxu0 %vm2878_vm1, %v5321_v40  ;;  %v5298_v17 = vmul.f32 %v5290_v19, %v5026_v28  ;;  %v5146_v56 = vmul.f32 %v6050_v60, %v9194_v53  ;;  %v5196_v52 = vmul.f32 %v5188_v0, %v9209_v43  ;;  %vm5151_vm2 = vweird.f32 %v6050_v60 }
 0x7f2   : > { %v5235_v26 = vadd.f32 0.2548296, %v5227_v12  ;;  %v9232_v36 = vadd.f32 1.0, %v5046_v6  ;;  %v6052_v25 = vpop.eup %6051  ;;  %v5273_v23 = vmul.f32 1.442695, %v5260_v44  ;;  %vm5152_vm5 = vmor %vm5150_vm4, %vm5151_vm2  ;;  %v5157_v5 = vor.u32 1.1754944e-38, %v5156_v16 }
 0x7f3   : > { %v5306_v51 = vadd.f32 1.0, %v5298_v17  ;;  %v5147_v10 = vsub.f32 1.0, %v5146_v56  ;;  %v5204_v13 = vadd.f32 1.4214138, %v5196_v52  ;;  %vm5155_vm6 = vcmp.eq.f32.partialorder %v5154_v47, 8.507059e+37 }
 0x7f4   : > { %v5243_v49 = vmul.f32 %v5235_v26, %v9181_v42  ;;  %6053 = vrcp.f32 %v9232_v36  ;;  %v5027_v59 = vsel %vm5019_vm3, 1.0, %v6141_v9  ;;  %v5253_v31 = vsub.f32 0.0, %v9184_v30 }
 0x7f5   : > { %v5314_v46 = vmul.f32 %v5306_v51, %v5002_v8  ;;  %v5148_v50 = vmul.f32 %v6050_v60, %v5147_v10  ;;  %v5212_v15 = vmul.f32 %v5204_v13, %v9209_v43  ;;  %6055 = vpow2.f32 %v5273_v23  ;;  %v5425_v13 = vld [vmem:[%s9357_s5 + $0x38] sm:$0xff] }
 0x7f6   : > { %v5283_v18 = vmul.f32 %v6052_v25, %v5243_v49  ;;  %v5003_v55 = vmul.f32 0.5, %v9076_v62  ;;  %v5261_v28 = vmul.f32 %v5253_v31, %v9184_v30  ;;  %vm5020_vm7 = vcmp.ge.f32.partialorder %v9130_v7, 0.0  ;;  %v4939_v25 = vpop.f32.mrf.mxu2  ;;  %5460 = vmatpush.msra.mxu1 %v5425_v13  ;;  %v5422_v31 = vld [vmem:[%s9357_s5 + $0x20] sm:$0xff] }
 0x7f7   : > { %v5322_v11 = vmul.f32 %v5314_v46, %v4934_v20  ;;  %v5149_v34 = vadd.f32 %v6050_v60, %v5148_v50  ;;  %v5220_v42 = vadd.f32 -0.28449672, %v5212_v15  ;;  %v5169_v62 = vand.u32 2147483647, %v9232_v36  ;;  %v5424_v50 = vld [vmem:[%s9357_s5 + $0x30] sm:$0xff] }
 0x7f8   : > { %v5291_v14 = vsub.f32 1.0, %v5283_v18  ;;  %v5171_v8 = vand.u32 2147483648, %v9232_v36  ;;  %v5275_v52 = vmul.f32 1.442695, %v5261_v28  ;;  %vm5165_vm9 = vweird.f32 %v9232_v36  ;;  %5461 = vmatpush.msra.mxu1 %v5424_v50 }
 0x7f9   : > { %v5153_v1 = vsel %vm5152_vm5, %v6050_v60, %v5149_v34  ;;  %5829 = vmatmul.msk.f32.gmra.mxu0 %vm2878_vm1, %v5322_v11  ;;  %v5228_v39 = vmul.f32 %v5220_v42, %v9209_v43  ;;  %v4937_v60 = vadd.f32 %v9050_v27, %v4936_v54  ;;  %vm5170_vm12 = vcmp.eq.f32.partialorder %v5169_v62, 8.507059e+37 }
 0x7fa   : > { %v5158_v53 = vsel %vm5155_vm6, %v5157_v5, %v5153_v1  ;;  %v5299_v40 = vmul.f32 %v5291_v14, %v5027_v59  ;;  %v6054_v45 = vpop.eup %6053  ;;  %v5172_v7 = vor.u32 1.1754944e-38, %v5171_v8  ;;  %6057 = vpow2.f32 %v5275_v52  ;;  %v5423_v5 = vld [vmem:[%s9357_s5 + $0x28] sm:$0xff] }
 0x7fb   : > { %v5181_v58 = vmul.f32 1.0614054, %v5158_v53  ;;  %v5236_v19 = vadd.f32 0.2548296, %v5228_v39  ;;  %v5161_v38 = vmul.f32 %v6054_v45, %v9232_v36  ;;  %v6056_v20 = vpop.eup %6055  ;;  %vm5166_vm8 = vweird.f32 %v6054_v45  ;;  %5462 = vmatpush.msra.mxu1 %v5423_v5 }
 0x7fc   : > { %v5307_v2 = vadd.f32 1.0, %v5299_v40  ;;  %vm5167_vm14 = vmor %vm5165_vm9, %vm5166_vm8  ;;  %v5254_v23 = vsub.f32 0.0, %v9220_v4  ;;  %v5004_v11 = vmul.f32 0.5, %v9116_v29  ;;  %v4940_v14 = vadd.f32 %v9050_v27, %v4939_v25 }
 0x7fd   : > { %v5189_v33 = vadd.f32 -1.4531521, %v5181_v58  ;;  %v5244_v12 = vmul.f32 %v5236_v19, %v9209_v43  ;;  %v5162_v56 = vsub.f32 1.0, %v5161_v38  ;;  %v5028_v43 = vsel %vm5020_vm7, 1.0, %v6141_v9  ;;  %v5421_v58 = vld [vmem:[%s9357_s5 + $0x18] sm:$0xff]  ;;  %5463 = vmatpush.msra.mxu1 %v5422_v31  ;;  %v5419_v38 = vld [vmem:[%s9357_s5 + $0x8] sm:$0xff] }
 0x7fe   : > { %v5315_v17 = vmul.f32 %v5307_v2, %v5003_v55  ;;  %v5262_v54 = vmul.f32 %v5254_v23, %v9220_v4  ;;  %vm5021_vm11 = vcmp.ge.f32.partialorder %v9174_v24, 0.0  ;;  %v5420_v4 = vld [vmem:[%s9357_s5 + $0x10] sm:$0xff]  ;;  %vm5022_vm13 = vcmp.ge.f32.partialorder %v9213_v57, 0.0  ;;  %v5418_v57 = vld [vmem:[%s9357_s5] sm:$0xff] }
 0x7ff   : > { %v5197_v0 = vmul.f32 %v5189_v33, %v5158_v53  ;;  %v5284_v6 = vmul.f32 %v6056_v20, %v5244_v12  ;;  %v5163_v26 = vmul.f32 %v6054_v45, %v5162_v56  ;;  %5464 = vmatpush.msra.mxu1 %v5421_v58  ;;  %v5005_v12 = vmul.f32 0.5, %v9168_v48 }
 0x800   : > { %v5323_v44 = vmul.f32 %v5315_v17, %v4937_v60  ;;  %v5277_v19 = vmul.f32 1.442695, %v5262_v54  ;;  %v5029_v60 = vsel %vm5021_vm11, 1.0, %v6141_v9  ;;  %v4942_v17 = vpop.f32.mrf.mxu2  ;;  %v5006_v48 = vmul.f32 0.5, %v9202_v21 }
 0x801   : > { %v5205_v51 = vadd.f32 1.4214138, %v5197_v0  ;;  %v5292_v10 = vsub.f32 1.0, %v5284_v6  ;;  %v5164_v47 = vadd.f32 %v6054_v45, %v5163_v26  ;;  %5465 = vmatpush.msra.mxu1 %v5420_v4  ;;  %v4943_v20 = vadd.f32 %v9050_v27, %v4942_v17 }
 0x802   : > { %5830 = vmatmul.msk.f32.gmra.mxu0 %vm2878_vm1, %v5323_v44  ;;  %6059 = vpow2.f32 %v5277_v19 }
 0x803   : > { %v5213_v30 = vmul.f32 %v5205_v51, %v5158_v53  ;;  %v5300_v16 = vmul.f32 %v5292_v10, %v5028_v43  ;;  %v5168_v49 = vsel %vm5167_vm14, %v6054_v45, %v5164_v47  ;;  %v6058_v45 = vpop.eup %6057  ;;  %5466 = vmatpush.msra.mxu1 %v5419_v38  ;;  %v5030_v10 = vsel %vm5022_vm13, 1.0, %v6141_v9  ;;  %v5915_v9 = vld [vmem:[%s9356_s4 + $0x6] ss:$0 sm:$0xff] }
 0x804   : > { %v5173_v36 = vsel %vm5170_vm12, %v5172_v7, %v5168_v49 }
 0x805   : > { %v5221_v46 = vadd.f32 -0.28449672, %v5213_v30  ;;  %v5308_v18 = vadd.f32 1.0, %v5300_v16  ;;  %v5182_v34 = vmul.f32 1.0614054, %v5173_v36  ;;  %5467 = vmatpush.msra.mxu1 %v5418_v57 }
 0x807   : > { %v5229_v15 = vmul.f32 %v5221_v46, %v5158_v53  ;;  %v5316_v42 = vmul.f32 %v5308_v18, %v5004_v11  ;;  %v5190_v59 = vadd.f32 -1.4531521, %v5182_v34 }
 0x808   : > { %v6060_v51 = vpop.eup %6059  ;;  %v4945_v47 = vpop.f32.mrf.mxu2 }
 0x809   : > { %v5237_v1 = vadd.f32 0.2548296, %v5229_v15  ;;  %v5324_v29 = vmul.f32 %v5316_v42, %v4940_v14  ;;  %v5198_v39 = vmul.f32 %v5190_v59, %v5173_v36  ;;  %v4946_v7 = vadd.f32 %v9050_v27, %v4945_v47 }
 0x80b   : > { %v5245_v40 = vmul.f32 %v5237_v1, %v5158_v53  ;;  %v5206_v2 = vadd.f32 1.4214138, %v5198_v39  ;;  %5831 = vmatmul.msk.f32.gmra.mxu0 %vm2878_vm1, %v5324_v29 }
 0x80d   : > { %v5285_v55 = vmul.f32 %v6058_v45, %v5245_v40  ;;  %v5214_v33 = vmul.f32 %v5206_v2, %v5173_v36 }
 0x80f   : > { %v5293_v53 = vsub.f32 1.0, %v5285_v55  ;;  %v5222_v28 = vadd.f32 -0.28449672, %v5214_v33 }
 0x811   : > { %v5301_v24 = vmul.f32 %v5293_v53, %v5029_v60  ;;  %v5230_v56 = vmul.f32 %v5222_v28, %v5173_v36 }
 0x813   : > { %v5309_v0 = vadd.f32 1.0, %v5301_v24  ;;  %v5238_v8 = vadd.f32 0.2548296, %v5230_v56 }
 0x815   : > { %v5317_v62 = vmul.f32 %v5309_v0, %v5005_v12  ;;  %v5246_v6 = vmul.f32 %v5238_v8, %v5173_v36 }
 0x817   : > { %v5325_v44 = vmul.f32 %v5317_v62, %v4943_v20  ;;  %v5286_v26 = vmul.f32 %v6060_v51, %v5246_v6 }
 0x819   : > { %5832 = vmatmul.msk.f32.gmra.mxu0 %vm2878_vm1, %v5325_v44  ;;  %v5294_v52 = vsub.f32 1.0, %v5286_v26 }
 0x81b   : > { %v5302_v30 = vmul.f32 %v5294_v52, %v5030_v10 }
 0x81d   : > { %v5310_v43 = vadd.f32 1.0, %v5302_v30 }
 0x81f   : > { %v5318_v16 = vmul.f32 %v5310_v43, %v5006_v48 }
 0x821   : > { %v5326_v46 = vmul.f32 %v5318_v16, %v4946_v7 }
 0x823   : > { %5833 = vmatmul.msk.f32.vlgmr.msrb.gmra.mxu2 %vm2878_vm1, %v5326_v46 }
 0x85e   : > { %v5376_v49 = vpop.f32.mrf.mxu0 }
 0x85f   : > { %v5400_v13 = vadd.f32 %v5376_v49, %v8803_v41 }
 0x861   : > { %v5410_v21 = vadd.f32 %v5915_v9, %v5400_v13 }
 0x863   : > { %5834 = vmatmul.msk.f32.vlgmr.msra.gmra.mxu1 %vm2878_vm1, %v5410_v21 }
 0x866   : > { %v5379_v27 = vpop.f32.mrf.mxu0 }
 0x867   : > { %v5401_v50 = vadd.f32 %v5379_v27, %v8808_v37 }
 0x869   : > { %v5411_v25 = vadd.f32 %v5915_v9, %v5401_v50 }
 0x86b   : > { %5835 = vmatmul.msk.f32.gmra.mxu1 %vm2878_vm1, %v5411_v25 }
 0x86e   : > { %v5382_v36 = vpop.f32.mrf.mxu0 }
 0x86f   : > { %v5402_v23 = vadd.f32 %v5382_v36, %v8813_v61 }
 0x871   : > { %v5412_v11 = vadd.f32 %v5915_v9, %v5402_v23 }
 0x873   : > { %5836 = vmatmul.msk.f32.gmra.mxu1 %vm2878_vm1, %v5412_v11 }
 0x876   : > { %v5385_v18 = vpop.f32.mrf.mxu0 }
 0x877   : > { %v5403_v15 = vadd.f32 %v5385_v18, %v8818_v22 }
 0x879   : > { %v5413_v34 = vadd.f32 %v5915_v9, %v5403_v15 }
 0x87b   : > { %5837 = vmatmul.msk.f32.gmra.mxu1 %vm2878_vm1, %v5413_v34 }
 0x87f   : > { %v5388_v41 = vpop.f32.mrf.mxu0 }
 0x880   : > { %v5404_v5 = vadd.f32 %v5388_v41, %v8823_v35 }
 0x882   : > { %v5414_v37 = vadd.f32 %v5915_v9, %v5404_v5 }
 0x884   : > { %5838 = vmatmul.msk.f32.gmra.mxu1 %vm2878_vm1, %v5414_v37 }
 0x888   : > { %v5391_v14 = vpop.f32.mrf.mxu0 }
 0x889   : > { %v5405_v61 = vadd.f32 %v5391_v14, %v8828_v32  ;;  %v5916_v32 = vld [vmem:[%s9357_s5 + $0x40] ss:$0 sm:$0xff] }
 0x88b   : > { %v5415_v42 = vadd.f32 %v5915_v9, %v5405_v61 }
 0x88d   : > { %5839 = vmatmul.msk.f32.gmra.mxu1 %vm2878_vm1, %v5415_v42 }
 0x896   : > { %v5394_v1 = vpop.f32.mrf.mxu0 }
 0x897   : > { %v5406_v22 = vadd.f32 %v5394_v1, %v8833_v63 }
 0x899   : > { %v5416_v59 = vadd.f32 %v5915_v9, %v5406_v22 }
 0x89b   : > { %5840 = vmatmul.msk.f32.gmra.mxu1 %vm2878_vm1, %v5416_v59 }
 0x8a6   : > { %v5397_v31 = vpop.f32.mrf.mxu2 }
 0x8a7   : > { %v5407_v54 = vadd.f32 %v5397_v31, %v8838_v3 }
 0x8a9   : > { %v5417_v35 = vadd.f32 %v5915_v9, %v5407_v54 }
 0x8ab   : > { %5841 = vmatmul.msk.f32.gmra.mxu1 %vm2878_vm1, %v5417_v35 }
 0x8e0   : > { %v5469_v29 = vpop.f32.mrf.mxu1 }
 0x8e1   : > { %v5470_v40 = vadd.f32 %v5916_v32, %v5469_v29 }
 0x8e3   : > { %5493 = vst [vmem:[%s245_s26] sm:$0xff] %v5470_v40 }
 0x8e8   : > { %v5472_v63 = vpop.f32.mrf.mxu1 }
 0x8e9   : > { %v5473_v39 = vadd.f32 %v5916_v32, %v5472_v63 }
 0x8eb   : > { %5494 = vst [vmem:[%s245_s26 + $0x8] sm:$0xff] %v5473_v39 }
 0x8f0   : > { %v5475_v58 = vpop.f32.mrf.mxu1 }
 0x8f1   : > { %v5476_v3 = vadd.f32 %v5916_v32, %v5475_v58 }
 0x8f3   : > { %5495 = vst [vmem:[%s245_s26 + $0x10] sm:$0xff] %v5476_v3 }
 0x8f8   : > { %v5478_v45 = vpop.f32.mrf.mxu1 }
 0x8f9   : > { %v5479_v55 = vadd.f32 %v5916_v32, %v5478_v45 }
 0x8fb   : > { %5496 = vst [vmem:[%s245_s26 + $0x18] sm:$0xff] %v5479_v55 }
 0x901   : > { %v5481_v2 = vpop.f32.mrf.mxu1 }
 0x902   : > { %v5482_v4 = vadd.f32 %v5916_v32, %v5481_v2 }
 0x904   : > { %5497 = vst [vmem:[%s245_s26 + $0x20] sm:$0xff] %v5482_v4 }
 0x90a   : > { %v5484_v19 = vpop.f32.mrf.mxu1 }
 0x90b   : > { %v5485_v53 = vadd.f32 %v5916_v32, %v5484_v19 }
 0x90d   : > { %5498 = vst [vmem:[%s245_s26 + $0x28] sm:$0xff] %v5485_v53 }
 0x918   : > { %v5487_v33 = vpop.f32.mrf.mxu1 }
 0x919   : > { %v5488_v38 = vadd.f32 %v5916_v32, %v5487_v33 }
 0x91b   : > { %5499 = vst [vmem:[%s245_s26 + $0x30] sm:$0xff] %v5488_v38 }
 0x928   : > { %v5490_v60 = vpop.f32.mrf.mxu1 }
 0x929   : > { %v5491_v24 = vadd.f32 %v5916_v32, %v5490_v60 }
 0x92b   : > { %5500 = vst [vmem:[%s245_s26 + $0x38] sm:$0xff] %v5491_v24 }
 0x92c   : > { %6097 = shalt.err (!%p6094_p3)
}
 0x92d   : > { %s6142_s17 = smov 128   ;;  %s6143_s26 = smov 8  }
 0x92e   : > { %5860 = dma.vmem_to_hbm [thread:$0]  (%p6217_p5), %s5515_s11, 1024, %s5517_s12, %s5502_s13, %s6142_s17, %s6142_s17, %s6143_s26  }
 0x92f PF: > { %p5866_p4 = scmp.ge.s32.totalorder %s6132_s24, 2  ;;  %s5531_s28 = sand.u32 1, %s6120_s21  }
 0x930   : > { %s5532_s29 = scalar_lea.sflag [#allocation3], %s5531_s28 }
 0x931   : > { %p5863_p7 = pnand %p5866_p4, %p6221_p6 }
 0x933   : > { %p5864_p8 = pneg %p5863_p7 }
 0x935   : > { %6115 = dma.done.wait (%p5864_p8), %s5532_s29, 1024  }
 0x936   : > { %6117 = vsyncadd (%p5864_p8), %s5532_s29, 4294966272  ;;  %p16_p9 = scmp.ge.s32.totalorder %s6204_s27, 4   ;;  %s9493_s21 = smov %s6124_s22 }
 0x937   : > { %s9494_s22 = smov %s6128_s23  ;;  %s9495_s23 = smov %s6215_s30 }
 0x938   : > { %s9496_s24 = smov %s6204_s27  ;;  %18 = sbr.rel (!%p16_p9) target bundleno = 3 (0x3), region = 79 }
 0x93d   :  { %5538 = vsyncpa [#allocation3], 1 }
 0x93e   :  { %5540 = vsyncpa [#allocation3 + $0x1], 1 }

</bundles_post_ra>
